<compile_context>
chip_gen: v5e
topology: v5e:2x2
jax: 0.10.0
libtpu: 0.0.40
codegen_flags: <defaults>
</compile_context>

<pallas_src>
import jax
import jax.numpy as jnp
from jax.experimental import pallas as pl
from jax.experimental.pallas import tpu as pltpu


# ----------------------------------------------------------------------------
# Fused Pallas kernel (one grid step per batch sample)
# ----------------------------------------------------------------------------

def _cnn_net3_kernel(x_ref, w1_ref, b1_ref, w2_ref, b2_ref, wfc1_ref,
                     bfc1_ref, wfc2_ref, bfc2_ref, o_ref):
    P = 196  # 14*14 spatial positions, kept on the lane axis

    # ---- conv1 (1x1) + relu  (max_pool2d(kernel=1) is identity) ----
    x = x_ref[...]                                                     # [3, 196] f32
    h1 = jnp.dot(w1_ref[...], x, preferred_element_type=jnp.float32)   # [8, 196]
    h1 = jnp.maximum(h1 + b1_ref[...], 0.0)

    # ---- conv2 (2x2, valid) + relu ----
    # Shifted copies of h1 are built with constant 0/1 shift matrices
    # (iota compare -> matmul), so everything stays plain matmuls on
    # VMEM-resident data.  Columns belonging to invalid output pixels
    # (h == 13 or w == 13) hold junk; the fc1 weight slab has zero rows at
    # those positions, so they contribute exactly 0 downstream.
    q = jax.lax.broadcasted_iota(jnp.int32, (P, P), 0)
    p = jax.lax.broadcasted_iota(jnp.int32, (P, P), 1)
    acc = jnp.dot(w2_ref[0], h1, preferred_element_type=jnp.float32)   # (kh,kw)=(0,0)
    for k, s in ((1, 1), (2, 14), (3, 15)):                            # s = kh*14 + kw
        shift = (q == p + s).astype(jnp.float32)                       # [196, 196]
        h1s = jnp.dot(h1, shift, preferred_element_type=jnp.float32)   # h1s[:, j] = h1[:, j+s]
        acc = acc + jnp.dot(w2_ref[k], h1s, preferred_element_type=jnp.float32)
    h2 = jnp.maximum(acc + b2_ref[...], 0.0)                           # [32, 196]

    # TODO(synk): Dropout2d is identity here (eval-mode / deterministic inference).

    # ---- fc1 + relu : contraction over (channel, pixel) ----
    # One [1,196] x [196,128] bf16 dot per channel against the pre-permuted,
    # zero-padded, lane-dense weight slab; f32 accumulation.
    h2b = h2.astype(jnp.bfloat16)
    f1 = jnp.zeros((1, 128), jnp.float32)
    for c in range(32):
        f1 = f1 + jnp.dot(h2b[c:c + 1, :], wfc1_ref[c],
                          preferred_element_type=jnp.float32)
    f1 = jnp.maximum(f1 + bfc1_ref[...], 0.0)                          # [1,128]; cols 100.. == 0

    # ---- fc2 + relu + log_softmax (14 classes) ----
    z = jnp.dot(f1, wfc2_ref[...], preferred_element_type=jnp.float32) + bfc2_ref[...]
    z = jnp.maximum(z, 0.0)                                            # [1, 14]
    m = jnp.max(z, axis=-1, keepdims=True)
    zc = z - m
    lse = jnp.log(jnp.sum(jnp.exp(zc), axis=-1, keepdims=True))
    o_ref[...] = zc - lse


# ----------------------------------------------------------------------------
# Parameter init (PyTorch-shaped) + one-time kernel-layout preparation
# ----------------------------------------------------------------------------

def init_params(key):
    ks = jax.random.split(key, 8)
    scale = 0.05
    return {
        "w1":   scale * jax.random.normal(ks[0], (8, 3, 1, 1), jnp.float32),
        "b1":   scale * jax.random.normal(ks[1], (8,), jnp.float32),
        "w2":   scale * jax.random.normal(ks[2], (32, 8, 2, 2), jnp.float32),
        "b2":   scale * jax.random.normal(ks[3], (32,), jnp.float32),
        "wfc1": scale * jax.random.normal(ks[4], (100, 5408), jnp.float32),
        "bfc1": scale * jax.random.normal(ks[5], (100,), jnp.float32),
        "wfc2": scale * jax.random.normal(ks[6], (14, 100), jnp.float32),
        "bfc2": scale * jax.random.normal(ks[7], (14,), jnp.float32),
    }


def prepare_params(params):
    """One-time re-layout of the PyTorch-shaped weights into kernel layout."""
    w1p = params["w1"].reshape(8, 3)                                   # [cout, cin]
    b1p = params["b1"].reshape(8, 1)
    # conv2 weights grouped per kernel offset k = kh*2 + kw -> [4, cout, cin]
    w2p = jnp.transpose(params["w2"], (2, 3, 0, 1)).reshape(4, 32, 8)
    b2p = params["b2"].reshape(32, 1)
    # fc1 weight: [100, 32*13*13] (f, c, h, w) -> [c, h14, w14, f128] with zero
    # rows at the invalid (h==13 or w==13) positions and zero output columns
    # 100..127, stored bf16.  Shape [32, 196, 128].
    w = params["wfc1"].reshape(100, 32, 13, 13)
    w = jnp.transpose(w, (1, 2, 3, 0))                                 # [32,13,13,100]
    w = jnp.pad(w, ((0, 0), (0, 1), (0, 1), (0, 28)))                  # [32,14,14,128]
    wfc1p = w.reshape(32, 196, 128).astype(jnp.bfloat16)
    bfc1p = jnp.pad(params["bfc1"], (0, 28)).reshape(1, 128)
    wfc2p = jnp.pad(params["wfc2"].T, ((0, 28), (0, 0)))               # [128, 14]
    bfc2p = params["bfc2"].reshape(1, 14)
    return dict(w1=w1p, b1=b1p, w2=w2p, b2=b2p,
                wfc1=wfc1p, bfc1=bfc1p, wfc2=wfc2p, bfc2=bfc2p)


# ----------------------------------------------------------------------------
# Forward pass (single fused pallas_call)
# ----------------------------------------------------------------------------

@jax.jit
def cnn_net3_forward(prepped, x):
    """x: [B, 3, 14, 14] (NCHW, matching the PyTorch module). Returns [B, 14]."""
    B, C, H, W = x.shape
    assert (C, H, W) == (3, 14, 14)
    x3 = x.reshape(B, 3, H * W)        # free reshape: NCHW with spatial flattened

    out = pl.pallas_call(
        _cnn_net3_kernel,
        out_shape=jax.ShapeDtypeStruct((B, 1, 14), jnp.float32),
        grid_spec=pltpu.PrefetchScalarGridSpec(
            num_scalar_prefetch=0,
            grid=(B,),
            in_specs=[
                pl.BlockSpec((None, 3, 196),   lambda b: (b, 0, 0)),   # x (per sample)
                pl.BlockSpec((8, 3),           lambda b: (0, 0)),      # conv1 w
                pl.BlockSpec((8, 1),           lambda b: (0, 0)),      # conv1 b
                pl.BlockSpec((4, 32, 8),       lambda b: (0, 0, 0)),   # conv2 w
                pl.BlockSpec((32, 1),          lambda b: (0, 0)),      # conv2 b
                pl.BlockSpec((32, 196, 128),   lambda b: (0, 0, 0)),   # fc1 w (resident, bf16)
                pl.BlockSpec((1, 128),         lambda b: (0, 0)),      # fc1 b
                pl.BlockSpec((128, 14),        lambda b: (0, 0)),      # fc2 w
                pl.BlockSpec((1, 14),          lambda b: (0, 0)),      # fc2 b
            ],
            out_specs=pl.BlockSpec((None, 1, 14), lambda b: (b, 0, 0)),
        ),
        compiler_params=pltpu.CompilerParams(
            dimension_semantics=("parallel",)),   # samples are independent
    )(x3, prepped["w1"], prepped["b1"], prepped["w2"], prepped["b2"],
      prepped["wfc1"], prepped["bfc1"], prepped["wfc2"], prepped["bfc2"])
    return out.reshape(B, 14)


# ----------------------------------------------------------------------------
# Plain-JAX f32 reference of the PyTorch module (for correctness check)
# ----------------------------------------------------------------------------

def reference_forward(params, x):
    B = x.shape[0]
    w1 = params["w1"].reshape(8, 3)
    h1 = jnp.einsum("oc,bchw->bohw", w1, x) + params["b1"][None, :, None, None]
    h1 = jnp.maximum(h1, 0.0)
    h2 = jnp.zeros((B, 32, 13, 13), jnp.float32)
    for kh in range(2):
        for kw in range(2):
            h2 = h2 + jnp.einsum("oi,bihw->bohw", params["w2"][:, :, kh, kw],
                                 h1[:, :, kh:kh + 13, kw:kw + 13])
    h2 = jnp.maximum(h2 + params["b2"][None, :, None, None], 0.0)
    flat = h2.reshape(B, 5408)                                        # PyTorch (c,h,w) order
    f1 = jnp.maximum(flat @ params["wfc1"].T + params["bfc1"], 0.0)
    z = jnp.maximum(f1 @ params["wfc2"].T + params["bfc2"], 0.0)
    return jax.nn.log_softmax(z, axis=1)


# ----------------------------------------------------------------------------
# Main
# ----------------------------------------------------------------------------

if __name__ == "__main__":
    key = jax.random.PRNGKey(0)
    pkey, xkey = jax.random.split(key)
    params = init_params(pkey)
    prepped = prepare_params(params)   # one-time weight re-layout (not per call)

    # Input consistent with the module: 5408 = 32*13*13 -> 3x14x14 input.
    B = 2
    x = jax.random.normal(xkey, (B, 3, 14, 14), jnp.float32)

    out = cnn_net3_forward(prepped, x)
    out = jax.block_until_ready(out)
    assert out.shape == (B, 14)

    # log_softmax rows should exponentiate-sum to 1
    row_sums = jnp.exp(out).sum(axis=1)
    assert bool(jnp.all(jnp.abs(row_sums - 1.0) < 1e-4)), "log_softmax rows off"

    # cross-check against the plain-JAX f32 reference (bf16 fc1 weights -> loose tol)
    ref = reference_forward(params, x)
    max_err = float(jnp.max(jnp.abs(out - ref)))
    assert max_err < 3e-2, f"mismatch vs reference: {max_err}"

    print("KERNEL_OK")
</pallas_src>

<mosaic_0001>
module attributes {stable_mosaic.version = 11 : i64} {
  func.func @_cnn_net3_kernel(%arg0: i32, %arg1: memref<1x3x196xf32, #tpu.memory_space<vmem>>, %arg2: memref<8x3xf32, #tpu.memory_space<vmem>>, %arg3: memref<8x1xf32, #tpu.memory_space<vmem>>, %arg4: memref<4x32x8xf32, #tpu.memory_space<vmem>>, %arg5: memref<32x1xf32, #tpu.memory_space<vmem>>, %arg6: memref<32x196x128xbf16, #tpu.memory_space<vmem>>, %arg7: memref<1x128xf32, #tpu.memory_space<vmem>>, %arg8: memref<128x14xf32, #tpu.memory_space<vmem>>, %arg9: memref<1x14xf32, #tpu.memory_space<vmem>>, %arg10: memref<1x1x14xf32, #tpu.memory_space<vmem>>) attributes {dimension_semantics = [#tpu.dimension_semantics<parallel>], iteration_bounds = array<i64: 2>, scalar_prefetch = 0 : i64, scratch_operands = 0 : i64, tpu.core_type = #tpu.core_type<tc>, window_params = [{transform_indices = @transform_0, window_bounds = array<i64: 1, 3, 196>}, {pipeline_mode = #tpu.pipeline_mode<synchronous>, transform_indices = @transform_1, window_bounds = array<i64: 8, 3>}, {pipeline_mode = #tpu.pipeline_mode<synchronous>, transform_indices = @transform_2, window_bounds = array<i64: 8, 1>}, {pipeline_mode = #tpu.pipeline_mode<synchronous>, transform_indices = @transform_3, window_bounds = array<i64: 4, 32, 8>}, {pipeline_mode = #tpu.pipeline_mode<synchronous>, transform_indices = @transform_4, window_bounds = array<i64: 32, 1>}, {pipeline_mode = #tpu.pipeline_mode<synchronous>, transform_indices = @transform_5, window_bounds = array<i64: 32, 196, 128>}, {pipeline_mode = #tpu.pipeline_mode<synchronous>, transform_indices = @transform_6, window_bounds = array<i64: 1, 128>}, {pipeline_mode = #tpu.pipeline_mode<synchronous>, transform_indices = @transform_7, window_bounds = array<i64: 128, 14>}, {pipeline_mode = #tpu.pipeline_mode<synchronous>, transform_indices = @transform_8, window_bounds = array<i64: 1, 14>}, {transform_indices = @transform_9, window_bounds = array<i64: 1, 1, 14>}]} {
    %c0 = arith.constant 0 : index
    %c0_0 = arith.constant 0 : index
    %c0_1 = arith.constant 0 : index
    %0 = vector.load %arg1[%c0, %c0_0, %c0_1] : memref<1x3x196xf32, #tpu.memory_space<vmem>>, vector<1x3x196xf32>
    %1 = vector.shape_cast %0 : vector<1x3x196xf32> to vector<3x196xf32>
    %c0_2 = arith.constant 0 : index
    %c0_3 = arith.constant 0 : index
    %2 = vector.load %arg2[%c0_2, %c0_3] : memref<8x3xf32, #tpu.memory_space<vmem>>, vector<8x3xf32>
    %cst = arith.constant dense<0.000000e+00> : vector<8x196xf32>
    %3 = tpu.matmul %2, %1, %cst {dimension_numbers = #tpu.dot_dimension_numbers<[1], [0], [0], [1], [0, 0, 1, 1], [], []>} : vector<8x3xf32>, vector<3x196xf32>, vector<8x196xf32> -> vector<8x196xf32>
    %c0_4 = arith.constant 0 : index
    %c0_5 = arith.constant 0 : index
    %4 = vector.load %arg3[%c0_4, %c0_5] : memref<8x1xf32, #tpu.memory_space<vmem>>, vector<8x1xf32>
    %5 = vector.broadcast %4 : vector<8x1xf32> to vector<8x196xf32>
    %6 = arith.addf %3, %5 : vector<8x196xf32>
    %cst_6 = arith.constant 0.000000e+00 : f32
    %7 = vector.broadcast %cst_6 : f32 to vector<8x196xf32>
    %8 = arith.maximumf %6, %7 : vector<8x196xf32>
    %9 = tpu.iota {dimensions = array<i32: 0>} : vector<196x196xi32>
    %10 = tpu.iota {dimensions = array<i32: 1>} : vector<196x196xi32>
    %c0_7 = arith.constant 0 : index
    %c0_8 = arith.constant 0 : index
    %c0_9 = arith.constant 0 : index
    %11 = vector.load %arg4[%c0_7, %c0_8, %c0_9] : memref<4x32x8xf32, #tpu.memory_space<vmem>>, vector<1x32x8xf32>
    %12 = vector.shape_cast %11 : vector<1x32x8xf32> to vector<32x8xf32>
    %cst_10 = arith.constant dense<0.000000e+00> : vector<32x196xf32>
    %13 = tpu.matmul %12, %8, %cst_10 {dimension_numbers = #tpu.dot_dimension_numbers<[1], [0], [0], [1], [0, 0, 1, 1], [], []>} : vector<32x8xf32>, vector<8x196xf32>, vector<32x196xf32> -> vector<32x196xf32>
    %c1_i32 = arith.constant 1 : i32
    %14 = vector.broadcast %c1_i32 : i32 to vector<196x196xi32>
    %15 = arith.addi %10, %14 : vector<196x196xi32>
    %16 = arith.cmpi eq, %9, %15 : vector<196x196xi32>
    %17 = arith.extui %16 : vector<196x196xi1> to vector<196x196xi32>
    %18 = arith.sitofp %17 : vector<196x196xi32> to vector<196x196xf32>
    %cst_11 = arith.constant dense<0.000000e+00> : vector<8x196xf32>
    %19 = tpu.matmul %8, %18, %cst_11 {dimension_numbers = #tpu.dot_dimension_numbers<[1], [0], [0], [1], [0, 0, 1, 1], [], []>} : vector<8x196xf32>, vector<196x196xf32>, vector<8x196xf32> -> vector<8x196xf32>
    %c1 = arith.constant 1 : index
    %c0_12 = arith.constant 0 : index
    %c0_13 = arith.constant 0 : index
    %20 = vector.load %arg4[%c1, %c0_12, %c0_13] : memref<4x32x8xf32, #tpu.memory_space<vmem>>, vector<1x32x8xf32>
    %21 = vector.shape_cast %20 : vector<1x32x8xf32> to vector<32x8xf32>
    %cst_14 = arith.constant dense<0.000000e+00> : vector<32x196xf32>
    %22 = tpu.matmul %21, %19, %cst_14 {dimension_numbers = #tpu.dot_dimension_numbers<[1], [0], [0], [1], [0, 0, 1, 1], [], []>} : vector<32x8xf32>, vector<8x196xf32>, vector<32x196xf32> -> vector<32x196xf32>
    %23 = arith.addf %13, %22 : vector<32x196xf32>
    %c14_i32 = arith.constant 14 : i32
    %24 = vector.broadcast %c14_i32 : i32 to vector<196x196xi32>
    %25 = arith.addi %10, %24 : vector<196x196xi32>
    %26 = arith.cmpi eq, %9, %25 : vector<196x196xi32>
    %27 = arith.extui %26 : vector<196x196xi1> to vector<196x196xi32>
    %28 = arith.sitofp %27 : vector<196x196xi32> to vector<196x196xf32>
    %cst_15 = arith.constant dense<0.000000e+00> : vector<8x196xf32>
    %29 = tpu.matmul %8, %28, %cst_15 {dimension_numbers = #tpu.dot_dimension_numbers<[1], [0], [0], [1], [0, 0, 1, 1], [], []>} : vector<8x196xf32>, vector<196x196xf32>, vector<8x196xf32> -> vector<8x196xf32>
    %c2 = arith.constant 2 : index
    %c0_16 = arith.constant 0 : index
    %c0_17 = arith.constant 0 : index
    %30 = vector.load %arg4[%c2, %c0_16, %c0_17] : memref<4x32x8xf32, #tpu.memory_space<vmem>>, vector<1x32x8xf32>
    %31 = vector.shape_cast %30 : vector<1x32x8xf32> to vector<32x8xf32>
    %cst_18 = arith.constant dense<0.000000e+00> : vector<32x196xf32>
    %32 = tpu.matmul %31, %29, %cst_18 {dimension_numbers = #tpu.dot_dimension_numbers<[1], [0], [0], [1], [0, 0, 1, 1], [], []>} : vector<32x8xf32>, vector<8x196xf32>, vector<32x196xf32> -> vector<32x196xf32>
    %33 = arith.addf %23, %32 : vector<32x196xf32>
    %c15_i32 = arith.constant 15 : i32
    %34 = vector.broadcast %c15_i32 : i32 to vector<196x196xi32>
    %35 = arith.addi %10, %34 : vector<196x196xi32>
    %36 = arith.cmpi eq, %9, %35 : vector<196x196xi32>
    %37 = arith.extui %36 : vector<196x196xi1> to vector<196x196xi32>
    %38 = arith.sitofp %37 : vector<196x196xi32> to vector<196x196xf32>
    %cst_19 = arith.constant dense<0.000000e+00> : vector<8x196xf32>
    %39 = tpu.matmul %8, %38, %cst_19 {dimension_numbers = #tpu.dot_dimension_numbers<[1], [0], [0], [1], [0, 0, 1, 1], [], []>} : vector<8x196xf32>, vector<196x196xf32>, vector<8x196xf32> -> vector<8x196xf32>
    %c3 = arith.constant 3 : index
    %c0_20 = arith.constant 0 : index
    %c0_21 = arith.constant 0 : index
    %40 = vector.load %arg4[%c3, %c0_20, %c0_21] : memref<4x32x8xf32, #tpu.memory_space<vmem>>, vector<1x32x8xf32>
    %41 = vector.shape_cast %40 : vector<1x32x8xf32> to vector<32x8xf32>
    %cst_22 = arith.constant dense<0.000000e+00> : vector<32x196xf32>
    %42 = tpu.matmul %41, %39, %cst_22 {dimension_numbers = #tpu.dot_dimension_numbers<[1], [0], [0], [1], [0, 0, 1, 1], [], []>} : vector<32x8xf32>, vector<8x196xf32>, vector<32x196xf32> -> vector<32x196xf32>
    %43 = arith.addf %33, %42 : vector<32x196xf32>
    %c0_23 = arith.constant 0 : index
    %c0_24 = arith.constant 0 : index
    %44 = vector.load %arg5[%c0_23, %c0_24] : memref<32x1xf32, #tpu.memory_space<vmem>>, vector<32x1xf32>
    %45 = vector.broadcast %44 : vector<32x1xf32> to vector<32x196xf32>
    %46 = arith.addf %43, %45 : vector<32x196xf32>
    %cst_25 = arith.constant 0.000000e+00 : f32
    %47 = vector.broadcast %cst_25 : f32 to vector<32x196xf32>
    %48 = arith.maximumf %46, %47 : vector<32x196xf32>
    %49 = arith.truncf %48 : vector<32x196xf32> to vector<32x196xbf16>
    %cst_26 = arith.constant 0.000000e+00 : f32
    %50 = vector.broadcast %cst_26 : f32 to vector<1x128xf32>
    %51 = vector.extract_strided_slice %49 {offsets = [0, 0], sizes = [1, 196], strides = [1, 1]} : vector<32x196xbf16> to vector<1x196xbf16>
    %c0_27 = arith.constant 0 : index
    %c0_28 = arith.constant 0 : index
    %c0_29 = arith.constant 0 : index
    %52 = vector.load %arg6[%c0_27, %c0_28, %c0_29] : memref<32x196x128xbf16, #tpu.memory_space<vmem>>, vector<1x196x128xbf16>
    %53 = vector.shape_cast %52 : vector<1x196x128xbf16> to vector<196x128xbf16>
    %cst_30 = arith.constant dense<0.000000e+00> : vector<1x128xf32>
    %54 = tpu.matmul %51, %53, %cst_30 {dimension_numbers = #tpu.dot_dimension_numbers<[1], [0], [0], [1], [0, 0, 1, 1], [], []>} : vector<1x196xbf16>, vector<196x128xbf16>, vector<1x128xf32> -> vector<1x128xf32>
    %55 = arith.addf %50, %54 : vector<1x128xf32>
    %56 = vector.extract_strided_slice %49 {offsets = [1, 0], sizes = [1, 196], strides = [1, 1]} : vector<32x196xbf16> to vector<1x196xbf16>
    %c1_31 = arith.constant 1 : index
    %c0_32 = arith.constant 0 : index
    %c0_33 = arith.constant 0 : index
    %57 = vector.load %arg6[%c1_31, %c0_32, %c0_33] : memref<32x196x128xbf16, #tpu.memory_space<vmem>>, vector<1x196x128xbf16>
    %58 = vector.shape_cast %57 : vector<1x196x128xbf16> to vector<196x128xbf16>
    %cst_34 = arith.constant dense<0.000000e+00> : vector<1x128xf32>
    %59 = tpu.matmul %56, %58, %cst_34 {dimension_numbers = #tpu.dot_dimension_numbers<[1], [0], [0], [1], [0, 0, 1, 1], [], []>} : vector<1x196xbf16>, vector<196x128xbf16>, vector<1x128xf32> -> vector<1x128xf32>
    %60 = arith.addf %55, %59 : vector<1x128xf32>
    %61 = vector.extract_strided_slice %49 {offsets = [2, 0], sizes = [1, 196], strides = [1, 1]} : vector<32x196xbf16> to vector<1x196xbf16>
    %c2_35 = arith.constant 2 : index
    %c0_36 = arith.constant 0 : index
    %c0_37 = arith.constant 0 : index
    %62 = vector.load %arg6[%c2_35, %c0_36, %c0_37] : memref<32x196x128xbf16, #tpu.memory_space<vmem>>, vector<1x196x128xbf16>
    %63 = vector.shape_cast %62 : vector<1x196x128xbf16> to vector<196x128xbf16>
    %cst_38 = arith.constant dense<0.000000e+00> : vector<1x128xf32>
    %64 = tpu.matmul %61, %63, %cst_38 {dimension_numbers = #tpu.dot_dimension_numbers<[1], [0], [0], [1], [0, 0, 1, 1], [], []>} : vector<1x196xbf16>, vector<196x128xbf16>, vector<1x128xf32> -> vector<1x128xf32>
    %65 = arith.addf %60, %64 : vector<1x128xf32>
    %66 = vector.extract_strided_slice %49 {offsets = [3, 0], sizes = [1, 196], strides = [1, 1]} : vector<32x196xbf16> to vector<1x196xbf16>
    %c3_39 = arith.constant 3 : index
    %c0_40 = arith.constant 0 : index
    %c0_41 = arith.constant 0 : index
    %67 = vector.load %arg6[%c3_39, %c0_40, %c0_41] : memref<32x196x128xbf16, #tpu.memory_space<vmem>>, vector<1x196x128xbf16>
    %68 = vector.shape_cast %67 : vector<1x196x128xbf16> to vector<196x128xbf16>
    %cst_42 = arith.constant dense<0.000000e+00> : vector<1x128xf32>
    %69 = tpu.matmul %66, %68, %cst_42 {dimension_numbers = #tpu.dot_dimension_numbers<[1], [0], [0], [1], [0, 0, 1, 1], [], []>} : vector<1x196xbf16>, vector<196x128xbf16>, vector<1x128xf32> -> vector<1x128xf32>
    %70 = arith.addf %65, %69 : vector<1x128xf32>
    %71 = vector.extract_strided_slice %49 {offsets = [4, 0], sizes = [1, 196], strides = [1, 1]} : vector<32x196xbf16> to vector<1x196xbf16>
    %c4 = arith.constant 4 : index
    %c0_43 = arith.constant 0 : index
    %c0_44 = arith.constant 0 : index
    %72 = vector.load %arg6[%c4, %c0_43, %c0_44] : memref<32x196x128xbf16, #tpu.memory_space<vmem>>, vector<1x196x128xbf16>
    %73 = vector.shape_cast %72 : vector<1x196x128xbf16> to vector<196x128xbf16>
    %cst_45 = arith.constant dense<0.000000e+00> : vector<1x128xf32>
    %74 = tpu.matmul %71, %73, %cst_45 {dimension_numbers = #tpu.dot_dimension_numbers<[1], [0], [0], [1], [0, 0, 1, 1], [], []>} : vector<1x196xbf16>, vector<196x128xbf16>, vector<1x128xf32> -> vector<1x128xf32>
    %75 = arith.addf %70, %74 : vector<1x128xf32>
    %76 = vector.extract_strided_slice %49 {offsets = [5, 0], sizes = [1, 196], strides = [1, 1]} : vector<32x196xbf16> to vector<1x196xbf16>
    %c5 = arith.constant 5 : index
    %c0_46 = arith.constant 0 : index
    %c0_47 = arith.constant 0 : index
    %77 = vector.load %arg6[%c5, %c0_46, %c0_47] : memref<32x196x128xbf16, #tpu.memory_space<vmem>>, vector<1x196x128xbf16>
    %78 = vector.shape_cast %77 : vector<1x196x128xbf16> to vector<196x128xbf16>
    %cst_48 = arith.constant dense<0.000000e+00> : vector<1x128xf32>
    %79 = tpu.matmul %76, %78, %cst_48 {dimension_numbers = #tpu.dot_dimension_numbers<[1], [0], [0], [1], [0, 0, 1, 1], [], []>} : vector<1x196xbf16>, vector<196x128xbf16>, vector<1x128xf32> -> vector<1x128xf32>
    %80 = arith.addf %75, %79 : vector<1x128xf32>
    %81 = vector.extract_strided_slice %49 {offsets = [6, 0], sizes = [1, 196], strides = [1, 1]} : vector<32x196xbf16> to vector<1x196xbf16>
    %c6 = arith.constant 6 : index
    %c0_49 = arith.constant 0 : index
    %c0_50 = arith.constant 0 : index
    %82 = vector.load %arg6[%c6, %c0_49, %c0_50] : memref<32x196x128xbf16, #tpu.memory_space<vmem>>, vector<1x196x128xbf16>
    %83 = vector.shape_cast %82 : vector<1x196x128xbf16> to vector<196x128xbf16>
    %cst_51 = arith.constant dense<0.000000e+00> : vector<1x128xf32>
    %84 = tpu.matmul %81, %83, %cst_51 {dimension_numbers = #tpu.dot_dimension_numbers<[1], [0], [0], [1], [0, 0, 1, 1], [], []>} : vector<1x196xbf16>, vector<196x128xbf16>, vector<1x128xf32> -> vector<1x128xf32>
    %85 = arith.addf %80, %84 : vector<1x128xf32>
    %86 = vector.extract_strided_slice %49 {offsets = [7, 0], sizes = [1, 196], strides = [1, 1]} : vector<32x196xbf16> to vector<1x196xbf16>
    %c7 = arith.constant 7 : index
    %c0_52 = arith.constant 0 : index
    %c0_53 = arith.constant 0 : index
    %87 = vector.load %arg6[%c7, %c0_52, %c0_53] : memref<32x196x128xbf16, #tpu.memory_space<vmem>>, vector<1x196x128xbf16>
    %88 = vector.shape_cast %87 : vector<1x196x128xbf16> to vector<196x128xbf16>
    %cst_54 = arith.constant dense<0.000000e+00> : vector<1x128xf32>
    %89 = tpu.matmul %86, %88, %cst_54 {dimension_numbers = #tpu.dot_dimension_numbers<[1], [0], [0], [1], [0, 0, 1, 1], [], []>} : vector<1x196xbf16>, vector<196x128xbf16>, vector<1x128xf32> -> vector<1x128xf32>
    %90 = arith.addf %85, %89 : vector<1x128xf32>
    %91 = vector.extract_strided_slice %49 {offsets = [8, 0], sizes = [1, 196], strides = [1, 1]} : vector<32x196xbf16> to vector<1x196xbf16>
    %c8 = arith.constant 8 : index
    %c0_55 = arith.constant 0 : index
    %c0_56 = arith.constant 0 : index
    %92 = vector.load %arg6[%c8, %c0_55, %c0_56] : memref<32x196x128xbf16, #tpu.memory_space<vmem>>, vector<1x196x128xbf16>
    %93 = vector.shape_cast %92 : vector<1x196x128xbf16> to vector<196x128xbf16>
    %cst_57 = arith.constant dense<0.000000e+00> : vector<1x128xf32>
    %94 = tpu.matmul %91, %93, %cst_57 {dimension_numbers = #tpu.dot_dimension_numbers<[1], [0], [0], [1], [0, 0, 1, 1], [], []>} : vector<1x196xbf16>, vector<196x128xbf16>, vector<1x128xf32> -> vector<1x128xf32>
    %95 = arith.addf %90, %94 : vector<1x128xf32>
    %96 = vector.extract_strided_slice %49 {offsets = [9, 0], sizes = [1, 196], strides = [1, 1]} : vector<32x196xbf16> to vector<1x196xbf16>
    %c9 = arith.constant 9 : index
    %c0_58 = arith.constant 0 : index
    %c0_59 = arith.constant 0 : index
    %97 = vector.load %arg6[%c9, %c0_58, %c0_59] : memref<32x196x128xbf16, #tpu.memory_space<vmem>>, vector<1x196x128xbf16>
    %98 = vector.shape_cast %97 : vector<1x196x128xbf16> to vector<196x128xbf16>
    %cst_60 = arith.constant dense<0.000000e+00> : vector<1x128xf32>
    %99 = tpu.matmul %96, %98, %cst_60 {dimension_numbers = #tpu.dot_dimension_numbers<[1], [0], [0], [1], [0, 0, 1, 1], [], []>} : vector<1x196xbf16>, vector<196x128xbf16>, vector<1x128xf32> -> vector<1x128xf32>
    %100 = arith.addf %95, %99 : vector<1x128xf32>
    %101 = vector.extract_strided_slice %49 {offsets = [10, 0], sizes = [1, 196], strides = [1, 1]} : vector<32x196xbf16> to vector<1x196xbf16>
    %c10 = arith.constant 10 : index
    %c0_61 = arith.constant 0 : index
    %c0_62 = arith.constant 0 : index
    %102 = vector.load %arg6[%c10, %c0_61, %c0_62] : memref<32x196x128xbf16, #tpu.memory_space<vmem>>, vector<1x196x128xbf16>
    %103 = vector.shape_cast %102 : vector<1x196x128xbf16> to vector<196x128xbf16>
    %cst_63 = arith.constant dense<0.000000e+00> : vector<1x128xf32>
    %104 = tpu.matmul %101, %103, %cst_63 {dimension_numbers = #tpu.dot_dimension_numbers<[1], [0], [0], [1], [0, 0, 1, 1], [], []>} : vector<1x196xbf16>, vector<196x128xbf16>, vector<1x128xf32> -> vector<1x128xf32>
    %105 = arith.addf %100, %104 : vector<1x128xf32>
    %106 = vector.extract_strided_slice %49 {offsets = [11, 0], sizes = [1, 196], strides = [1, 1]} : vector<32x196xbf16> to vector<1x196xbf16>
    %c11 = arith.constant 11 : index
    %c0_64 = arith.constant 0 : index
    %c0_65 = arith.constant 0 : index
    %107 = vector.load %arg6[%c11, %c0_64, %c0_65] : memref<32x196x128xbf16, #tpu.memory_space<vmem>>, vector<1x196x128xbf16>
    %108 = vector.shape_cast %107 : vector<1x196x128xbf16> to vector<196x128xbf16>
    %cst_66 = arith.constant dense<0.000000e+00> : vector<1x128xf32>
    %109 = tpu.matmul %106, %108, %cst_66 {dimension_numbers = #tpu.dot_dimension_numbers<[1], [0], [0], [1], [0, 0, 1, 1], [], []>} : vector<1x196xbf16>, vector<196x128xbf16>, vector<1x128xf32> -> vector<1x128xf32>
    %110 = arith.addf %105, %109 : vector<1x128xf32>
    %111 = vector.extract_strided_slice %49 {offsets = [12, 0], sizes = [1, 196], strides = [1, 1]} : vector<32x196xbf16> to vector<1x196xbf16>
    %c12 = arith.constant 12 : index
    %c0_67 = arith.constant 0 : index
    %c0_68 = arith.constant 0 : index
    %112 = vector.load %arg6[%c12, %c0_67, %c0_68] : memref<32x196x128xbf16, #tpu.memory_space<vmem>>, vector<1x196x128xbf16>
    %113 = vector.shape_cast %112 : vector<1x196x128xbf16> to vector<196x128xbf16>
    %cst_69 = arith.constant dense<0.000000e+00> : vector<1x128xf32>
    %114 = tpu.matmul %111, %113, %cst_69 {dimension_numbers = #tpu.dot_dimension_numbers<[1], [0], [0], [1], [0, 0, 1, 1], [], []>} : vector<1x196xbf16>, vector<196x128xbf16>, vector<1x128xf32> -> vector<1x128xf32>
    %115 = arith.addf %110, %114 : vector<1x128xf32>
    %116 = vector.extract_strided_slice %49 {offsets = [13, 0], sizes = [1, 196], strides = [1, 1]} : vector<32x196xbf16> to vector<1x196xbf16>
    %c13 = arith.constant 13 : index
    %c0_70 = arith.constant 0 : index
    %c0_71 = arith.constant 0 : index
    %117 = vector.load %arg6[%c13, %c0_70, %c0_71] : memref<32x196x128xbf16, #tpu.memory_space<vmem>>, vector<1x196x128xbf16>
    %118 = vector.shape_cast %117 : vector<1x196x128xbf16> to vector<196x128xbf16>
    %cst_72 = arith.constant dense<0.000000e+00> : vector<1x128xf32>
    %119 = tpu.matmul %116, %118, %cst_72 {dimension_numbers = #tpu.dot_dimension_numbers<[1], [0], [0], [1], [0, 0, 1, 1], [], []>} : vector<1x196xbf16>, vector<196x128xbf16>, vector<1x128xf32> -> vector<1x128xf32>
    %120 = arith.addf %115, %119 : vector<1x128xf32>
    %121 = vector.extract_strided_slice %49 {offsets = [14, 0], sizes = [1, 196], strides = [1, 1]} : vector<32x196xbf16> to vector<1x196xbf16>
    %c14 = arith.constant 14 : index
    %c0_73 = arith.constant 0 : index
    %c0_74 = arith.constant 0 : index
    %122 = vector.load %arg6[%c14, %c0_73, %c0_74] : memref<32x196x128xbf16, #tpu.memory_space<vmem>>, vector<1x196x128xbf16>
    %123 = vector.shape_cast %122 : vector<1x196x128xbf16> to vector<196x128xbf16>
    %cst_75 = arith.constant dense<0.000000e+00> : vector<1x128xf32>
    %124 = tpu.matmul %121, %123, %cst_75 {dimension_numbers = #tpu.dot_dimension_numbers<[1], [0], [0], [1], [0, 0, 1, 1], [], []>} : vector<1x196xbf16>, vector<196x128xbf16>, vector<1x128xf32> -> vector<1x128xf32>
    %125 = arith.addf %120, %124 : vector<1x128xf32>
    %126 = vector.extract_strided_slice %49 {offsets = [15, 0], sizes = [1, 196], strides = [1, 1]} : vector<32x196xbf16> to vector<1x196xbf16>
    %c15 = arith.constant 15 : index
    %c0_76 = arith.constant 0 : index
    %c0_77 = arith.constant 0 : index
    %127 = vector.load %arg6[%c15, %c0_76, %c0_77] : memref<32x196x128xbf16, #tpu.memory_space<vmem>>, vector<1x196x128xbf16>
    %128 = vector.shape_cast %127 : vector<1x196x128xbf16> to vector<196x128xbf16>
    %cst_78 = arith.constant dense<0.000000e+00> : vector<1x128xf32>
    %129 = tpu.matmul %126, %128, %cst_78 {dimension_numbers = #tpu.dot_dimension_numbers<[1], [0], [0], [1], [0, 0, 1, 1], [], []>} : vector<1x196xbf16>, vector<196x128xbf16>, vector<1x128xf32> -> vector<1x128xf32>
    %130 = arith.addf %125, %129 : vector<1x128xf32>
    %131 = vector.extract_strided_slice %49 {offsets = [16, 0], sizes = [1, 196], strides = [1, 1]} : vector<32x196xbf16> to vector<1x196xbf16>
    %c16 = arith.constant 16 : index
    %c0_79 = arith.constant 0 : index
    %c0_80 = arith.constant 0 : index
    %132 = vector.load %arg6[%c16, %c0_79, %c0_80] : memref<32x196x128xbf16, #tpu.memory_space<vmem>>, vector<1x196x128xbf16>
    %133 = vector.shape_cast %132 : vector<1x196x128xbf16> to vector<196x128xbf16>
    %cst_81 = arith.constant dense<0.000000e+00> : vector<1x128xf32>
    %134 = tpu.matmul %131, %133, %cst_81 {dimension_numbers = #tpu.dot_dimension_numbers<[1], [0], [0], [1], [0, 0, 1, 1], [], []>} : vector<1x196xbf16>, vector<196x128xbf16>, vector<1x128xf32> -> vector<1x128xf32>
    %135 = arith.addf %130, %134 : vector<1x128xf32>
    %136 = vector.extract_strided_slice %49 {offsets = [17, 0], sizes = [1, 196], strides = [1, 1]} : vector<32x196xbf16> to vector<1x196xbf16>
    %c17 = arith.constant 17 : index
    %c0_82 = arith.constant 0 : index
    %c0_83 = arith.constant 0 : index
    %137 = vector.load %arg6[%c17, %c0_82, %c0_83] : memref<32x196x128xbf16, #tpu.memory_space<vmem>>, vector<1x196x128xbf16>
    %138 = vector.shape_cast %137 : vector<1x196x128xbf16> to vector<196x128xbf16>
    %cst_84 = arith.constant dense<0.000000e+00> : vector<1x128xf32>
    %139 = tpu.matmul %136, %138, %cst_84 {dimension_numbers = #tpu.dot_dimension_numbers<[1], [0], [0], [1], [0, 0, 1, 1], [], []>} : vector<1x196xbf16>, vector<196x128xbf16>, vector<1x128xf32> -> vector<1x128xf32>
    %140 = arith.addf %135, %139 : vector<1x128xf32>
    %141 = vector.extract_strided_slice %49 {offsets = [18, 0], sizes = [1, 196], strides = [1, 1]} : vector<32x196xbf16> to vector<1x196xbf16>
    %c18 = arith.constant 18 : index
    %c0_85 = arith.constant 0 : index
    %c0_86 = arith.constant 0 : index
    %142 = vector.load %arg6[%c18, %c0_85, %c0_86] : memref<32x196x128xbf16, #tpu.memory_space<vmem>>, vector<1x196x128xbf16>
    %143 = vector.shape_cast %142 : vector<1x196x128xbf16> to vector<196x128xbf16>
    %cst_87 = arith.constant dense<0.000000e+00> : vector<1x128xf32>
    %144 = tpu.matmul %141, %143, %cst_87 {dimension_numbers = #tpu.dot_dimension_numbers<[1], [0], [0], [1], [0, 0, 1, 1], [], []>} : vector<1x196xbf16>, vector<196x128xbf16>, vector<1x128xf32> -> vector<1x128xf32>
    %145 = arith.addf %140, %144 : vector<1x128xf32>
    %146 = vector.extract_strided_slice %49 {offsets = [19, 0], sizes = [1, 196], strides = [1, 1]} : vector<32x196xbf16> to vector<1x196xbf16>
    %c19 = arith.constant 19 : index
    %c0_88 = arith.constant 0 : index
    %c0_89 = arith.constant 0 : index
    %147 = vector.load %arg6[%c19, %c0_88, %c0_89] : memref<32x196x128xbf16, #tpu.memory_space<vmem>>, vector<1x196x128xbf16>
    %148 = vector.shape_cast %147 : vector<1x196x128xbf16> to vector<196x128xbf16>
    %cst_90 = arith.constant dense<0.000000e+00> : vector<1x128xf32>
    %149 = tpu.matmul %146, %148, %cst_90 {dimension_numbers = #tpu.dot_dimension_numbers<[1], [0], [0], [1], [0, 0, 1, 1], [], []>} : vector<1x196xbf16>, vector<196x128xbf16>, vector<1x128xf32> -> vector<1x128xf32>
    %150 = arith.addf %145, %149 : vector<1x128xf32>
    %151 = vector.extract_strided_slice %49 {offsets = [20, 0], sizes = [1, 196], strides = [1, 1]} : vector<32x196xbf16> to vector<1x196xbf16>
    %c20 = arith.constant 20 : index
    %c0_91 = arith.constant 0 : index
    %c0_92 = arith.constant 0 : index
    %152 = vector.load %arg6[%c20, %c0_91, %c0_92] : memref<32x196x128xbf16, #tpu.memory_space<vmem>>, vector<1x196x128xbf16>
    %153 = vector.shape_cast %152 : vector<1x196x128xbf16> to vector<196x128xbf16>
    %cst_93 = arith.constant dense<0.000000e+00> : vector<1x128xf32>
    %154 = tpu.matmul %151, %153, %cst_93 {dimension_numbers = #tpu.dot_dimension_numbers<[1], [0], [0], [1], [0, 0, 1, 1], [], []>} : vector<1x196xbf16>, vector<196x128xbf16>, vector<1x128xf32> -> vector<1x128xf32>
    %155 = arith.addf %150, %154 : vector<1x128xf32>
    %156 = vector.extract_strided_slice %49 {offsets = [21, 0], sizes = [1, 196], strides = [1, 1]} : vector<32x196xbf16> to vector<1x196xbf16>
    %c21 = arith.constant 21 : index
    %c0_94 = arith.constant 0 : index
    %c0_95 = arith.constant 0 : index
    %157 = vector.load %arg6[%c21, %c0_94, %c0_95] : memref<32x196x128xbf16, #tpu.memory_space<vmem>>, vector<1x196x128xbf16>
    %158 = vector.shape_cast %157 : vector<1x196x128xbf16> to vector<196x128xbf16>
    %cst_96 = arith.constant dense<0.000000e+00> : vector<1x128xf32>
    %159 = tpu.matmul %156, %158, %cst_96 {dimension_numbers = #tpu.dot_dimension_numbers<[1], [0], [0], [1], [0, 0, 1, 1], [], []>} : vector<1x196xbf16>, vector<196x128xbf16>, vector<1x128xf32> -> vector<1x128xf32>
    %160 = arith.addf %155, %159 : vector<1x128xf32>
    %161 = vector.extract_strided_slice %49 {offsets = [22, 0], sizes = [1, 196], strides = [1, 1]} : vector<32x196xbf16> to vector<1x196xbf16>
    %c22 = arith.constant 22 : index
    %c0_97 = arith.constant 0 : index
    %c0_98 = arith.constant 0 : index
    %162 = vector.load %arg6[%c22, %c0_97, %c0_98] : memref<32x196x128xbf16, #tpu.memory_space<vmem>>, vector<1x196x128xbf16>
    %163 = vector.shape_cast %162 : vector<1x196x128xbf16> to vector<196x128xbf16>
    %cst_99 = arith.constant dense<0.000000e+00> : vector<1x128xf32>
    %164 = tpu.matmul %161, %163, %cst_99 {dimension_numbers = #tpu.dot_dimension_numbers<[1], [0], [0], [1], [0, 0, 1, 1], [], []>} : vector<1x196xbf16>, vector<196x128xbf16>, vector<1x128xf32> -> vector<1x128xf32>
    %165 = arith.addf %160, %164 : vector<1x128xf32>
    %166 = vector.extract_strided_slice %49 {offsets = [23, 0], sizes = [1, 196], strides = [1, 1]} : vector<32x196xbf16> to vector<1x196xbf16>
    %c23 = arith.constant 23 : index
    %c0_100 = arith.constant 0 : index
    %c0_101 = arith.constant 0 : index
    %167 = vector.load %arg6[%c23, %c0_100, %c0_101] : memref<32x196x128xbf16, #tpu.memory_space<vmem>>, vector<1x196x128xbf16>
    %168 = vector.shape_cast %167 : vector<1x196x128xbf16> to vector<196x128xbf16>
    %cst_102 = arith.constant dense<0.000000e+00> : vector<1x128xf32>
    %169 = tpu.matmul %166, %168, %cst_102 {dimension_numbers = #tpu.dot_dimension_numbers<[1], [0], [0], [1], [0, 0, 1, 1], [], []>} : vector<1x196xbf16>, vector<196x128xbf16>, vector<1x128xf32> -> vector<1x128xf32>
    %170 = arith.addf %165, %169 : vector<1x128xf32>
    %171 = vector.extract_strided_slice %49 {offsets = [24, 0], sizes = [1, 196], strides = [1, 1]} : vector<32x196xbf16> to vector<1x196xbf16>
    %c24 = arith.constant 24 : index
    %c0_103 = arith.constant 0 : index
    %c0_104 = arith.constant 0 : index
    %172 = vector.load %arg6[%c24, %c0_103, %c0_104] : memref<32x196x128xbf16, #tpu.memory_space<vmem>>, vector<1x196x128xbf16>
    %173 = vector.shape_cast %172 : vector<1x196x128xbf16> to vector<196x128xbf16>
    %cst_105 = arith.constant dense<0.000000e+00> : vector<1x128xf32>
    %174 = tpu.matmul %171, %173, %cst_105 {dimension_numbers = #tpu.dot_dimension_numbers<[1], [0], [0], [1], [0, 0, 1, 1], [], []>} : vector<1x196xbf16>, vector<196x128xbf16>, vector<1x128xf32> -> vector<1x128xf32>
    %175 = arith.addf %170, %174 : vector<1x128xf32>
    %176 = vector.extract_strided_slice %49 {offsets = [25, 0], sizes = [1, 196], strides = [1, 1]} : vector<32x196xbf16> to vector<1x196xbf16>
    %c25 = arith.constant 25 : index
    %c0_106 = arith.constant 0 : index
    %c0_107 = arith.constant 0 : index
    %177 = vector.load %arg6[%c25, %c0_106, %c0_107] : memref<32x196x128xbf16, #tpu.memory_space<vmem>>, vector<1x196x128xbf16>
    %178 = vector.shape_cast %177 : vector<1x196x128xbf16> to vector<196x128xbf16>
    %cst_108 = arith.constant dense<0.000000e+00> : vector<1x128xf32>
    %179 = tpu.matmul %176, %178, %cst_108 {dimension_numbers = #tpu.dot_dimension_numbers<[1], [0], [0], [1], [0, 0, 1, 1], [], []>} : vector<1x196xbf16>, vector<196x128xbf16>, vector<1x128xf32> -> vector<1x128xf32>
    %180 = arith.addf %175, %179 : vector<1x128xf32>
    %181 = vector.extract_strided_slice %49 {offsets = [26, 0], sizes = [1, 196], strides = [1, 1]} : vector<32x196xbf16> to vector<1x196xbf16>
    %c26 = arith.constant 26 : index
    %c0_109 = arith.constant 0 : index
    %c0_110 = arith.constant 0 : index
    %182 = vector.load %arg6[%c26, %c0_109, %c0_110] : memref<32x196x128xbf16, #tpu.memory_space<vmem>>, vector<1x196x128xbf16>
    %183 = vector.shape_cast %182 : vector<1x196x128xbf16> to vector<196x128xbf16>
    %cst_111 = arith.constant dense<0.000000e+00> : vector<1x128xf32>
    %184 = tpu.matmul %181, %183, %cst_111 {dimension_numbers = #tpu.dot_dimension_numbers<[1], [0], [0], [1], [0, 0, 1, 1], [], []>} : vector<1x196xbf16>, vector<196x128xbf16>, vector<1x128xf32> -> vector<1x128xf32>
    %185 = arith.addf %180, %184 : vector<1x128xf32>
    %186 = vector.extract_strided_slice %49 {offsets = [27, 0], sizes = [1, 196], strides = [1, 1]} : vector<32x196xbf16> to vector<1x196xbf16>
    %c27 = arith.constant 27 : index
    %c0_112 = arith.constant 0 : index
    %c0_113 = arith.constant 0 : index
    %187 = vector.load %arg6[%c27, %c0_112, %c0_113] : memref<32x196x128xbf16, #tpu.memory_space<vmem>>, vector<1x196x128xbf16>
    %188 = vector.shape_cast %187 : vector<1x196x128xbf16> to vector<196x128xbf16>
    %cst_114 = arith.constant dense<0.000000e+00> : vector<1x128xf32>
    %189 = tpu.matmul %186, %188, %cst_114 {dimension_numbers = #tpu.dot_dimension_numbers<[1], [0], [0], [1], [0, 0, 1, 1], [], []>} : vector<1x196xbf16>, vector<196x128xbf16>, vector<1x128xf32> -> vector<1x128xf32>
    %190 = arith.addf %185, %189 : vector<1x128xf32>
    %191 = vector.extract_strided_slice %49 {offsets = [28, 0], sizes = [1, 196], strides = [1, 1]} : vector<32x196xbf16> to vector<1x196xbf16>
    %c28 = arith.constant 28 : index
    %c0_115 = arith.constant 0 : index
    %c0_116 = arith.constant 0 : index
    %192 = vector.load %arg6[%c28, %c0_115, %c0_116] : memref<32x196x128xbf16, #tpu.memory_space<vmem>>, vector<1x196x128xbf16>
    %193 = vector.shape_cast %192 : vector<1x196x128xbf16> to vector<196x128xbf16>
    %cst_117 = arith.constant dense<0.000000e+00> : vector<1x128xf32>
    %194 = tpu.matmul %191, %193, %cst_117 {dimension_numbers = #tpu.dot_dimension_numbers<[1], [0], [0], [1], [0, 0, 1, 1], [], []>} : vector<1x196xbf16>, vector<196x128xbf16>, vector<1x128xf32> -> vector<1x128xf32>
    %195 = arith.addf %190, %194 : vector<1x128xf32>
    %196 = vector.extract_strided_slice %49 {offsets = [29, 0], sizes = [1, 196], strides = [1, 1]} : vector<32x196xbf16> to vector<1x196xbf16>
    %c29 = arith.constant 29 : index
    %c0_118 = arith.constant 0 : index
    %c0_119 = arith.constant 0 : index
    %197 = vector.load %arg6[%c29, %c0_118, %c0_119] : memref<32x196x128xbf16, #tpu.memory_space<vmem>>, vector<1x196x128xbf16>
    %198 = vector.shape_cast %197 : vector<1x196x128xbf16> to vector<196x128xbf16>
    %cst_120 = arith.constant dense<0.000000e+00> : vector<1x128xf32>
    %199 = tpu.matmul %196, %198, %cst_120 {dimension_numbers = #tpu.dot_dimension_numbers<[1], [0], [0], [1], [0, 0, 1, 1], [], []>} : vector<1x196xbf16>, vector<196x128xbf16>, vector<1x128xf32> -> vector<1x128xf32>
    %200 = arith.addf %195, %199 : vector<1x128xf32>
    %201 = vector.extract_strided_slice %49 {offsets = [30, 0], sizes = [1, 196], strides = [1, 1]} : vector<32x196xbf16> to vector<1x196xbf16>
    %c30 = arith.constant 30 : index
    %c0_121 = arith.constant 0 : index
    %c0_122 = arith.constant 0 : index
    %202 = vector.load %arg6[%c30, %c0_121, %c0_122] : memref<32x196x128xbf16, #tpu.memory_space<vmem>>, vector<1x196x128xbf16>
    %203 = vector.shape_cast %202 : vector<1x196x128xbf16> to vector<196x128xbf16>
    %cst_123 = arith.constant dense<0.000000e+00> : vector<1x128xf32>
    %204 = tpu.matmul %201, %203, %cst_123 {dimension_numbers = #tpu.dot_dimension_numbers<[1], [0], [0], [1], [0, 0, 1, 1], [], []>} : vector<1x196xbf16>, vector<196x128xbf16>, vector<1x128xf32> -> vector<1x128xf32>
    %205 = arith.addf %200, %204 : vector<1x128xf32>
    %206 = vector.extract_strided_slice %49 {offsets = [31, 0], sizes = [1, 196], strides = [1, 1]} : vector<32x196xbf16> to vector<1x196xbf16>
    %c31 = arith.constant 31 : index
    %c0_124 = arith.constant 0 : index
    %c0_125 = arith.constant 0 : index
    %207 = vector.load %arg6[%c31, %c0_124, %c0_125] : memref<32x196x128xbf16, #tpu.memory_space<vmem>>, vector<1x196x128xbf16>
    %208 = vector.shape_cast %207 : vector<1x196x128xbf16> to vector<196x128xbf16>
    %cst_126 = arith.constant dense<0.000000e+00> : vector<1x128xf32>
    %209 = tpu.matmul %206, %208, %cst_126 {dimension_numbers = #tpu.dot_dimension_numbers<[1], [0], [0], [1], [0, 0, 1, 1], [], []>} : vector<1x196xbf16>, vector<196x128xbf16>, vector<1x128xf32> -> vector<1x128xf32>
    %210 = arith.addf %205, %209 : vector<1x128xf32>
    %c0_127 = arith.constant 0 : index
    %c0_128 = arith.constant 0 : index
    %211 = vector.load %arg7[%c0_127, %c0_128] : memref<1x128xf32, #tpu.memory_space<vmem>>, vector<1x128xf32>
    %212 = arith.addf %210, %211 : vector<1x128xf32>
    %cst_129 = arith.constant 0.000000e+00 : f32
    %213 = vector.broadcast %cst_129 : f32 to vector<1x128xf32>
    %214 = arith.maximumf %212, %213 : vector<1x128xf32>
    %c0_130 = arith.constant 0 : index
    %c0_131 = arith.constant 0 : index
    %215 = vector.load %arg8[%c0_130, %c0_131] : memref<128x14xf32, #tpu.memory_space<vmem>>, vector<128x14xf32>
    %cst_132 = arith.constant dense<0.000000e+00> : vector<1x14xf32>
    %216 = tpu.matmul %214, %215, %cst_132 {dimension_numbers = #tpu.dot_dimension_numbers<[1], [0], [0], [1], [0, 0, 1, 1], [], []>} : vector<1x128xf32>, vector<128x14xf32>, vector<1x14xf32> -> vector<1x14xf32>
    %c0_133 = arith.constant 0 : index
    %c0_134 = arith.constant 0 : index
    %217 = vector.load %arg9[%c0_133, %c0_134] : memref<1x14xf32, #tpu.memory_space<vmem>>, vector<1x14xf32>
    %218 = arith.addf %216, %217 : vector<1x14xf32>
    %cst_135 = arith.constant 0.000000e+00 : f32
    %219 = vector.broadcast %cst_135 : f32 to vector<1x14xf32>
    %220 = arith.maximumf %218, %219 : vector<1x14xf32>
    %cst_136 = arith.constant dense<0xFF800000> : vector<1xf32>
    %221 = vector.multi_reduction <maximumf>, %220, %cst_136 [1] : vector<1x14xf32> to vector<1xf32>
    %222 = vector.shape_cast %221 : vector<1xf32> to vector<1x1xf32>
    %223 = vector.broadcast %222 : vector<1x1xf32> to vector<1x14xf32>
    %224 = arith.subf %220, %223 : vector<1x14xf32>
    %225 = math.exp %224 : vector<1x14xf32>
    %cst_137 = arith.constant dense<0.000000e+00> : vector<1xf32>
    %226 = vector.multi_reduction <add>, %225, %cst_137 [1] : vector<1x14xf32> to vector<1xf32>
    %227 = vector.shape_cast %226 : vector<1xf32> to vector<1x1xf32>
    %228 = math.log %227 : vector<1x1xf32>
    %229 = vector.broadcast %228 : vector<1x1xf32> to vector<1x14xf32>
    %230 = arith.subf %224, %229 : vector<1x14xf32>
    %c0_138 = arith.constant 0 : index
    %c0_139 = arith.constant 0 : index
    %c0_140 = arith.constant 0 : index
    %231 = vector.load %arg10[%c0_138, %c0_139, %c0_140] : memref<1x1x14xf32, #tpu.memory_space<vmem>>, vector<1x1x14xf32>
    %232 = vector.shape_cast %231 : vector<1x1x14xf32> to vector<1x14xf32>
    %233 = vector.shape_cast %230 : vector<1x14xf32> to vector<1x1x14xf32>
    tpu.vector_store %arg10[%c0_138, %c0_139, %c0_140], %233 {strides = array<i32>} : memref<1x1x14xf32, #tpu.memory_space<vmem>>, vector<1x1x14xf32>,
    return
  }
  func.func @transform_0(%arg0: i32) -> (i32, i32, i32) {
    %c0_i32 = arith.constant 0 : i32
    %c0_i32_0 = arith.constant 0 : i32
    %c0_i32_1 = arith.constant 0 : i32
    return %arg0, %c0_i32, %c0_i32_0 : i32, i32, i32
  }
  func.func @transform_1(%arg0: i32) -> (i32, i32) {
    %c0_i32 = arith.constant 0 : i32
    %c0_i32_0 = arith.constant 0 : i32
    %c0_i32_1 = arith.constant 0 : i32
    return %c0_i32, %c0_i32_0 : i32, i32
  }
  func.func @transform_2(%arg0: i32) -> (i32, i32) {
    %c0_i32 = arith.constant 0 : i32
    %c0_i32_0 = arith.constant 0 : i32
    %c0_i32_1 = arith.constant 0 : i32
    return %c0_i32, %c0_i32_0 : i32, i32
  }
  func.func @transform_3(%arg0: i32) -> (i32, i32, i32) {
    %c0_i32 = arith.constant 0 : i32
    %c0_i32_0 = arith.constant 0 : i32
    %c0_i32_1 = arith.constant 0 : i32
    %c0_i32_2 = arith.constant 0 : i32
    return %c0_i32, %c0_i32_0, %c0_i32_1 : i32, i32, i32
  }
  func.func @transform_4(%arg0: i32) -> (i32, i32) {
    %c0_i32 = arith.constant 0 : i32
    %c0_i32_0 = arith.constant 0 : i32
    %c0_i32_1 = arith.constant 0 : i32
    return %c0_i32, %c0_i32_0 : i32, i32
  }
  func.func @transform_5(%arg0: i32) -> (i32, i32, i32) {
    %c0_i32 = arith.constant 0 : i32
    %c0_i32_0 = arith.constant 0 : i32
    %c0_i32_1 = arith.constant 0 : i32
    %c0_i32_2 = arith.constant 0 : i32
    return %c0_i32, %c0_i32_0, %c0_i32_1 : i32, i32, i32
  }
  func.func @transform_6(%arg0: i32) -> (i32, i32) {
    %c0_i32 = arith.constant 0 : i32
    %c0_i32_0 = arith.constant 0 : i32
    %c0_i32_1 = arith.constant 0 : i32
    return %c0_i32, %c0_i32_0 : i32, i32
  }
  func.func @transform_7(%arg0: i32) -> (i32, i32) {
    %c0_i32 = arith.constant 0 : i32
    %c0_i32_0 = arith.constant 0 : i32
    %c0_i32_1 = arith.constant 0 : i32
    return %c0_i32, %c0_i32_0 : i32, i32
  }
  func.func @transform_8(%arg0: i32) -> (i32, i32) {
    %c0_i32 = arith.constant 0 : i32
    %c0_i32_0 = arith.constant 0 : i32
    %c0_i32_1 = arith.constant 0 : i32
    return %c0_i32, %c0_i32_0 : i32, i32
  }
  func.func @transform_9(%arg0: i32) -> (i32, i32, i32) {
    %c0_i32 = arith.constant 0 : i32
    %c0_i32_0 = arith.constant 0 : i32
    %c0_i32_1 = arith.constant 0 : i32
    return %arg0, %c0_i32, %c0_i32_0 : i32, i32, i32
  }
}

</mosaic_0001>

<bundles_post_ra>
// kernel: cnn_net3_forward.1
= control target key start
LH: loop header
LB: loop body
LE: loop exit
PB: predicated region body
PF: predicated region fallthrough
CT: control target
= control target key end

     0   :  { %14 = vsyncpa [#allocation3], 0  ;;  %s11280_s0 = inlined_call_operand.vmem [shape: f32[2,3,196], index: 0, kind: input, shape index: {}]   ;;  %s11281_s1 = inlined_call_operand.vmem [shape: f32[8,3], index: 1, kind: input, shape index: {}]   ;;  %s11282_s2 = inlined_call_operand.vmem [shape: f32[8,1], index: 2, kind: input, shape index: {}]   ;;  %s11283_s3 = inlined_call_operand.vmem [shape: f32[4,32,8], index: 3, kind: input, shape index: {}]   ;;  %s11284_s4 = inlined_call_operand.vmem [shape: f32[32,1], index: 4, kind: input, shape index: {}]   ;;  %s11285_s5 = inlined_call_operand.vmem [shape: bf16[32,196,128], index: 5, kind: input, shape index: {}]   ;;  %s11286_s6 = inlined_call_operand.vmem [shape: f32[1,128], index: 6, kind: input, shape index: {}]   ;;  %s11287_s7 = inlined_call_operand.vmem [shape: f32[128,14], index: 7, kind: input, shape index: {}]   ;;  %s11288_s8 = inlined_call_operand.vmem [shape: f32[1,14], index: 8, kind: input, shape index: {}]   ;;  %s11289_s9 = inlined_call_operand.hbm [shape: f32[2,1,14], index: 9, kind: output, shape index: {}]  }
   0x1   :  { %16 = vsyncpa [#allocation3 + $0x1], 0  ;;  %s9139_s30 = smov 0   ;;  %s9141_s10 = smov 0  }
   0x2   :  { %s9143_s11 = smov 0   ;;  %s9145_s12 = smov 0  }
   0x3 LB: > { %s9160_s13 = sadd.s32 4294967295, %s9084_s12   ;;  %s6031_s14 = sadd.s32 4294967294, %s9084_s12   ;;  %s9084_s12 = sphi %s9145_s12, %s11295_s12   ;;  %s9080_s11 = sphi %s9143_s11, %s11294_s11   ;;  %s9076_s10 = sphi %s9141_s10, %s11293_s10   ;;  %s9072_s30 = sphi %s9139_s30, %s11292_s30  }
   0x4   : > { %s9164_s15 = sadd.s32 1, %s9084_s12   ;;  %s223_s16 = sadd.s32 1, %s9080_s11 }
   0x5   : > { %s220_s17 = ssub.s32 %s9084_s12, %s9164_s15  ;;  %p233_p0 = scmp.ne.s32.totalorder %s9080_s11, %s9076_s10 }
   0x6   : > { %p221_p1 = scmp.eq.s32.totalorder %s220_s17, 0  ;;  %p234_p2 = scmp.eq.s32.totalorder %s9160_s13, 1 }
   0x7   : > { %p239_p3 = scmp.ne.s32.totalorder %s9076_s10, %s9072_s30  ;;  %p240_p4 = scmp.eq.s32.totalorder %s6031_s14, 1 }
   0x8   : > { %s9175_s18 = scalar_select %p221_p1, %s9080_s11, %s223_s16  }
   0x9   : > { %p9177_p5 = por %p234_p2, %p233_p0  ;;  %p9181_p6 = por %p240_p4, %p239_p3 }
   0xa   : > { %p6034_p7 = scmp.ge.s32.totalorder %s9084_s12, 1  ;;  %p290_p8 = scmp.lt.s32.totalorder %s9084_s12, 3 }
   0xc   : > { %p291_p9 = pnand %p6034_p7, %p290_p8 }
   0xd   : > { %p325_p10 = scmp.lt.s32.totalorder (!%p291_p9), %s9160_s13, 1  ;;  %s323_s26 = sand.u32 (!%p291_p9), 1, %s9076_s10  }
   0xe   : > { %294 = sbr.rel (%p291_p9) target bundleno = 1699 (0x6a3), region = 56  ;;  %s5972_s29 = scalar_lea.hbm (!%p291_p9), %s11289_s9, %s9160_s13 }
   0xf   : > { %s324_s14 = scalar_lea.vmem (!%p291_p9), [#allocation2], %s323_s26  ;;  %s5976_s17 = sshll.u32 (!%p291_p9), %s5972_s29, 4  ;;  %s5977_s17 = int_to_ptr.hbm [resolvable:$true] %s5976_s17 }
  0x10   : > { %s5974_s16 = sshll.u32 (!%p291_p9), %s324_s14, 4  ;;  %s5964_s21 = scalar_lea.sflag (!%p291_p9), [#allocation3], %s323_s26  ;;  %s5975_s16 = int_to_ptr.vmem [resolvable:$true] %s5974_s16 }
  0x11   : > { %s9036_s22 = sshra.s32 (!%p291_p9), %s5977_s17, 4  ;;  %s9042_s25 = scalar_lea.hbm (!%p291_p9), %s11289_s9, 2  ;;  %s9037_s22 = int_to_ptr.hbm [resolvable:$true] %s9036_s22 }
  0x12   : > { %p9043_p0 = scmp.lt.s32.totalorder (!%p291_p9), %s9037_s22, %s11289_s9 }
  0x13   : > { %v333_v0 = vld [vmem:[%s11282_s2] sm:$0xff]  ;;  %v394_v1 = vlaneseq  ;;  %v9086_v2 = vmov 0   ;;  %s326_s23 = scalar_select %p325_p10, %s9160_s13, 1  ;;  %v9087_v5 = vmov 0.0   ;;  %v9088_v13 = vmov 1.0   ;;  %v424_v51 = vld [vmem:[%s11283_s3 + $0x8] sm:$0xff] }
  0x14   : > { %9015 = vset.pattern.permute.xlu0 %v9086_v2  ;;  %9016 = vset.pattern.permute.xlu1 %v9086_v2  ;;  %v1458_v12 = vld [vmem:[%s11284_s4] sm:$0xff]  ;;  %vm347_vm4 = vcmask 1042432   ;;  %vm343_vm7 = vcmask 23552   ;;  %vm583_vm9 = vcmask 1043456   ;;  %v425_v52 = vld [vmem:[%s11283_s3 + $0x10] sm:$0xff]  ;;  %v426_v53 = vld [vmem:[%s11283_s3 + $0x18] sm:$0xff] }
  0x15   : > { %336 = vperm.xlu0 %9015, %v333_v0   ;;  %v9192_v3 = vshrl.u32 %v394_v1, 7  ;;  %v9194_v4 = vand.u32 127, %v394_v1  ;;  %645 = vmatpush.msra.mxu0 %v9087_v5  ;;  %s8588_s24 = sshll.u32 %s326_s23, 3  ;;  %v332_v20 = vld [vmem:[%s11281_s1] sm:$0xff]  ;;  %v6096_v63 = vld [vmem:[%s11283_s3 + $0x28] sm:$0xff]  ;;  %s9038_s23 = scalar_lea.hbm %s9037_s22, 1 }
  0x16   : > { %9017 = vset.pattern.permute.xlu2 %v9086_v2  ;;  %s329_s27 = scalar_lea.vmem %s11280_s0, %s8588_s24  ;;  %v423_v50 = vld [vmem:[%s11283_s3] sm:$0xff]  ;;  %v6097_v2 = vld [vmem:[%s11283_s3 + $0x30] sm:$0xff]  ;;  %p9039_p11 = scmp.ne.s32.totalorder %s9037_s22, %s9038_s23 }
  0x17   : > { %v9198_v6 = vadd.s32 120, %v9192_v3  ;;  %v9201_v7 = vadd.s32 1, %v9194_v4  ;;  %v9204_v8 = vadd.s32 112, %v9192_v3  ;;  %v9207_v9 = vadd.s32 104, %v9192_v3  ;;  %v331_v10 = vld [vmem:[%s329_s27] sm:$0x77]  ;;  %p9044_p1 = scmp.lt.s32.totalorder %s9042_s25, %s9038_s23 }
  0x18   : > { %v9217_v11 = vadd.s32 96, %v9192_v3  ;;  %340 = vst [vmem:[#allocation1] ss:$2 sm:$0xff] %v331_v10  ;;  %v9226_v14 = vadd.s32 88, %v9192_v3  ;;  %v9229_v15 = vadd.s32 192, %v9192_v3  ;;  %v9232_v16 = vadd.s32 128, %v9194_v4  ;;  %p9040_p12 = pnand %p9039_p11, %p9177_p5 }
  0x19   : > { %vm459_vm0 = vcmp.eq.s32.totalorder %v9198_v6, %v9201_v7  ;;  %vm457_vm1 = vcmp.eq.s32.totalorder %v9204_v8, %v9201_v7  ;;  %vm455_vm2 = vcmp.eq.s32.totalorder %v9207_v9, %v9201_v7  ;;  %v9238_v17 = vadd.s32 80, %v9192_v3  ;;  %v6095_v59 = vld [vmem:[%s11283_s3 + $0x20] sm:$0xff]  ;;  %p9045_p2 = por %p9044_p1, %p9043_p0 }
  0x1a   : > { %6067 = vmatpush.msk.msra.mxu2 %vm459_vm0, %v9088_v13  ;;  %vm453_vm3 = vcmp.eq.s32.totalorder %v9217_v11, %v9201_v7  ;;  %v9241_v18 = vadd.s32 1, %v9232_v16  ;;  %vm451_vm5 = vcmp.eq.s32.totalorder %v9226_v14, %v9201_v7  ;;  %v9247_v19 = vadd.s32 72, %v9192_v3  ;;  %p9041_p13 = pneg %p9040_p12 }
  0x1b   : > { %v9256_v21 = vadd.s32 64, %v9192_v3  ;;  %v9259_v22 = vadd.s32 184, %v9192_v3  ;;  %vm449_vm8 = vcmp.eq.s32.totalorder %v9238_v17, %v9201_v7  ;;  %v9270_v26 = vadd.s32 56, %v9192_v3 }
  0x1c   : > { %6068 = vmatpush.msk.msra.mxu2 %vm457_vm1, %v9088_v13  ;;  %vm478_vm6 = vcmp.eq.s32.totalorder %v9229_v15, %v9241_v18  ;;  %vm447_vm10 = vcmp.eq.s32.totalorder %v9247_v19, %v9201_v7  ;;  %v9280_v27 = vadd.s32 48, %v9192_v3  ;;  %v9293_v28 = vadd.s32 176, %v9192_v3  ;;  %p9046_p3 = pnand %p9045_p2, %p9041_p13 }
  0x1d   : > { %1464 = vperm.xlu0 %9015, %v1458_v12   ;;  %v6066_v25 = vsel %vm478_vm6, 1.0, %v9087_v5  ;;  %vm476_vm11 = vcmp.eq.s32.totalorder %v9259_v22, %v9241_v18  ;;  %vm445_vm12 = vcmp.eq.s32.totalorder %v9256_v21, %v9201_v7  ;;  %vm443_vm13 = vcmp.eq.s32.totalorder %v9270_v26, %v9201_v7 }
  0x1e   : > { %6069 = vmatpush.msk.msra.mxu2 %vm455_vm2, %v9088_v13  ;;  %vm441_vm14 = vcmp.eq.s32.totalorder %v9280_v27, %v9201_v7  ;;  %v9296_v29 = vadd.s32 40, %v9192_v3  ;;  %v9299_v30 = vadd.s32 168, %v9192_v3  ;;  %v9302_v31 = vadd.s32 32, %v9192_v3 }
  0x1f   : > { %v341_v23 = vld.sshfl [vmem:[#allocation1] sm:$0xff pattern:$0x75316420]  ;;  %v342_v24 = vld.sshfl [vmem:[#allocation1 + $0x8] sm:$0xff pattern:$0x75316420]  ;;  %vm474_vm15 = vcmp.eq.s32.totalorder %v9293_v28, %v9241_v18 }
  0x20   : > { %6070 = vmatpush.msk.msra.mxu2 %vm453_vm3, %v9088_v13  ;;  %6037 = vmatpush.msk.msra.mxu1 %vm347_vm4, %v341_v23  ;;  %v9305_v32 = vadd.s32 160, %v9192_v3  ;;  %v9308_v33 = vadd.s32 24, %v9192_v3  ;;  %v9311_v34 = vadd.s32 152, %v9192_v3  ;;  %v9314_v35 = vadd.s32 16, %v9192_v3  ;;  %v9578_v23 = vld [vmem:[%s11283_s3 + $0x68] sm:$0xff] }
  0x21   : > { %6038 = vmatmul.msk.f32.vlgmr.msra.gmra.mxu1 %vm343_vm7, %v332_v20  ;;  %vm439_vm0 = vcmp.eq.s32.totalorder %v9296_v29, %v9201_v7  ;;  %vm472_vm1 = vcmp.eq.s32.totalorder %v9299_v30, %v9241_v18  ;;  %vm437_vm2 = vcmp.eq.s32.totalorder %v9302_v31, %v9201_v7  ;;  %v9341_v36 = vadd.s32 144, %v9192_v3 }
  0x22   : > { %6071 = vmatpush.msk.msra.mxu2 %vm451_vm5, %v9088_v13  ;;  %6039 = vmatpush.msk.msrb.mxu1 %vm347_vm4, %v342_v24  ;;  %vm470_vm3 = vcmp.eq.s32.totalorder %v9305_v32, %v9241_v18  ;;  %vm435_vm4 = vcmp.eq.s32.totalorder %v9308_v33, %v9201_v7  ;;  %vm468_vm5 = vcmp.eq.s32.totalorder %v9311_v34, %v9241_v18  ;;  %v9346_v37 = vadd.s32 8, %v9192_v3 }
  0x23   : > { %vm433_vm6 = vcmp.eq.s32.totalorder %v9314_v35, %v9201_v7  ;;  %v9349_v38 = vadd.s32 136, %v9192_v3  ;;  %v9357_v39 = vadd.s32 128, %v9192_v3  ;;  %v817_v44 = vadd.s32 14, %v9232_v16 }
  0x24   : > { %6072 = vmatpush.msk.msra.mxu2 %vm449_vm8, %v9088_v13  ;;  %6085 = vmatpush.msk.msra.mxu1 %vm583_vm9, %v6066_v25  ;;  %vm431_vm8 = vcmp.eq.s32.totalorder %v9346_v37, %v9201_v7  ;;  %v9377_v46 = vadd.s32 15, %v9194_v4  ;;  %v816_v57 = vadd.s32 14, %v9194_v4  ;;  %v9587_v25 = vld [vmem:[%s11283_s3 + $0x70] sm:$0xff] }
  0x26   : > { %6073 = vmatpush.msk.msra.mxu2 %vm447_vm10, %v9088_v13  ;;  %6086 = vmatpush.msk.msra.mxu1 %vm476_vm11, %v9088_v13  ;;  %vm464_vm10 = vcmp.eq.s32.totalorder %v9349_v38, %v9241_v18  ;;  %vm429_vm11 = vcmp.eq.s32.totalorder %v9192_v3, %v9201_v7 }
  0x28   : > { %6074 = vmatpush.msk.msra.mxu2 %vm445_vm12, %v9088_v13  ;;  %6087 = vmatpush.msk.msra.mxu1 %vm474_vm15, %v9088_v13  ;;  %vm462_vm12 = vcmp.eq.s32.totalorder %v9357_v39, %v9241_v18  ;;  %vm579_vm15 = vcmask 556032  }
  0x29   : > { %6040 = vmatmul.msk.f32.vlgmr.msrb.gmra.mxu1 %vm343_vm7, %v332_v20  ;;  %vm466_vm7 = vcmp.eq.s32.totalorder %v9341_v36, %v9241_v18 }
  0x2a   : > { %6075 = vmatpush.msk.msra.mxu2 %vm443_vm13, %v9088_v13  ;;  %6088 = vmatpush.msk.msra.mxu1 %vm472_vm1, %v9088_v13  ;;  %vm461_vm13 = vcmp.eq.s32.totalorder %v9357_v39, %v9201_v7  ;;  %vm865_vm1 = vcmp.eq.s32.totalorder %v9259_v22, %v817_v44 }
  0x2c   : > { %6076 = vmatpush.msk.msra.mxu2 %vm441_vm14, %v9088_v13  ;;  %6089 = vmatpush.msk.msra.mxu1 %vm470_vm3, %v9088_v13  ;;  %vm867_vm14 = vcmp.eq.s32.totalorder %v9229_v15, %v817_v44  ;;  %vm863_vm3 = vcmp.eq.s32.totalorder %v9293_v28, %v817_v44 }
  0x2d   : > { %v6139_v49 = vsel %vm867_vm14, 1.0, %v9087_v5  ;;  %vm1157_vm14 = vcmp.eq.s32.totalorder %v9247_v19, %v9377_v46 }
  0x2e   : > { %6077 = vmatpush.msk.msra.mxu2 %vm439_vm0, %v9088_v13  ;;  %6090 = vmatpush.msk.msra.mxu1 %vm468_vm5, %v9088_v13  ;;  %vm1169_vm0 = vcmp.eq.s32.totalorder %v9198_v6, %v9377_v46  ;;  %vm861_vm5 = vcmp.eq.s32.totalorder %v9299_v30, %v817_v44 }
  0x30   : > { %6078 = vmatpush.msk.msra.mxu2 %vm437_vm2, %v9088_v13  ;;  %6091 = vmatpush.msk.msra.mxu1 %vm466_vm7, %v9088_v13  ;;  %vm1167_vm2 = vcmp.eq.s32.totalorder %v9204_v8, %v9377_v46  ;;  %vm1163_vm7 = vcmp.eq.s32.totalorder %v9217_v11, %v9377_v46 }
  0x32   : > { %6079 = vmatpush.msk.msra.mxu2 %vm435_vm4, %v9088_v13  ;;  %6092 = vmatpush.msk.msra.mxu1 %vm464_vm10, %v9088_v13  ;;  %vm1165_vm4 = vcmp.eq.s32.totalorder %v9207_v9, %v9377_v46  ;;  %vm1161_vm10 = vcmp.eq.s32.totalorder %v9226_v14, %v9377_v46 }
  0x34   : > { %6080 = vmatpush.msk.msra.mxu2 %vm433_vm6, %v9088_v13  ;;  %6093 = vmatpush.msk.msra.mxu1 %vm462_vm12, %v9088_v13  ;;  %vm675_vm6 = vcmask 64512   ;;  %vm1159_vm12 = vcmp.eq.s32.totalorder %v9238_v17, %v9377_v46 }
  0x36   : > { %6081 = vmatpush.msk.msra.mxu2 %vm431_vm8, %v9088_v13  ;;  %vm859_vm8 = vcmp.eq.s32.totalorder %v9305_v32, %v817_v44 }
  0x38   : > { %6082 = vmatpush.msk.msra.mxu2 %vm429_vm11, %v9088_v13  ;;  %vm857_vm11 = vcmp.eq.s32.totalorder %v9311_v34, %v817_v44 }
  0x3a   : > { %6083 = vmatpush.msk.msrb.mxu2 %vm461_vm13, %v9088_v13  ;;  %vm855_vm13 = vcmp.eq.s32.totalorder %v9341_v36, %v817_v44 }
  0x87   : > { %v337_v40 = vpop.permute.xlu0 %336 }
  0x9e   : > { %v369_v41 = vpop.f32.mrf.mxu1 }
  0x9f   : > { %v370_v42 = vadd.f32 %v369_v41, %v337_v40 }
  0xa1   : > { %v9370_v43 = vmax.f32 %v370_v42, 0.0  ;;  %v6167_v42 = vld [vmem:[%s11283_s3 + $0x40] sm:$0xff] }
  0xa3   : > { %606 = vmatmul.f32.vlgmr.msra.gmra.mxu2 %v9370_v43  ;;  %646 = vmatmul.f32.vlgmr.msra.gmra.mxu0 %v9370_v43 }
  0xa4   : > { %773 = vmatpush.msrb.mxu1 %v9370_v43 }
  0xa6   : > { %v389_v45 = vpop.f32.mrf.mxu1 }
  0xa7   : > { %v390_v47 = vadd.f32 %v389_v45, %v337_v40  ;;  %v6168_v45 = vld [vmem:[%s11283_s3 + $0x48] sm:$0xff] }
  0xa9   : > { %v9380_v48 = vmax.f32 %v390_v47, 0.0 }
  0xab   : > { %6084 = vmatmul.msk.f32.vlgmr.msrb.gmra.mxu2 %vm579_vm15, %v9380_v48  ;;  %6094 = vmatmul.msk.f32.vlgmr.msra.gmra.mxu1 %vm579_vm15, %v9380_v48 }
  0xac   : > { %802 = vmatpush.msra.mxu2 %v9380_v48  ;;  %6158 = vmatpush.msk.msra.mxu1 %vm583_vm9, %v6139_v49  ;;  %v6267_v49 = vld [vmem:[%s11285_s5 + $0xc4] sm:$0x3] }
  0xae   : > { %6204 = vmatpush.msk.msrb.mxu2 %vm1169_vm0, %v9088_v13  ;;  %6159 = vmatpush.msk.msra.mxu1 %vm865_vm1, %v9088_v13  ;;  %vm853_vm0 = vcmp.eq.s32.totalorder %v9349_v38, %v817_v44  ;;  %vm1155_vm1 = vcmp.eq.s32.totalorder %v9256_v21, %v9377_v46 }
  0xb0   : > { %6205 = vmatpush.msk.msrb.mxu2 %vm1167_vm2, %v9088_v13  ;;  %6160 = vmatpush.msk.msra.mxu1 %vm863_vm3, %v9088_v13  ;;  %vm1173_vm2 = vcmp.eq.s32.totalorder %v9349_v38, %v9377_v46  ;;  %vm1153_vm3 = vcmp.eq.s32.totalorder %v9270_v26, %v9377_v46 }
  0xb2   : > { %6206 = vmatpush.msk.msrb.mxu2 %vm1165_vm4, %v9088_v13  ;;  %6161 = vmatpush.msk.msra.mxu1 %vm861_vm5, %v9088_v13  ;;  %vm1171_vm4 = vcmp.eq.s32.totalorder %v9357_v39, %v9377_v46  ;;  %vm1151_vm5 = vcmp.eq.s32.totalorder %v9280_v27, %v9377_v46 }
  0xb3   : > { %6107 = vmatmul.msk.f32.vlgmr.msrb.gmra.mxu1 %vm675_vm6, %v423_v50  ;;  %6111 = vmatmul.msk.f32.vlgmr.msra.gmra.mxu2 %vm675_vm6, %v423_v50 }
  0xb4   : > { %6207 = vmatpush.msk.msrb.mxu2 %vm1163_vm7, %v9088_v13  ;;  %6162 = vmatpush.msk.msra.mxu1 %vm859_vm8, %v9088_v13  ;;  %vm1149_vm7 = vcmp.eq.s32.totalorder %v9296_v29, %v9377_v46  ;;  %vm1147_vm8 = vcmp.eq.s32.totalorder %v9302_v31, %v9377_v46 }
  0xb6   : > { %6208 = vmatpush.msk.msrb.mxu2 %vm1161_vm10, %v9088_v13  ;;  %6163 = vmatpush.msk.msra.mxu1 %vm857_vm11, %v9088_v13  ;;  %vm1145_vm10 = vcmp.eq.s32.totalorder %v9308_v33, %v9377_v46  ;;  %vm1143_vm11 = vcmp.eq.s32.totalorder %v9314_v35, %v9377_v46 }
  0xb8   : > { %6209 = vmatpush.msk.msrb.mxu2 %vm1159_vm12, %v9088_v13  ;;  %6164 = vmatpush.msk.msra.mxu1 %vm855_vm13, %v9088_v13  ;;  %vm1141_vm12 = vcmp.eq.s32.totalorder %v9346_v37, %v9377_v46  ;;  %vm852_vm13 = vcmp.eq.s32.totalorder %v9349_v38, %v816_v57 }
  0xba   : > { %6210 = vmatpush.msk.msrb.mxu2 %vm1157_vm14, %v9088_v13  ;;  %6165 = vmatpush.msk.msra.mxu1 %vm853_vm0, %v9088_v13  ;;  %vm850_vm14 = vcmp.eq.s32.totalorder %v9357_v39, %v816_v57  ;;  %vm848_vm0 = vcmp.eq.s32.totalorder %v9198_v6, %v816_v57  ;;  %v6098_v6 = vld [vmem:[%s11283_s3 + $0x38] sm:$0xff] }
  0xbb   : > { %6108 = vmatmul.msk.f32.gmra.mxu1 %vm675_vm6, %v424_v51  ;;  %6112 = vmatmul.msk.f32.gmra.mxu2 %vm675_vm6, %v424_v51  ;;  %v8620_v51 = vld [vmem:[%s11285_s5 + $0x100] sm:$0xff] }
  0xbc   : > { %6211 = vmatpush.msk.msrb.mxu2 %vm1155_vm1, %v9088_v13  ;;  %1049 = vmatpush.msra.mxu1 %v9087_v5  ;;  %vm846_vm1 = vcmp.eq.s32.totalorder %v9204_v8, %v816_v57 }
  0xbe   : > { %6219 = vmatpush.msk.msrb.mxu1 %vm1173_vm2, %v9088_v13  ;;  %6212 = vmatpush.msk.msrb.mxu2 %vm1153_vm3, %v9088_v13  ;;  %vm844_vm2 = vcmp.eq.s32.totalorder %v9207_v9, %v816_v57  ;;  %vm842_vm3 = vcmp.eq.s32.totalorder %v9217_v11, %v816_v57 }
  0xc0   : > { %6220 = vmatpush.msk.msrb.mxu1 %vm1171_vm4, %v9088_v13  ;;  %6213 = vmatpush.msk.msrb.mxu2 %vm1151_vm5, %v9088_v13  ;;  %vm840_vm4 = vcmp.eq.s32.totalorder %v9226_v14, %v816_v57  ;;  %vm838_vm5 = vcmp.eq.s32.totalorder %v9238_v17, %v816_v57 }
  0xc2   : > { %6214 = vmatpush.msk.msrb.mxu2 %vm1149_vm7, %v9088_v13  ;;  %vm836_vm7 = vcmp.eq.s32.totalorder %v9247_v19, %v816_v57  ;;  %v9567_v19 = vld [vmem:[%s11283_s3 + $0x60] sm:$0xff] }
  0xc3   : > { %6109 = vmatmul.msk.f32.gmra.mxu1 %vm675_vm6, %v425_v52  ;;  %6113 = vmatmul.msk.f32.gmra.mxu2 %vm675_vm6, %v425_v52  ;;  %v1614_v52 = vunpack.c.l.b16 %v6267_v49  ;;  %v8641_v49 = vld [vmem:[%s11285_s5 + $0x1b0] sm:$0xff] }
  0xc4   : > { %6215 = vmatpush.msk.msrb.mxu2 %vm1147_vm8, %v9088_v13  ;;  %vm834_vm8 = vcmp.eq.s32.totalorder %v9256_v21, %v816_v57 }
  0xc6   : > { %6216 = vmatpush.msk.msrb.mxu2 %vm1145_vm10, %v9088_v13  ;;  %vm832_vm10 = vcmp.eq.s32.totalorder %v9270_v26, %v816_v57 }
  0xc8   : > { %6217 = vmatpush.msk.msrb.mxu2 %vm1143_vm11, %v9088_v13  ;;  %vm830_vm11 = vcmp.eq.s32.totalorder %v9280_v27, %v816_v57  ;;  %v1459_v27 = vld [vmem:[%s11284_s4 + $0x8] sm:$0xff] }
  0xc9   : > { %1469 = vperm.xlu1 %9016, %v1459_v27   ;;  %v8603_v27 = vld [vmem:[%s11285_s5 + $0x74] sm:$0xff] }
  0xca   : > { %6218 = vmatpush.msk.msrb.mxu2 %vm1141_vm12, %v9088_v13  ;;  %vm828_vm12 = vcmp.eq.s32.totalorder %v9296_v29, %v816_v57 }
  0xcb   : > { %6110 = vmatmul.msk.f32.gmra.mxu1 %vm675_vm6, %v426_v53  ;;  %6114 = vmatmul.msk.f32.gmra.mxu2 %vm675_vm6, %v426_v53  ;;  %v8594_v53 = vld [vmem:[%s11285_s5 + $0x28] sm:$0xff] }
  0xcc   : > { %1310 = vmatpush.msrb.mxu2 %v9087_v5 }
  0xd3   : > { %6166 = vmatmul.msk.f32.vlgmr.msra.gmra.mxu1 %vm579_vm15, %v9380_v48  ;;  %1311 = vmatmul.f32.vlgmr.msrb.gmra.mxu2 %v9370_v43 }
  0xd4   : > { %1350 = vmatpush.msra.mxu1 %v9087_v5 }
  0xdb   : > { %6221 = vmatmul.msk.f32.vlgmr.msrb.gmra.mxu1 %vm579_vm15, %v9380_v48 }
  0xe3   : > { %1351 = vmatmul.f32.vlgmr.msra.gmra.mxu1 %v9370_v43 }
 0x120   : > { %v647_v55 = vpop.f32.mrf.mxu0 }
 0x126   : > { %v607_v54 = vpop.f32.mrf.mxu2 }
 0x128   : > { %v667_v56 = vpop.f32.mrf.mxu1 }
 0x129   : > { %v668_v58 = vadd.f32 %v667_v56, %v647_v55  ;;  %v8606_v55 = vld [vmem:[%s11285_s5 + $0x8c] sm:$0xff]  ;;  %v8619_v56 = vld [vmem:[%s11285_s5 + $0xf8] sm:$0xff] }
 0x12b   : > { %732 = vmatpush.msrb.mxu0 %v668_v58  ;;  %v8612_v58 = vld [vmem:[%s11285_s5 + $0xbc] sm:$0xff] }
 0x12c   : > { %6103 = vmatmul.msk.f32.vlgmr.msrb.gmra.mxu0 %vm675_vm6, %v6095_v59 }
 0x12d   : > { %6155 = vmatpush.msk.msra.mxu0 %vm852_vm13, %v9088_v13  ;;  %vm826_vm13 = vcmp.eq.s32.totalorder %v9302_v31, %v816_v57  ;;  %v9601_v31 = vld [vmem:[%s11283_s3 + $0x78] sm:$0xff] }
 0x12e   : > { %v627_v60 = vpop.f32.mrf.mxu2 }
 0x12f   : > { %v628_v61 = vadd.f32 %v627_v60, %v607_v54  ;;  %6156 = vmatpush.msk.msra.mxu0 %vm850_vm14, %v9088_v13  ;;  %vm824_vm14 = vcmp.eq.s32.totalorder %v9308_v33, %v816_v57  ;;  %v1627_v54 = vpack.c.b16 %v1614_v52, %v1614_v52  ;;  %v8605_v60 = vld [vmem:[%s11285_s5 + $0x84] sm:$0xff] }
 0x130   : > { %v9492_v62 = vpop.f32.mrf.mxu1  ;;  %v8624_v52 = vld [vmem:[%s11285_s5 + $0x120] sm:$0xff] }
 0x131   : > { %703 = vmatpush.msra.mxu3 %v628_v61  ;;  %v8618_v61 = vld [vmem:[%s11285_s5 + $0xf0] sm:$0xff] }
 0x132   : > { %6099 = vmatmul.msk.f32.vlgmr.msra.gmra.mxu3 %vm675_vm6, %v6095_v59  ;;  %v8593_v59 = vld [vmem:[%s11285_s5 + $0x20] sm:$0xff] }
 0x133   : > { %6140 = vmatpush.msk.msrb.mxu3 %vm848_vm0, %v9088_v13  ;;  %vm822_vm0 = vcmp.eq.s32.totalorder %v9314_v35, %v816_v57  ;;  %v1138_v35 = vadd.s32 15, %v9232_v16  ;;  %v1461_v16 = vld [vmem:[%s11284_s4 + $0x18] sm:$0xff] }
 0x134   : > { %6104 = vmatmul.msk.f32.gmra.mxu0 %vm675_vm6, %v6096_v63  ;;  %1479 = vperm.xlu2 %9017, %v1461_v16   ;;  %v8602_v16 = vld [vmem:[%s11285_s5 + $0x6c] sm:$0xff] }
 0x135   : > { %6141 = vmatpush.msk.msrb.mxu3 %vm846_vm1, %v9088_v13  ;;  %vm820_vm1 = vcmp.eq.s32.totalorder %v9346_v37, %v816_v57  ;;  %v1460_v37 = vld [vmem:[%s11284_s4 + $0x10] sm:$0xff] }
 0x136   : > { %v9504_v0 = vpop.f32.mrf.mxu2  ;;  %1474 = vperm.xlu1 %9016, %v1460_v37  }
 0x137   : > { %6142 = vmatpush.msk.msrb.mxu3 %vm844_vm2, %v9088_v13  ;;  %vm1188_vm2 = vcmp.eq.s32.totalorder %v9229_v15, %v1138_v35 }
 0x138   : > { %v9508_v1 = vpop.f32.mrf.mxu1 }
 0x139   : > { %6143 = vmatpush.msk.msrb.mxu3 %vm842_vm3, %v9088_v13  ;;  %vm1186_vm3 = vcmp.eq.s32.totalorder %v9259_v22, %v1138_v35  ;;  %v6169_v22 = vld [vmem:[%s11283_s3 + $0x50] sm:$0xff] }
 0x13a   : > { %6100 = vmatmul.msk.f32.gmra.mxu3 %vm675_vm6, %v6096_v63  ;;  %v8611_v63 = vld [vmem:[%s11285_s5 + $0xb4] sm:$0xff] }
 0x13b   : > { %6144 = vmatpush.msk.msrb.mxu3 %vm840_vm4, %v9088_v13  ;;  %vm1184_vm4 = vcmp.eq.s32.totalorder %v9293_v28, %v1138_v35  ;;  %v6170_v28 = vld [vmem:[%s11283_s3 + $0x58] sm:$0xff] }
 0x13c   : > { %6105 = vmatmul.msk.f32.gmra.mxu0 %vm675_vm6, %v6097_v2 }
 0x13d   : > { %6145 = vmatpush.msk.msrb.mxu3 %vm838_vm5, %v9088_v13  ;;  %vm1182_vm5 = vcmp.eq.s32.totalorder %v9299_v30, %v1138_v35 }
 0x13e   : > { %v9521_v3 = vpop.f32.mrf.mxu2 }
 0x13f   : > { %6146 = vmatpush.msk.msrb.mxu3 %vm836_vm7, %v9088_v13  ;;  %vm1180_vm7 = vcmp.eq.s32.totalorder %v9305_v32, %v1138_v35 }
 0x140   : > { %v9525_v4 = vpop.f32.mrf.mxu1 }
 0x141   : > { %6147 = vmatpush.msk.msrb.mxu3 %vm834_vm8, %v9088_v13  ;;  %vm1176_vm8 = vcmp.eq.s32.totalorder %v9341_v36, %v1138_v35  ;;  %v8608_v36 = vld [vmem:[%s11285_s5 + $0x9c] sm:$0xff] }
 0x142   : > { %6101 = vmatmul.msk.f32.gmra.mxu3 %vm675_vm6, %v6097_v2  ;;  %v8592_v2 = vld [vmem:[%s11285_s5 + $0x18] sm:$0xff] }
 0x143   : > { %6148 = vmatpush.msk.msrb.mxu3 %vm832_vm10, %v9088_v13  ;;  %vm1174_vm10 = vcmp.eq.s32.totalorder %v9349_v38, %v1138_v35  ;;  %v8595_v38 = vld [vmem:[%s11285_s5 + $0x30] sm:$0xff] }
 0x144   : > { %6106 = vmatmul.msk.f32.gmra.mxu0 %vm675_vm6, %v6098_v6 }
 0x145   : > { %6149 = vmatpush.msk.msrb.mxu3 %vm830_vm11, %v9088_v13  ;;  %vm1643_vm11 = vcmask 1041408  }
 0x146   : > { %v9538_v7 = vpop.f32.mrf.mxu2  ;;  %v1645_v57 = vsel %vm1643_vm11, %v1627_v54, 0  ;;  %v8635_v54 = vld [vmem:[%s11285_s5 + $0x17c] sm:$0xff] }
 0x147   : > { %6150 = vmatpush.msk.msrb.mxu3 %vm828_vm12, %v9088_v13 }
 0x148   : > { %v9542_v8 = vpop.f32.mrf.mxu1 }
 0x149   : > { %6151 = vmatpush.msk.msrb.mxu3 %vm826_vm13, %v9088_v13 }
 0x14a   : > { %6102 = vmatmul.msk.f32.gmra.mxu3 %vm675_vm6, %v6098_v6  ;;  %v6390_v6 = vld [vmem:[%s11285_s5 + $0x128] sm:$0x3] }
 0x14b   : > { %6152 = vmatpush.msk.msrb.mxu3 %vm824_vm14, %v9088_v13 }
 0x14c   : > { %6157 = vmatmul.msk.f32.vlgmr.msra.gmra.mxu0 %vm579_vm15, %v9380_v48 }
 0x14d   : > { %6153 = vmatpush.msk.msrb.mxu3 %vm822_vm0, %v9088_v13 }
 0x14e   : > { %v9553_v9 = vpop.f32.mrf.mxu2 }
 0x14f   : > { %6154 = vmatpush.msk.msrb.mxu3 %vm820_vm1, %v9088_v13 }
 0x150   : > { %v1051_v10 = vpop.f32.mrf.mxu1 }
 0x151   : > { %989 = vmatpush.msrb.mxu3 %v9087_v5 }
 0x152   : > { %990 = vmatmul.f32.vlgmr.msrb.gmra.mxu3 %v9370_v43 }
 0x153   : > { %1029 = vmatpush.msra.mxu3 %v9087_v5 }
 0x156   : > { %v1312_v11 = vpop.f32.mrf.mxu2 }
 0x158   : > { %v1332_v12 = vpop.f32.mrf.mxu1 }
 0x159   : > { %v1333_v14 = vadd.f32 %v1332_v12, %v1312_v11  ;;  %v1858_v11 = vunpack.c.l.b16 %v6390_v6  ;;  %v8617_v12 = vld [vmem:[%s11285_s5 + $0xe8] sm:$0xff] }
 0x15a   : > { %1030 = vmatmul.f32.vlgmr.msra.gmra.mxu3 %v9370_v43  ;;  %v6203_v43 = vsel %vm1188_vm2, 1.0, %v9087_v5  ;;  %v8621_v6 = vld [vmem:[%s11285_s5 + $0x108] sm:$0xff] }
 0x15b   : > { %1407 = vmatpush.msra.mxu2 %v1333_v14  ;;  %v8610_v14 = vld [vmem:[%s11285_s5 + $0xac] sm:$0xff]  ;;  %v1871_v37 = vpack.c.b16 %v1858_v11, %v1858_v11 }
 0x15c   : > { %6235 = vmatmul.msk.f32.vlgmr.msra.gmra.mxu2 %vm675_vm6, %v9567_v19 }
 0x160   : > { %v1352_v46 = vpop.f32.mrf.mxu1 }
 0x164   : > { %6236 = vmatmul.msk.f32.gmra.mxu2 %vm675_vm6, %v9578_v23 }
 0x16c   : > { %6237 = vmatmul.msk.f32.gmra.mxu2 %vm675_vm6, %v9587_v25 }
 0x174   : > { %6238 = vmatmul.msk.f32.gmra.mxu2 %vm675_vm6, %v9601_v31 }
 0x1a9   : > { %v9560_v17 = vpop.f32.mrf.mxu0 }
 0x1b1   : > { %v9571_v20 = vpop.f32.mrf.mxu0 }
 0x1b5   : > { %v9562_v18 = vpop.f32.mrf.mxu3 }
 0x1b9   : > { %v9582_v24 = vpop.f32.mrf.mxu0 }
 0x1bd   : > { %v9573_v21 = vpop.f32.mrf.mxu3 }
 0x1c1   : > { %v9596_v29 = vpop.f32.mrf.mxu0 }
 0x1c5   : > { %v9589_v26 = vpop.f32.mrf.mxu3 }
 0x1c9   : > { %v1011_v39 = vpop.f32.mrf.mxu0 }
 0x1cd   : > { %v9603_v33 = vpop.f32.mrf.mxu3 }
 0x1d5   : > { %v991_v40 = vpop.f32.mrf.mxu3 }
 0x1d6   : > { %v1012_v41 = vadd.f32 %v1011_v39, %v991_v40  ;;  %v8616_v39 = vld [vmem:[%s11285_s5 + $0xe0] sm:$0xff] }
 0x1d8   : > { %1086 = vmatpush.msrb.mxu0 %v1012_v41  ;;  %v8609_v41 = vld [vmem:[%s11285_s5 + $0xa4] sm:$0xff] }
 0x1d9   : > { %6171 = vmatmul.msk.f32.vlgmr.msrb.gmra.mxu0 %vm675_vm6, %v6167_v42 }
 0x1da   : > { %6222 = vmatpush.msk.msra.mxu0 %vm583_vm9, %v6203_v43  ;;  %vm1178_vm9 = vcmp.eq.s32.totalorder %v9311_v34, %v1138_v35  ;;  %v8596_v34 = vld [vmem:[%s11285_s5 + $0x38] sm:$0xff]  ;;  %v1526_v35 = vld [vmem:[%s11285_s5 + $0x60] sm:$0x3] }
 0x1db   : > { %1754 = vmatpush.bf16.msrb.mxu2 %v8596_v34  ;;  %v1723_v43 = vunpack.c.l.b16 %v1526_v35  ;;  %v1465_v35 = vpop.permute.xlu0 %1464 }
 0x1dc   : > { %6223 = vmatpush.msk.msra.mxu0 %vm1186_vm3, %v9088_v13 }
 0x1dd   : > { %v1031_v15 = vpop.f32.mrf.mxu3 }
 0x1de   : > { %v1052_v44 = vadd.f32 %v1051_v10, %v1031_v15  ;;  %6224 = vmatpush.msk.msra.mxu0 %vm1184_vm4, %v9088_v13  ;;  %v8604_v10 = vld [vmem:[%s11285_s5 + $0x7c] sm:$0xff]  ;;  %v1888_v15 = vsel %vm1643_vm11, %v1871_v37, 0 }
 0x1df   : > { %1755 = vmatpush.bf16.msrb.mxu2 %v8595_v38  ;;  %v1409_v11 = vpop.f32.mrf.mxu2 }
 0x1e0   : > { %1115 = vmatpush.msrb.mxu3 %v1052_v44  ;;  %6225 = vmatpush.msk.msra.mxu0 %vm1182_vm5, %v9088_v13  ;;  %v8615_v44 = vld [vmem:[%s11285_s5 + $0xd8] sm:$0xff] }
 0x1e1   : > { %6172 = vmatmul.msk.f32.gmra.mxu0 %vm675_vm6, %v6168_v45  ;;  %6175 = vmatmul.msk.f32.vlgmr.msrb.gmra.mxu3 %vm675_vm6, %v6167_v42  ;;  %v8590_v42 = vld [vmem:[%s11285_s5 + $0x8] sm:$0xff] }
 0x1e2   : > { %6226 = vmatpush.msk.msra.mxu0 %vm1180_vm7, %v9088_v13  ;;  %1647 = vmatpush.bf16.msra.mxu3 %v8608_v36  ;;  %v8601_v36 = vld [vmem:[%s11285_s5 + $0x64] sm:$0xff] }
 0x1e3   : > { %1756 = vmatpush.bf16.msrb.mxu2 %v8594_v53  ;;  %v8640_v53 = vld [vmem:[%s11285_s5 + $0x1a8] sm:$0xff] }
 0x1e4   : > { %6227 = vmatpush.msk.msra.mxu0 %vm1178_vm9, %v9088_v13 }
 0x1e6   : > { %6228 = vmatpush.msk.msra.mxu0 %vm1176_vm8, %v9088_v13 }
 0x1e7   : > { %1757 = vmatpush.bf16.msrb.mxu2 %v8593_v59  ;;  %v8598_v59 = vld [vmem:[%s11285_s5 + $0x48] sm:$0xff] }
 0x1e8   : > { %6229 = vmatpush.msk.msra.mxu0 %vm1174_vm10, %v9088_v13 }
 0x1e9   : > { %6173 = vmatmul.msk.f32.gmra.mxu0 %vm675_vm6, %v6169_v22  ;;  %6176 = vmatmul.msk.f32.gmra.mxu3 %vm675_vm6, %v6168_v45 }
 0x1ea   : > { %1370 = vmatpush.msra.mxu0 %v9087_v5 }
 0x1eb   : > { %1758 = vmatpush.bf16.msrb.mxu2 %v8592_v2  ;;  %v8597_v2 = vld [vmem:[%s11285_s5 + $0x40] sm:$0xff] }
 0x1ec   : > { %1663 = vmatpush.bf16.msrb.mxu0 %v1645_v57  ;;  %v8639_v57 = vld [vmem:[%s11285_s5 + $0x1a0] sm:$0xff] }
 0x1f0   : > { %1664 = vmatpush.bf16.msrb.mxu0 %v8612_v58  ;;  %v8634_v58 = vld [vmem:[%s11285_s5 + $0x174] sm:$0xff] }
 0x1f1   : > { %6174 = vmatmul.msk.f32.gmra.mxu0 %vm675_vm6, %v6170_v28  ;;  %6177 = vmatmul.msk.f32.gmra.mxu3 %vm675_vm6, %v6169_v22  ;;  %v8589_v22 = vld [vmem:[%s11285_s5] sm:$0xff] }
 0x1f4   : > { %1665 = vmatpush.bf16.msrb.mxu0 %v8611_v63  ;;  %v8633_v63 = vld [vmem:[%s11285_s5 + $0x16c] sm:$0xff] }
 0x1f8   : > { %1666 = vmatpush.bf16.msrb.mxu0 %v8610_v14 }
 0x1f9   : > { %6178 = vmatmul.msk.f32.gmra.mxu3 %vm675_vm6, %v6170_v28  ;;  %6230 = vmatmul.msk.f32.vlgmr.msra.gmra.mxu0 %vm579_vm15, %v9380_v48  ;;  %v8607_v48 = vld [vmem:[%s11285_s5 + $0x94] sm:$0xff] }
 0x1fa   : > { %1648 = vmatpush.bf16.msra.mxu3 %v8607_v48  ;;  %v8614_v28 = vld [vmem:[%s11285_s5 + $0xd0] sm:$0xff]  ;;  %v8643_v48 = vld [vmem:[%s11285_s5 + $0x1c0] sm:$0xff] }
 0x1fc   : > { %1667 = vmatpush.bf16.msrb.mxu0 %v8609_v41 }
 0x1fe   : > { %1649 = vmatpush.bf16.msra.mxu3 %v8606_v55  ;;  %v8599_v55 = vld [vmem:[%s11285_s5 + $0x50] sm:$0xff] }
 0x200   : > { %1906 = vmatpush.bf16.msra.mxu0 %v1888_v15 }
 0x202   : > { %1650 = vmatpush.bf16.msra.mxu3 %v8605_v60  ;;  %v8622_v60 = vld [vmem:[%s11285_s5 + $0x110] sm:$0xff] }
 0x204   : > { %1907 = vmatpush.bf16.msra.mxu0 %v8624_v52  ;;  %v8655_v52 = vld [vmem:[%s11285_s5 + $0x224] sm:$0xff] }
 0x206   : > { %1651 = vmatpush.bf16.msra.mxu3 %v8604_v10  ;;  %v8637_v10 = vld [vmem:[%s11285_s5 + $0x190] sm:$0xff] }
 0x20a   : > { %1652 = vmatpush.bf16.msra.mxu3 %v8603_v27 }
 0x20e   : > { %1653 = vmatpush.bf16.msra.mxu3 %v8602_v16 }
 0x212   : > { %1654 = vmatpush.bf16.msra.mxu3 %v8601_v36  ;;  %v8656_v36 = vld [vmem:[%s11285_s5 + $0x22c] sm:$0xff] }
 0x256   : > { %v9654_v13 = vpop.f32.mrf.mxu0 }
 0x25e   : > { %v9656_v30 = vpop.f32.mrf.mxu0 }
 0x264   : > { %v1117_v14 = vpop.f32.mrf.mxu3 }
 0x266   : > { %v9658_v32 = vpop.f32.mrf.mxu0 }
 0x26e   : > { %v9660_v5 = vpop.f32.mrf.mxu0 }
 0x276   : > { %v1372_v47 = vpop.f32.mrf.mxu0 }
 0x277   : > { %v1373_v50 = vadd.f32 %v1372_v47, %v1352_v46  ;;  %v8613_v46 = vld [vmem:[%s11285_s5 + $0xc8] sm:$0xff] }
 0x278   : > { %v8644_v47 = vld [vmem:[%s11285_s5 + $0x1c8] sm:$0xff] }
 0x279   : > { %1436 = vmatpush.msrb.mxu1 %v1373_v50  ;;  %v8636_v50 = vld [vmem:[%s11285_s5 + $0x184] sm:$0xff] }
 0x27a   : > { %6239 = vmatmul.msk.f32.vlgmr.msrb.gmra.mxu1 %vm675_vm6, %v9567_v19  ;;  %v6464_v19 = vld [vmem:[%s11285_s5 + $0x18c] sm:$0x3] }
 0x27b   : > { %1890 = vmatpush.bf16.msra.mxu1 %v8620_v51  ;;  %v1995_v40 = vunpack.c.l.b16 %v6464_v19  ;;  %v8600_v51 = vld [vmem:[%s11285_s5 + $0x58] sm:$0xff] }
 0x27d   : > { %v2008_v45 = vpack.c.b16 %v1995_v40, %v1995_v40 }
 0x27f   : > { %1891 = vmatpush.bf16.msra.mxu1 %v8619_v56  ;;  %v2025_v34 = vsel %vm1643_vm11, %v2008_v45, 0  ;;  %v8623_v56 = vld [vmem:[%s11285_s5 + $0x118] sm:$0xff] }
 0x280   : > { %1908 = vmatpush.bf16.msra.mxu0 %v8623_v56 }
 0x282   : > { %6240 = vmatmul.msk.f32.gmra.mxu1 %vm675_vm6, %v9578_v23  ;;  %v8591_v23 = vld [vmem:[%s11285_s5 + $0x10] sm:$0xff] }
 0x283   : > { %1892 = vmatpush.bf16.msra.mxu1 %v8618_v61  ;;  %1759 = vmatpush.bf16.msrb.mxu2 %v8591_v23  ;;  %v8638_v61 = vld [vmem:[%s11285_s5 + $0x198] sm:$0xff]  ;;  %v805_v23 = vadd.f32 %v9504_v0, %v9560_v17  ;;  %v782_v17 = vadd.f32 %v9525_v4, %v9589_v26  ;;  %v811_v4 = vadd.f32 %v9538_v7, %v9582_v24  ;;  %v8668_v7 = vld [vmem:[%s11285_s5 + $0x290] sm:$0xff] }
 0x284   : > { %1909 = vmatpush.bf16.msra.mxu0 %v8622_v60  ;;  %v8654_v60 = vld [vmem:[%s11285_s5 + $0x21c] sm:$0xff] }
 0x285   : > { %v1130_v37 = vadd.f32 %v1117_v14, %v805_v23  ;;  %v8653_v14 = vld [vmem:[%s11285_s5 + $0x214] sm:$0xff] }
 0x287   : > { %1893 = vmatpush.bf16.msra.mxu1 %v8617_v12  ;;  %1760 = vmatpush.bf16.msrb.mxu2 %v8590_v42  ;;  %v776_v12 = vadd.f32 %v9492_v62, %v9562_v18  ;;  %v6538_v62 = vld [vmem:[%s11285_s5 + $0x1f0] sm:$0x3]  ;;  %v9842_v18 = vpop.permute.xlu1 %1469 }
 0x288   : > { %1910 = vmatpush.bf16.msra.mxu0 %v8621_v6  ;;  %v2132_v0 = vunpack.c.l.b16 %v6538_v62  ;;  %v8645_v62 = vld [vmem:[%s11285_s5 + $0x1d0] sm:$0xff] }
 0x289   : > { %v1129_v19 = vadd.f32 %v9654_v13, %v776_v12  ;;  %v8666_v12 = vld [vmem:[%s11285_s5 + $0x280] sm:$0xff] }
 0x28a   : > { %6241 = vmatmul.msk.f32.gmra.mxu1 %vm675_vm6, %v9587_v25  ;;  %v1736_v25 = vpack.c.b16 %v1723_v43, %v1723_v43  ;;  %v9837_v43 = vpop.f32.mrf.mxu3 }
 0x28b   : > { %1894 = vmatpush.bf16.msra.mxu1 %v8616_v39  ;;  %1761 = vmatpush.bf16.msrb.mxu2 %v8589_v22  ;;  %v1450_v27 = vadd.f32 %v1409_v11, %v1129_v19  ;;  %v9835_v39 = vpop.f32.mrf.mxu2  ;;  %v1133_v22 = vadd.f32 %v9658_v32, %v782_v17  ;;  %v8632_v32 = vld [vmem:[%s11285_s5 + $0x164] sm:$0xff] }
 0x28c   : > { %v1752_v38 = vsel %vm1643_vm11, %v1736_v25, 0  ;;  %v8647_v11 = vld [vmem:[%s11285_s5 + $0x1e0] sm:$0xff] }
 0x28d   : > { %1770 = vmatpush.bf16.msrb.mxu3 %v1752_v38  ;;  %v1482_v41 = vadd.f32 %v1465_v35, %v1450_v27  ;;  %v2145_v38 = vpack.c.b16 %v2132_v0, %v2132_v0  ;;  %v8629_v27 = vld [vmem:[%s11285_s5 + $0x14c] sm:$0xff]  ;;  %v6760_v0 = vld [vmem:[%s11285_s5 + $0x31c] sm:$0x3] }
 0x28f   : > { %1895 = vmatpush.bf16.msra.mxu1 %v8615_v44  ;;  %2043 = vmatpush.bf16.msra.mxu2 %v2025_v34  ;;  %v1490_v13 = vmax.f32 %v1482_v41, 0.0  ;;  %v1475_v24 = vpop.permute.xlu1 %1474 }
 0x291   : > { %1771 = vmatpush.bf16.msrb.mxu3 %v8600_v51  ;;  %v2162_v51 = vsel %vm1643_vm11, %v2145_v38, 0  ;;  %v8663_v38 = vld [vmem:[%s11285_s5 + $0x268] sm:$0xff] }
 0x292   : > { %6242 = vmatmul.msk.f32.gmra.mxu1 %vm675_vm6, %v9601_v31  ;;  %v8642_v31 = vld [vmem:[%s11285_s5 + $0x1b8] sm:$0xff]  ;;  %v1123_v26 = vpop.f32.mrf.mxu3 }
 0x293   : > { %1896 = vmatpush.bf16.msra.mxu1 %v8614_v28  ;;  %2044 = vmatpush.bf16.msra.mxu2 %v8636_v50  ;;  %v1415_v34 = vpop.f32.mrf.mxu2 }
 0x295   : > { %1772 = vmatpush.bf16.msrb.mxu3 %v8599_v55  ;;  %v8631_v55 = vld [vmem:[%s11285_s5 + $0x15c] sm:$0xff] }
 0x297   : > { %1897 = vmatpush.bf16.msra.mxu1 %v8613_v46  ;;  %2045 = vmatpush.bf16.msra.mxu2 %v8635_v54 }
 0x299   : > { %1773 = vmatpush.bf16.msrb.mxu3 %v8598_v59  ;;  %v8667_v59 = vld [vmem:[%s11285_s5 + $0x288] sm:$0xff] }
 0x29b   : > { %2164 = vmatpush.bf16.msrb.mxu1 %v8644_v47  ;;  %2046 = vmatpush.bf16.msra.mxu2 %v8634_v58  ;;  %v8648_v58 = vld [vmem:[%s11285_s5 + $0x1e8] sm:$0xff] }
 0x29d   : > { %1774 = vmatpush.bf16.msrb.mxu3 %v8597_v2  ;;  %v6686_v2 = vld [vmem:[%s11285_s5 + $0x2b8] sm:$0x3] }
 0x29e   : > { %v2406_v23 = vunpack.c.l.b16 %v6686_v2 }
 0x29f   : > { %2165 = vmatpush.bf16.msrb.mxu1 %v8643_v48  ;;  %2047 = vmatpush.bf16.msra.mxu2 %v8633_v63  ;;  %v1454_v48 = vadd.f32 %v1415_v34, %v1133_v22  ;;  %v8630_v63 = vld [vmem:[%s11285_s5 + $0x154] sm:$0xff]  ;;  %v8651_v22 = vld [vmem:[%s11285_s5 + $0x204] sm:$0xff]  ;;  %v2543_v34 = vunpack.c.l.b16 %v6760_v0  ;;  %v8704_v0 = vld [vmem:[%s11285_s5 + $0x3bc] sm:$0xff] }
 0x2a0   : > { %v2419_v41 = vpack.c.b16 %v2406_v23, %v2406_v23  ;;  %v8683_v23 = vld [vmem:[%s11285_s5 + $0x30c] sm:$0xff] }
 0x2a1   : > { %v1486_v56 = vadd.f32 %v1475_v24, %v1454_v48  ;;  %v8626_v48 = vld [vmem:[%s11285_s5 + $0x134] sm:$0xff] }
 0x2a3   : > { %2166 = vmatpush.bf16.msrb.mxu1 %v8642_v31  ;;  %v1494_v6 = vmax.f32 %v1486_v56, 0.0  ;;  %v8625_v56 = vld [vmem:[%s11285_s5 + $0x12c] sm:$0xff] }
 0x2a7   : > { %2167 = vmatpush.bf16.msrb.mxu1 %v8641_v49 }
 0x2ab   : > { %2168 = vmatpush.bf16.msrb.mxu1 %v8640_v53  ;;  %v1134_v53 = vadd.f32 %v1123_v26, %v811_v4  ;;  %v8672_v4 = vld [vmem:[%s11285_s5 + $0x2b0] sm:$0xff] }
 0x2af   : > { %2169 = vmatpush.bf16.msrb.mxu1 %v8639_v57 }
 0x2b3   : > { %2170 = vmatpush.bf16.msrb.mxu1 %v8638_v61 }
 0x2b7   : > { %2171 = vmatpush.bf16.msrb.mxu1 %v8637_v10 }
 0x2f7   : > { %v1438_v40 = vpop.f32.mrf.mxu1 }
 0x2f8   : > { %v1451_v42 = vadd.f32 %v1438_v40, %v1130_v37  ;;  %v8665_v37 = vld [vmem:[%s11285_s5 + $0x278] sm:$0xff]  ;;  %v8652_v40 = vld [vmem:[%s11285_s5 + $0x20c] sm:$0xff] }
 0x2fa   : > { %v1483_v16 = vadd.f32 %v1465_v35, %v1451_v42  ;;  %v8646_v35 = vld [vmem:[%s11285_s5 + $0x1d8] sm:$0xff] }
 0x2fc   : > { %v1491_v15 = vmax.f32 %v1483_v16, 0.0  ;;  %v8628_v16 = vld [vmem:[%s11285_s5 + $0x144] sm:$0xff] }
 0x2fe   : > { %v1498_v44 = vpack.c.bf16 %v1491_v15, %v1490_v13  ;;  %v8664_v15 = vld [vmem:[%s11285_s5 + $0x270] sm:$0xff] }
 0x2ff   : > { %v9846_v45 = vpop.f32.mrf.mxu1 }
 0x300   : > { %v1554_v25 = vunpack.c.l.b16 %v1498_v44  ;;  %v1555_v28 = vunpack.c.h.b16 %v1498_v44  ;;  %v2436_v44 = vsel %vm1643_vm11, %v2419_v41, 0 }
 0x302   : > { %v9852_v46 = vpack.c.b16 %v1554_v25, %v1554_v25  ;;  %v9854_v47 = vpack.c.b16 %v1555_v28, %v1555_v28  ;;  %v6612_v25 = vld [vmem:[%s11285_s5 + $0x254] sm:$0x3]  ;;  %v8627_v28 = vld [vmem:[%s11285_s5 + $0x13c] sm:$0xff] }
 0x303   : > { %v2269_v26 = vunpack.c.l.b16 %v6612_v25 }
 0x304   : > { %1762 = vmatmul.bf16.vlgmr.msrb.gmra.mxu2 %v9852_v46  ;;  %v9863_v31 = vshrl.u32 %v9852_v46, 16  ;;  %v9866_v49 = vshrl.u32 %v9854_v47, 16  ;;  %v1806_v50 = vrot.slane %v9852_v46, 1  ;;  %v1807_v13 = vrot.slane %v9854_v47, 1 }
 0x305   : > { %2301 = vmatpush.bf16.msrb.mxu2 %v8656_v36  ;;  %v2080_v17 = vrot.slane %v9852_v46, 2  ;;  %v6834_v36 = vld [vmem:[%s11285_s5 + $0x380] sm:$0x3] }
 0x306   : > { %1655 = vmatmul.bf16.vlgmr.msra.gmra.mxu3 %v9863_v31  ;;  %6316 = vmatmul.msk.bf16.vlgmr.msrb.gmra.mxu0 %vm579_vm15, %v9866_v49  ;;  %v1944_v42 = vrot.slane %v9866_v49, 1  ;;  %v1943_v2 = vrot.slane %v9863_v31, 1 }
 0x307   : > { %1898 = vmatmul.bf16.vlgmr.msra.gmra.mxu1 %v1806_v50  ;;  %2027 = vmatpush.bf16.msra.mxu3 %v8632_v32  ;;  %v1444_v54 = vpop.f32.mrf.mxu1  ;;  %v8650_v32 = vld [vmem:[%s11285_s5 + $0x1fc] sm:$0xff]  ;;  %v2683_v50 = vunpack.c.l.b16 %v6834_v36  ;;  %v2492_v36 = vrot.slane %v9866_v49, 3 }
 0x308   : > { %2180 = vmatpush.bf16.msrb.mxu0 %v2162_v51  ;;  %2438 = vmatpush.bf16.msra.mxu1 %v8668_v7  ;;  %v1455_v57 = vadd.f32 %v1444_v54, %v1134_v53  ;;  %v2556_v7 = vpack.c.b16 %v2543_v34, %v2543_v34  ;;  %v8671_v51 = vld [vmem:[%s11285_s5 + $0x2a8] sm:$0xff]  ;;  %v8649_v53 = vld [vmem:[%s11285_s5 + $0x1f4] sm:$0xff]  ;;  %v808_v54 = vadd.f32 %v9521_v3, %v9571_v20  ;;  %v8670_v20 = vld [vmem:[%s11285_s5 + $0x2a0] sm:$0xff] }
 0x309   : > { %2302 = vmatpush.bf16.msrb.mxu2 %v8655_v52  ;;  %v2282_v52 = vpack.c.b16 %v2269_v26, %v2269_v26  ;;  %v8661_v3 = vld [vmem:[%s11285_s5 + $0x258] sm:$0xff]  ;;  %v8716_v34 = vld [vmem:[%s11285_s5 + $0x420] sm:$0xff]  ;;  %v8679_v26 = vld [vmem:[%s11285_s5 + $0x2ec] sm:$0xff] }
 0x30a   : > { %v1487_v61 = vadd.f32 %v1475_v24, %v1455_v57  ;;  %v8662_v24 = vld [vmem:[%s11285_s5 + $0x260] sm:$0xff]  ;;  %v2696_v57 = vpack.c.b16 %v2683_v50, %v2683_v50  ;;  %v8688_v50 = vld [vmem:[%s11285_s5 + $0x338] sm:$0xff] }
 0x30b   : > { %2028 = vmatpush.bf16.msra.mxu3 %v8631_v55  ;;  %v779_v55 = vadd.f32 %v9508_v1, %v9573_v21  ;;  %v2299_v1 = vsel %vm1643_vm11, %v2282_v52, 0  ;;  %v8714_v52 = vld [vmem:[%s11285_s5 + $0x410] sm:$0xff] }
 0x30c   : > { %v1495_v10 = vmax.f32 %v1487_v61, 0.0  ;;  %2181 = vmatpush.bf16.msrb.mxu0 %v8648_v58  ;;  %2439 = vmatpush.bf16.msra.mxu1 %v8667_v59  ;;  %v2573_v58 = vsel %vm1643_vm11, %v2556_v7, 0  ;;  %v2217_v61 = vrot.slane %v9863_v31, 2  ;;  %v8678_v7 = vld [vmem:[%s11285_s5 + $0x2e4] sm:$0xff] }
 0x30d   : > { %2303 = vmatpush.bf16.msrb.mxu2 %v8654_v60  ;;  %v1131_v59 = vadd.f32 %v9656_v30, %v779_v55  ;;  %v1132_v60 = vadd.f32 %v9837_v43, %v808_v54  ;;  %v2713_v30 = vsel %vm1643_vm11, %v2696_v57, 0  ;;  %v8684_v43 = vld [vmem:[%s11285_s5 + $0x314] sm:$0xff]  ;;  %v8701_v54 = vld [vmem:[%s11285_s5 + $0x3a4] sm:$0xff]  ;;  %v8677_v55 = vld [vmem:[%s11285_s5 + $0x2dc] sm:$0xff] }
 0x30e   : > { %v9906_v19 = vpack.c.bf16 %v1495_v10, %v1494_v6  ;;  %v8669_v6 = vld [vmem:[%s11285_s5 + $0x298] sm:$0xff]  ;;  %v2081_v10 = vrot.slane %v9854_v47, 2  ;;  %v8713_v57 = vld [vmem:[%s11285_s5 + $0x408] sm:$0xff] }
 0x30f   : > { %2029 = vmatpush.bf16.msra.mxu3 %v8630_v63  ;;  %v1453_v21 = vadd.f32 %v9846_v45, %v1132_v60  ;;  %v1452_v63 = vadd.f32 %v9835_v39, %v1131_v59  ;;  %v8660_v45 = vld [vmem:[%s11285_s5 + $0x24c] sm:$0xff]  ;;  %v8696_v39 = vld [vmem:[%s11285_s5 + $0x378] sm:$0xff] }
 0x310   : > { %2182 = vmatpush.bf16.msrb.mxu0 %v8647_v11  ;;  %2440 = vmatpush.bf16.msra.mxu1 %v8666_v12  ;;  %v2354_v11 = vrot.slane %v9852_v46, 3  ;;  %v8692_v12 = vld [vmem:[%s11285_s5 + $0x358] sm:$0xff] }
 0x311   : > { %2304 = vmatpush.bf16.msrb.mxu2 %v8653_v14  ;;  %v1485_v14 = vadd.f32 %v9842_v18, %v1453_v21  ;;  %v1484_v46 = vadd.f32 %v9842_v18, %v1452_v63  ;;  %v8682_v18 = vld [vmem:[%s11285_s5 + $0x304] sm:$0xff]  ;;  %v8700_v59 = vld [vmem:[%s11285_s5 + $0x39c] sm:$0xff]  ;;  %v8676_v60 = vld [vmem:[%s11285_s5 + $0x2d4] sm:$0xff] }
 0x312   : > { %v8675_v63 = vld [vmem:[%s11285_s5 + $0x2cc] sm:$0xff] }
 0x313   : > { %2030 = vmatpush.bf16.msra.mxu3 %v8629_v27  ;;  %v8659_v27 = vld [vmem:[%s11285_s5 + $0x244] sm:$0xff]  ;;  %v1492_v41 = vmax.f32 %v1484_v46, 0.0  ;;  %v8710_v46 = vld [vmem:[%s11285_s5 + $0x3f0] sm:$0xff] }
 0x314   : > { %2183 = vmatpush.bf16.msrb.mxu0 %v8646_v35  ;;  %2441 = vmatpush.bf16.msra.mxu1 %v8665_v37  ;;  %v8695_v35 = vld [vmem:[%s11285_s5 + $0x370] sm:$0xff] }
 0x315   : > { %6513 = vmatmul.msk.bf16.vlgmr.msra.gmra.mxu2 %vm579_vm15, %v1944_v42  ;;  %v8691_v37 = vld [vmem:[%s11285_s5 + $0x350] sm:$0xff]  ;;  %v8658_v42 = vld [vmem:[%s11285_s5 + $0x23c] sm:$0xff] }
 0x316   : > { %2305 = vmatpush.bf16.msrb.mxu2 %v8652_v40  ;;  %6365 = vmatmul.msk.bf16.vlgmr.msrb.gmra.mxu3 %vm579_vm15, %v9854_v47  ;;  %v1493_v40 = vmax.f32 %v1485_v14, 0.0  ;;  %v8674_v14 = vld [vmem:[%s11285_s5 + $0x2c4] sm:$0xff] }
 0x317   : > { %6439 = vmatmul.msk.bf16.vlgmr.msra.gmra.mxu0 %vm579_vm15, %v1807_v13  ;;  %2031 = vmatpush.bf16.msra.mxu3 %v8628_v16  ;;  %v8694_v16 = vld [vmem:[%s11285_s5 + $0x368] sm:$0xff] }
 0x318   : > { %2172 = vmatmul.bf16.vlgmr.msrb.gmra.mxu1 %v2080_v17  ;;  %2184 = vmatpush.bf16.msrb.mxu0 %v8645_v62  ;;  %v8690_v62 = vld [vmem:[%s11285_s5 + $0x348] sm:$0xff]  ;;  %v10039_v13 = vpack.c.bf16 %v1493_v40, %v1492_v41  ;;  %v8657_v17 = vld [vmem:[%s11285_s5 + $0x234] sm:$0xff] }
 0x319   : > { %2442 = vmatpush.bf16.msra.mxu1 %v8664_v15  ;;  %v8681_v15 = vld [vmem:[%s11285_s5 + $0x2fc] sm:$0xff]  ;;  %v8697_v40 = vld [vmem:[%s11285_s5 + $0x384] sm:$0xff] }
 0x31a   : > { %2306 = vmatpush.bf16.msrb.mxu2 %v8651_v22  ;;  %v8680_v22 = vld [vmem:[%s11285_s5 + $0x2f4] sm:$0xff]  ;;  %v2630_v25 = vunpack.c.h.b16 %v10039_v13 }
 0x31b   : > { %2032 = vmatpush.bf16.msra.mxu3 %v8627_v28  ;;  %v8689_v28 = vld [vmem:[%s11285_s5 + $0x340] sm:$0xff] }
 0x31c   : > { %2454 = vmatpush.bf16.msra.mxu0 %v2436_v44  ;;  %v8693_v44 = vld [vmem:[%s11285_s5 + $0x360] sm:$0xff] }
 0x31d   : > { %2443 = vmatpush.bf16.msra.mxu1 %v8663_v38  ;;  %v2218_v38 = vrot.slane %v9866_v49, 2  ;;  %v8715_v49 = vld [vmem:[%s11285_s5 + $0x418] sm:$0xff] }
 0x31e   : > { %2307 = vmatpush.bf16.msrb.mxu2 %v8650_v32  ;;  %v10071_v32 = vpack.c.b16 %v2630_v25, %v2630_v25 }
 0x31f   : > { %2033 = vmatpush.bf16.msra.mxu3 %v8626_v48  ;;  %v2355_v48 = vrot.slane %v9854_v47, 3  ;;  %v8702_v47 = vld [vmem:[%s11285_s5 + $0x3ac] sm:$0xff] }
 0x320   : > { %2455 = vmatpush.bf16.msra.mxu0 %v8672_v4  ;;  %v8703_v4 = vld [vmem:[%s11285_s5 + $0x3b4] sm:$0xff] }
 0x321   : > { %2444 = vmatpush.bf16.msra.mxu1 %v8662_v24  ;;  %v6982_v24 = vld [vmem:[%s11285_s5 + $0x448] sm:$0x3] }
 0x322   : > { %2308 = vmatpush.bf16.msrb.mxu2 %v8649_v53  ;;  %v2960_v53 = vunpack.c.l.b16 %v6982_v24  ;;  %v8729_v24 = vld [vmem:[%s11285_s5 + $0x48c] sm:$0xff] }
 0x323   : > { %2034 = vmatpush.bf16.msra.mxu3 %v8625_v56  ;;  %v8686_v56 = vld [vmem:[%s11285_s5 + $0x328] sm:$0xff] }
 0x324   : > { %2456 = vmatpush.bf16.msra.mxu0 %v8671_v51  ;;  %v8687_v51 = vld [vmem:[%s11285_s5 + $0x330] sm:$0xff] }
 0x325   : > { %2445 = vmatpush.bf16.msra.mxu1 %v8661_v3  ;;  %2309 = vmatmul.bf16.vlgmr.msrb.gmra.mxu2 %v2217_v61  ;;  %v8685_v3 = vld [vmem:[%s11285_s5 + $0x320] sm:$0xff] }
 0x326   : > { %2591 = vmatpush.bf16.msra.mxu2 %v2573_v58  ;;  %2035 = vmatmul.bf16.vlgmr.msra.gmra.mxu3 %v1943_v2  ;;  %v2973_v58 = vpack.c.b16 %v2960_v53, %v2960_v53  ;;  %v6908_v61 = vld [vmem:[%s11285_s5 + $0x3e4] sm:$0x3]  ;;  %v10234_v53 = vshrl.u32 %v10071_v32, 16 }
 0x327   : > { %2317 = vmatpush.bf16.msrb.mxu3 %v2299_v1  ;;  %6587 = vmatmul.msk.bf16.vlgmr.msrb.gmra.mxu0 %vm579_vm15, %v2081_v10  ;;  %v2629_v1 = vunpack.c.l.b16 %v10039_v13  ;;  %v8718_v13 = vld [vmem:[%s11285_s5 + $0x430] sm:$0xff] }
 0x328   : > { %2457 = vmatpush.bf16.msra.mxu0 %v8670_v20  ;;  %2446 = vmatmul.bf16.vlgmr.msra.gmra.mxu1 %v2354_v11  ;;  %v8712_v20 = vld [vmem:[%s11285_s5 + $0x400] sm:$0xff]  ;;  %v2990_v21 = vsel %vm1643_vm11, %v2973_v58, 0  ;;  %v7130_v11 = vld [vmem:[%s11285_s5 + $0x510] sm:$0x3]  ;;  %v3046_v58 = vrot.slane %v10234_v53, 1 }
 0x329   : > { %2731 = vmatpush.bf16.msrb.mxu1 %v2713_v30  ;;  %v7056_v30 = vld [vmem:[%s11285_s5 + $0x4ac] sm:$0x3]  ;;  %v10138_v2 = vpack.c.b16 %v2629_v1, %v2629_v1 }
 0x32a   : > { %2592 = vmatpush.bf16.msra.mxu2 %v8684_v43  ;;  %v8699_v43 = vld [vmem:[%s11285_s5 + $0x394] sm:$0xff]  ;;  %v3097_v10 = vunpack.c.l.b16 %v7056_v30  ;;  %v8736_v1 = vld [vmem:[%s11285_s5 + $0x4c8] sm:$0xff] }
 0x32b   : > { %2318 = vmatpush.bf16.msrb.mxu3 %v8660_v45  ;;  %v8711_v45 = vld [vmem:[%s11285_s5 + $0x3f8] sm:$0xff]  ;;  %v2908_v25 = vrot.slane %v10138_v2, 1 }
 0x32c   : > { %2458 = vmatpush.bf16.msra.mxu0 %v8669_v6  ;;  %v8720_v6 = vld [vmem:[%s11285_s5 + $0x440] sm:$0xff]  ;;  %v8726_v30 = vld [vmem:[%s11285_s5 + $0x474] sm:$0xff] }
 0x32d   : > { %2732 = vmatpush.bf16.msrb.mxu1 %v8696_v39  ;;  %v2823_v39 = vunpack.c.l.b16 %v6908_v61  ;;  %v8735_v61 = vld [vmem:[%s11285_s5 + $0x4c0] sm:$0xff] }
 0x32e   : > { %2593 = vmatpush.bf16.msra.mxu2 %v8683_v23  ;;  %v3234_v23 = vunpack.c.l.b16 %v7130_v11  ;;  %v8734_v11 = vld [vmem:[%s11285_s5 + $0x4b8] sm:$0xff] }
 0x32f   : > { %2319 = vmatpush.bf16.msrb.mxu3 %v8659_v27  ;;  %v8719_v27 = vld [vmem:[%s11285_s5 + $0x438] sm:$0xff] }
 0x330   : > { %2715 = vmatpush.bf16.msrb.mxu0 %v8692_v12  ;;  %v8698_v12 = vld [vmem:[%s11285_s5 + $0x38c] sm:$0xff]  ;;  %v3247_v41 = vpack.c.b16 %v3234_v23, %v3234_v23 }
 0x331   : > { %2733 = vmatpush.bf16.msrb.mxu1 %v8695_v35  ;;  %v3110_v35 = vpack.c.b16 %v3097_v10, %v3097_v10 }
 0x332   : > { %2594 = vmatpush.bf16.msra.mxu2 %v8682_v18  ;;  %v8673_v18 = vld [vmem:[%s11285_s5 + $0x2bc] sm:$0xff] }
 0x333   : > { %2320 = vmatpush.bf16.msrb.mxu3 %v8658_v42  ;;  %v3127_v42 = vsel %vm1643_vm11, %v3110_v35, 0  ;;  %v7352_v35 = vld [vmem:[%s11285_s5 + $0x63c] sm:$0x3] }
 0x334   : > { %2716 = vmatpush.bf16.msrb.mxu0 %v8691_v37  ;;  %v2836_v37 = vpack.c.b16 %v2823_v39, %v2823_v39  ;;  %v8761_v39 = vld [vmem:[%s11285_s5 + $0x598] sm:$0xff] }
 0x335   : > { %2734 = vmatpush.bf16.msrb.mxu1 %v8694_v16  ;;  %v8709_v16 = vld [vmem:[%s11285_s5 + $0x3e8] sm:$0xff] }
 0x336   : > { %2595 = vmatpush.bf16.msra.mxu2 %v8681_v15  ;;  %v10177_v15 = vshrl.u32 %v10138_v2, 16 }
 0x337   : > { %2321 = vmatpush.bf16.msrb.mxu3 %v8657_v17  ;;  %6735 = vmatmul.msk.bf16.vlgmr.msra.gmra.mxu0 %vm579_vm15, %v2355_v48  ;;  %v8732_v17 = vld [vmem:[%s11285_s5 + $0x4a4] sm:$0xff] }
 0x338   : > { %2717 = vmatpush.bf16.msrb.mxu0 %v8690_v62  ;;  %v2853_v62 = vsel %vm1643_vm11, %v2836_v37, 0  ;;  %v8739_v48 = vld [vmem:[%s11285_s5 + $0x4e0] sm:$0xff] }
 0x339   : > { %2735 = vmatpush.bf16.msrb.mxu1 %v8693_v44  ;;  %6809 = vmatmul.msk.bf16.vlgmr.msra.gmra.mxu2 %vm579_vm15, %v2492_v36  ;;  %v2491_v44 = vrot.slane %v9863_v31, 3  ;;  %v8740_v31 = vld [vmem:[%s11285_s5 + $0x4e8] sm:$0xff]  ;;  %v8731_v36 = vld [vmem:[%s11285_s5 + $0x49c] sm:$0xff] }
 0x33a   : > { %2855 = vmatpush.bf16.msrb.mxu2 %v8704_v0  ;;  %6661 = vmatmul.msk.bf16.vlgmr.msrb.gmra.mxu3 %vm579_vm15, %v2218_v38  ;;  %v3264_v0 = vsel %vm1643_vm11, %v3247_v41, 0  ;;  %v8707_v38 = vld [vmem:[%s11285_s5 + $0x3d4] sm:$0xff]  ;;  %v8747_v37 = vld [vmem:[%s11285_s5 + $0x524] sm:$0xff]  ;;  %v8723_v41 = vld [vmem:[%s11285_s5 + $0x45c] sm:$0xff] }
 0x33b   : > { %2575 = vmatpush.bf16.msra.mxu3 %v8680_v22  ;;  %v8708_v22 = vld [vmem:[%s11285_s5 + $0x3dc] sm:$0xff] }
 0x33c   : > { %2718 = vmatpush.bf16.msrb.mxu0 %v8689_v28  ;;  %6883 = vmatmul.msk.bf16.vlgmr.msrb.gmra.mxu1 %vm579_vm15, %v10071_v32  ;;  %v8717_v28 = vld [vmem:[%s11285_s5 + $0x428] sm:$0xff] }
 0x33d   : > { %2992 = vmatpush.bf16.msra.mxu1 %v8716_v34  ;;  %v8744_v34 = vld [vmem:[%s11285_s5 + $0x508] sm:$0xff] }
 0x33e   : > { %2856 = vmatpush.bf16.msrb.mxu2 %v8703_v4  ;;  %v2909_v4 = vrot.slane %v10071_v32, 1 }
 0x33f   : > { %2576 = vmatpush.bf16.msra.mxu3 %v8679_v26  ;;  %v8743_v26 = vld [vmem:[%s11285_s5 + $0x500] sm:$0xff] }
 0x340   : > { %2719 = vmatpush.bf16.msrb.mxu0 %v8688_v50  ;;  %v8730_v50 = vld [vmem:[%s11285_s5 + $0x494] sm:$0xff] }
 0x341   : > { %2993 = vmatpush.bf16.msra.mxu1 %v8715_v49  ;;  %v8706_v49 = vld [vmem:[%s11285_s5 + $0x3cc] sm:$0xff] }
 0x342   : > { %2857 = vmatpush.bf16.msrb.mxu2 %v8702_v47  ;;  %v8742_v47 = vld [vmem:[%s11285_s5 + $0x4f8] sm:$0xff] }
 0x343   : > { %2577 = vmatpush.bf16.msra.mxu3 %v8678_v7  ;;  %v8738_v7 = vld [vmem:[%s11285_s5 + $0x4d8] sm:$0xff] }
 0x344   : > { %2720 = vmatpush.bf16.msrb.mxu0 %v8687_v51  ;;  %v8752_v51 = vld [vmem:[%s11285_s5 + $0x54c] sm:$0xff] }
 0x345   : > { %2994 = vmatpush.bf16.msra.mxu1 %v8714_v52  ;;  %v8705_v52 = vld [vmem:[%s11285_s5 + $0x3c4] sm:$0xff] }
 0x346   : > { %2858 = vmatpush.bf16.msrb.mxu2 %v8701_v54  ;;  %v8728_v54 = vld [vmem:[%s11285_s5 + $0x484] sm:$0xff] }
 0x347   : > { %2578 = vmatpush.bf16.msra.mxu3 %v8677_v55  ;;  %v8741_v55 = vld [vmem:[%s11285_s5 + $0x4f0] sm:$0xff] }
 0x348   : > { %2721 = vmatpush.bf16.msrb.mxu0 %v8686_v56  ;;  %v8737_v56 = vld [vmem:[%s11285_s5 + $0x4d0] sm:$0xff] }
 0x349   : > { %2995 = vmatpush.bf16.msra.mxu1 %v8713_v57  ;;  %v8764_v57 = vld [vmem:[%s11285_s5 + $0x5b0] sm:$0xff] }
 0x34a   : > { %2859 = vmatpush.bf16.msrb.mxu2 %v8700_v59  ;;  %v8751_v59 = vld [vmem:[%s11285_s5 + $0x544] sm:$0xff] }
 0x34b   : > { %2579 = vmatpush.bf16.msra.mxu3 %v8676_v60  ;;  %v8727_v60 = vld [vmem:[%s11285_s5 + $0x47c] sm:$0xff] }
 0x34c   : > { %2722 = vmatpush.bf16.msrb.mxu0 %v8685_v3  ;;  %v3183_v3 = vrot.slane %v10071_v32, 2 }
 0x34d   : > { %2996 = vmatpush.bf16.msra.mxu1 %v8712_v20  ;;  %v8763_v20 = vld [vmem:[%s11285_s5 + $0x5a8] sm:$0xff] }
 0x34e   : > { %2860 = vmatpush.bf16.msrb.mxu2 %v8699_v43  ;;  %v7278_v43 = vld [vmem:[%s11285_s5 + $0x5d8] sm:$0x3] }
 0x34f   : > { %2723 = vmatmul.bf16.vlgmr.msrb.gmra.mxu0 %v10138_v2  ;;  %2580 = vmatpush.bf16.msra.mxu3 %v8675_v63  ;;  %v8762_v63 = vld [vmem:[%s11285_s5 + $0x5a0] sm:$0xff]  ;;  %v3508_v10 = vunpack.c.l.b16 %v7278_v43  ;;  %v8791_v43 = vld [vmem:[%s11285_s5 + $0x690] sm:$0xff] }
 0x350   : > { %3008 = vmatpush.bf16.msra.mxu0 %v2990_v21  ;;  %v8750_v21 = vld [vmem:[%s11285_s5 + $0x53c] sm:$0xff] }
 0x351   : > { %2997 = vmatpush.bf16.msra.mxu1 %v8711_v45  ;;  %v8749_v45 = vld [vmem:[%s11285_s5 + $0x534] sm:$0xff]  ;;  %v3521_v23 = vpack.c.b16 %v3508_v10, %v3508_v10 }
 0x352   : > { %2861 = vmatpush.bf16.msrb.mxu2 %v8698_v12  ;;  %v8748_v12 = vld [vmem:[%s11285_s5 + $0x52c] sm:$0xff] }
 0x353   : > { %2581 = vmatpush.bf16.msra.mxu3 %v8674_v14  ;;  %v8724_v14 = vld [vmem:[%s11285_s5 + $0x464] sm:$0xff] }
 0x354   : > { %3009 = vmatpush.bf16.msra.mxu0 %v8720_v6  ;;  %v8725_v6 = vld [vmem:[%s11285_s5 + $0x46c] sm:$0xff] }
 0x355   : > { %2998 = vmatpush.bf16.msra.mxu1 %v8710_v46  ;;  %v8733_v46 = vld [vmem:[%s11285_s5 + $0x4b0] sm:$0xff] }
 0x356   : > { %2862 = vmatpush.bf16.msrb.mxu2 %v8697_v40  ;;  %v7204_v40 = vld [vmem:[%s11285_s5 + $0x574] sm:$0x3] }
 0x357   : > { %2582 = vmatpush.bf16.msra.mxu3 %v8673_v18  ;;  %v3538_v18 = vsel %vm1643_vm11, %v3521_v23, 0  ;;  %v8786_v23 = vld [vmem:[%s11285_s5 + $0x668] sm:$0xff] }
 0x358   : > { %3010 = vmatpush.bf16.msra.mxu0 %v8719_v27  ;;  %v8760_v27 = vld [vmem:[%s11285_s5 + $0x590] sm:$0xff] }
 0x359   : > { %2999 = vmatpush.bf16.msra.mxu1 %v8709_v16  ;;  %2863 = vmatmul.bf16.vlgmr.msrb.gmra.mxu2 %v10177_v15  ;;  %v7426_v16 = vld [vmem:[%s11285_s5 + $0x6a0] sm:$0x3] }
 0x35a   : > { %3145 = vmatpush.bf16.msra.mxu2 %v3127_v42  ;;  %2583 = vmatmul.bf16.vlgmr.msra.gmra.mxu3 %v2491_v44  ;;  %v3645_v42 = vunpack.c.l.b16 %v7352_v35  ;;  %v8746_v44 = vld [vmem:[%s11285_s5 + $0x51c] sm:$0xff]  ;;  %v8753_v35 = vld [vmem:[%s11285_s5 + $0x554] sm:$0xff] }
 0x35b   : > { %2871 = vmatpush.bf16.msrb.mxu3 %v2853_v62  ;;  %v8759_v62 = vld [vmem:[%s11285_s5 + $0x588] sm:$0xff] }
 0x35c   : > { %3011 = vmatpush.bf16.msra.mxu0 %v8718_v13  ;;  %3000 = vmatmul.bf16.vlgmr.msra.gmra.mxu1 %v2908_v25  ;;  %v3371_v13 = vunpack.c.l.b16 %v7204_v40  ;;  %v3785_v25 = vunpack.c.l.b16 %v7426_v16  ;;  %v8776_v40 = vld [vmem:[%s11285_s5 + $0x614] sm:$0xff]  ;;  %v8812_v16 = vld [vmem:[%s11285_s5 + $0x740] sm:$0xff] }
 0x35d   : > { %3282 = vmatpush.bf16.msrb.mxu1 %v3264_v0  ;;  %v3182_v0 = vrot.slane %v10138_v2, 2 }
 0x35e   : > { %3146 = vmatpush.bf16.msra.mxu2 %v8732_v17  ;;  %v8768_v17 = vld [vmem:[%s11285_s5 + $0x5d0] sm:$0xff] }
 0x35f   : > { %2872 = vmatpush.bf16.msrb.mxu3 %v8708_v22  ;;  %v8722_v22 = vld [vmem:[%s11285_s5 + $0x454] sm:$0xff] }
 0x360   : > { %3012 = vmatpush.bf16.msra.mxu0 %v8717_v28  ;;  %v3658_v28 = vpack.c.b16 %v3645_v42, %v3645_v42  ;;  %v8785_v42 = vld [vmem:[%s11285_s5 + $0x660] sm:$0xff] }
 0x361   : > { %3283 = vmatpush.bf16.msrb.mxu1 %v8744_v34  ;;  %v8758_v34 = vld [vmem:[%s11285_s5 + $0x580] sm:$0xff] }
 0x362   : > { %3147 = vmatpush.bf16.msra.mxu2 %v8731_v36  ;;  %v10337_v36 = vpop.f32.mrf.mxu1 }
 0x363   : > { %7031 = vmatmul.msk.bf16.vlgmr.msra.gmra.mxu0 %vm579_vm15, %v2909_v4  ;;  %2873 = vmatpush.bf16.msrb.mxu3 %v8707_v38  ;;  %v8767_v38 = vld [vmem:[%s11285_s5 + $0x5c8] sm:$0xff]  ;;  %v8745_v4 = vld [vmem:[%s11285_s5 + $0x514] sm:$0xff] }
 0x364   : > { %3266 = vmatpush.bf16.msrb.mxu0 %v8740_v31  ;;  %v3384_v31 = vpack.c.b16 %v3371_v13, %v3371_v13  ;;  %v3594_v13 = vrot.slane %v10234_v53, 3 }
 0x365   : > { %3284 = vmatpush.bf16.msrb.mxu1 %v8743_v26  ;;  %v8721_v26 = vld [vmem:[%s11285_s5 + $0x44c] sm:$0xff] }
 0x366   : > { %3148 = vmatpush.bf16.msra.mxu2 %v8730_v50  ;;  %v3675_v50 = vsel %vm1643_vm11, %v3658_v28, 0 }
 0x367   : > { %2874 = vmatpush.bf16.msrb.mxu3 %v8706_v49  ;;  %v10349_v49 = vpop.f32.mrf.mxu2 }
 0x368   : > { %3267 = vmatpush.bf16.msrb.mxu0 %v8739_v48  ;;  %v3798_v48 = vpack.c.b16 %v3785_v25, %v3785_v25 }
 0x369   : > { %3285 = vmatpush.bf16.msrb.mxu1 %v8742_v47  ;;  %v8757_v47 = vld [vmem:[%s11285_s5 + $0x578] sm:$0xff] }
 0x36a   : > { %3149 = vmatpush.bf16.msra.mxu2 %v8729_v24  ;;  %v8766_v24 = vld [vmem:[%s11285_s5 + $0x5c0] sm:$0xff] }
 0x36b   : > { %2875 = vmatpush.bf16.msrb.mxu3 %v8705_v52  ;;  %v3319_v52 = vrot.slane %v10177_v15, 2 }
 0x36c   : > { %3268 = vmatpush.bf16.msrb.mxu0 %v8738_v7  ;;  %v3401_v7 = vsel %vm1643_vm11, %v3384_v31, 0  ;;  %v8784_v31 = vld [vmem:[%s11285_s5 + $0x658] sm:$0xff] }
 0x36d   : > { %3286 = vmatpush.bf16.msrb.mxu1 %v8741_v55  ;;  %7105 = vmatmul.msk.bf16.vlgmr.msra.gmra.mxu2 %vm579_vm15, %v3046_v58  ;;  %v8780_v55 = vld [vmem:[%s11285_s5 + $0x634] sm:$0xff] }
 0x36e   : > { %3403 = vmatpush.bf16.msrb.mxu2 %v8752_v51  ;;  %6957 = vmatmul.msk.bf16.vlgmr.msrb.gmra.mxu3 %vm579_vm15, %v10234_v53  ;;  %v10358_v51 = vpop.f32.mrf.mxu3 }
 0x36f   : > { %3129 = vmatpush.bf16.msra.mxu3 %v8728_v54  ;;  %v3815_v54 = vsel %vm1643_vm11, %v3798_v48, 0  ;;  %v7574_v48 = vld [vmem:[%s11285_s5 + $0x768] sm:$0x3] }
 0x370   : > { %3269 = vmatpush.bf16.msrb.mxu0 %v8737_v56  ;;  %7179 = vmatmul.msk.bf16.vlgmr.msrb.gmra.mxu1 %vm579_vm15, %v3183_v3  ;;  %v8756_v56 = vld [vmem:[%s11285_s5 + $0x56c] sm:$0xff]  ;;  %v8765_v3 = vld [vmem:[%s11285_s5 + $0x5b8] sm:$0xff] }
 0x371   : > { %3540 = vmatpush.bf16.msra.mxu1 %v8764_v57  ;;  %v3045_v57 = vrot.slane %v10177_v15, 1 }
 0x372   : > { %3404 = vmatpush.bf16.msrb.mxu2 %v8751_v59  ;;  %v3456_v59 = vrot.slane %v10138_v2, 3  ;;  %v8755_v2 = vld [vmem:[%s11285_s5 + $0x564] sm:$0xff] }
 0x373   : > { %3130 = vmatpush.bf16.msra.mxu3 %v8727_v60 }
 0x374   : > { %3270 = vmatpush.bf16.msrb.mxu0 %v8736_v1  ;;  %v8792_v1 = vld [vmem:[%s11285_s5 + $0x698] sm:$0xff] }
 0x375   : > { %3541 = vmatpush.bf16.msra.mxu1 %v8763_v20  ;;  %v8788_v20 = vld [vmem:[%s11285_s5 + $0x678] sm:$0xff] }
 0x376   : > { %3405 = vmatpush.bf16.msrb.mxu2 %v8750_v21  ;;  %v8779_v21 = vld [vmem:[%s11285_s5 + $0x62c] sm:$0xff] }
 0x377   : > { %3131 = vmatpush.bf16.msra.mxu3 %v8726_v30 }
 0x378   : > { %3271 = vmatpush.bf16.msrb.mxu0 %v8735_v61  ;;  %v3457_v61 = vrot.slane %v10071_v32, 3 }
 0x379   : > { %3542 = vmatpush.bf16.msra.mxu1 %v8762_v63  ;;  %v8787_v63 = vld [vmem:[%s11285_s5 + $0x670] sm:$0xff] }
 0x37a   : > { %3406 = vmatpush.bf16.msrb.mxu2 %v8749_v45 }
 0x37b   : > { %3132 = vmatpush.bf16.msra.mxu3 %v8725_v6  ;;  %v8778_v6 = vld [vmem:[%s11285_s5 + $0x624] sm:$0xff] }
 0x37c   : > { %3272 = vmatpush.bf16.msrb.mxu0 %v8734_v11  ;;  %v8754_v11 = vld [vmem:[%s11285_s5 + $0x55c] sm:$0xff] }
 0x37d   : > { %3543 = vmatpush.bf16.msra.mxu1 %v8761_v39 }
 0x37e   : > { %3407 = vmatpush.bf16.msrb.mxu2 %v8748_v12  ;;  %v8790_v12 = vld [vmem:[%s11285_s5 + $0x688] sm:$0xff] }
 0x37f   : > { %3133 = vmatpush.bf16.msra.mxu3 %v8724_v14 }
 0x380   : > { %3273 = vmatpush.bf16.msrb.mxu0 %v8733_v46  ;;  %v8777_v46 = vld [vmem:[%s11285_s5 + $0x61c] sm:$0xff] }
 0x381   : > { %3544 = vmatpush.bf16.msra.mxu1 %v8760_v27  ;;  %v8800_v27 = vld [vmem:[%s11285_s5 + $0x6dc] sm:$0xff] }
 0x382   : > { %3408 = vmatpush.bf16.msrb.mxu2 %v8747_v37 }
 0x383   : > { %3134 = vmatpush.bf16.msra.mxu3 %v8723_v41  ;;  %3274 = vmatmul.bf16.vlgmr.msrb.gmra.mxu0 %v3182_v0  ;;  %v1669_v58 = vpop.f32.mrf.mxu0  ;;  %v3732_v41 = vunpack.c.h.b16 %v9906_v19  ;;  %v8799_v0 = vld [vmem:[%s11285_s5 + $0x6d4] sm:$0xff] }
 0x384   : > { %3556 = vmatpush.bf16.msra.mxu0 %v3538_v18  ;;  %v1899_v60 = vpop.f32.mrf.mxu1  ;;  %v8789_v18 = vld [vmem:[%s11285_s5 + $0x680] sm:$0xff] }
 0x385   : > { %3545 = vmatpush.bf16.msra.mxu1 %v8759_v62  ;;  %v10436_v25 = vpack.c.b16 %v3732_v41, %v3732_v41 }
 0x386   : > { %3409 = vmatpush.bf16.msrb.mxu2 %v8746_v44  ;;  %v3320_v44 = vrot.slane %v10234_v53, 2  ;;  %v8798_v53 = vld [vmem:[%s11285_s5 + $0x6cc] sm:$0xff] }
 0x387   : > { %3135 = vmatpush.bf16.msra.mxu3 %v8722_v22  ;;  %v1763_v30 = vpop.f32.mrf.mxu2 }
 0x388   : > { %3557 = vmatpush.bf16.msra.mxu0 %v8768_v17  ;;  %v8775_v17 = vld [vmem:[%s11285_s5 + $0x60c] sm:$0xff] }
 0x389   : > { %3546 = vmatpush.bf16.msra.mxu1 %v8758_v34  ;;  %v1656_v45 = vpop.f32.mrf.mxu3 }
 0x38a   : > { %3410 = vmatpush.bf16.msrb.mxu2 %v8745_v4  ;;  %v1670_v10 = vadd.f32 %v1669_v58, %v1656_v45  ;;  %v8774_v4 = vld [vmem:[%s11285_s5 + $0x604] sm:$0xff]  ;;  %v8795_v45 = vld [vmem:[%s11285_s5 + $0x6b4] sm:$0xff] }
 0x38b   : > { %3136 = vmatpush.bf16.msra.mxu3 %v8721_v26  ;;  %v1671_v39 = vpop.f32.mrf.mxu0 }
 0x38c   : > { %3558 = vmatpush.bf16.msra.mxu0 %v8767_v38  ;;  %v1901_v32 = vpop.f32.mrf.mxu1  ;;  %v1764_v14 = vadd.f32 %v1763_v30, %v1670_v10  ;;  %v8811_v38 = vld [vmem:[%s11285_s5 + $0x738] sm:$0xff]  ;;  %v8808_v30 = vld [vmem:[%s11285_s5 + $0x720] sm:$0xff] }
 0x38d   : > { %3547 = vmatpush.bf16.msra.mxu1 %v8757_v47  ;;  %3411 = vmatmul.bf16.vlgmr.msrb.gmra.mxu2 %v3319_v52  ;;  %v8810_v47 = vld [vmem:[%s11285_s5 + $0x730] sm:$0xff]  ;;  %v8797_v52 = vld [vmem:[%s11285_s5 + $0x6c4] sm:$0xff] }
 0x38e   : > { %3693 = vmatpush.bf16.msra.mxu2 %v3675_v50  ;;  %3137 = vmatmul.bf16.vlgmr.msra.gmra.mxu3 %v3045_v57  ;;  %v8783_v50 = vld [vmem:[%s11285_s5 + $0x650] sm:$0xff] }
 0x38f   : > { %3419 = vmatpush.bf16.msrb.mxu3 %v3401_v7  ;;  %v1765_v37 = vpop.f32.mrf.mxu2 }
 0x390   : > { %3559 = vmatpush.bf16.msra.mxu0 %v8766_v24  ;;  %3548 = vmatmul.bf16.vlgmr.msra.gmra.mxu1 %v3456_v59  ;;  %v8782_v59 = vld [vmem:[%s11285_s5 + $0x648] sm:$0xff] }
 0x391   : > { %3833 = vmatpush.bf16.msrb.mxu1 %v3815_v54  ;;  %v1658_v62 = vpop.f32.mrf.mxu3  ;;  %v8773_v54 = vld [vmem:[%s11285_s5 + $0x5fc] sm:$0xff]  ;;  %v8794_v37 = vld [vmem:[%s11285_s5 + $0x6ac] sm:$0xff] }
 0x392   : > { %3694 = vmatpush.bf16.msra.mxu2 %v8780_v55  ;;  %v4062_v55 = vunpack.c.l.b16 %v7574_v48 }
 0x393   : > { %3420 = vmatpush.bf16.msrb.mxu3 %v8756_v56 }
 0x394   : > { %3560 = vmatpush.bf16.msra.mxu0 %v8765_v3  ;;  %v1912_v22 = vpop.f32.mrf.mxu0  ;;  %v8796_v3 = vld [vmem:[%s11285_s5 + $0x6bc] sm:$0xff] }
 0x395   : > { %3834 = vmatpush.bf16.msrb.mxu1 %v8792_v1  ;;  %v1913_v28 = vadd.f32 %v1912_v22, %v1899_v60  ;;  %v2173_v34 = vpop.f32.mrf.mxu1  ;;  %v8809_v60 = vld [vmem:[%s11285_s5 + $0x728] sm:$0xff]  ;;  %v8772_v1 = vld [vmem:[%s11285_s5 + $0x5f4] sm:$0xff]  ;;  %v8769_v22 = vld [vmem:[%s11285_s5 + $0x5dc] sm:$0xff] }
 0x396   : > { %3695 = vmatpush.bf16.msra.mxu2 %v8779_v21 }
 0x397   : > { %3421 = vmatpush.bf16.msrb.mxu3 %v8755_v2  ;;  %7327 = vmatmul.msk.bf16.vlgmr.msra.gmra.mxu0 %vm579_vm15, %v3457_v61  ;;  %v8781_v2 = vld [vmem:[%s11285_s5 + $0x640] sm:$0xff]  ;;  %v7648_v61 = vld [vmem:[%s11285_s5 + $0x7cc] sm:$0x3] }
 0x398   : > { %3817 = vmatpush.bf16.msrb.mxu0 %v8788_v20  ;;  %v10453_v26 = vpop.f32.mrf.mxu2  ;;  %v4075_v20 = vpack.c.b16 %v4062_v55, %v4062_v55  ;;  %v4199_v39 = vunpack.c.l.b16 %v7648_v61  ;;  %v3593_v55 = vrot.slane %v10177_v15, 3  ;;  %v8827_v15 = vld [vmem:[%s11285_s5 + $0x7bc] sm:$0xff]  ;;  %v8826_v61 = vld [vmem:[%s11285_s5 + $0x7b4] sm:$0xff] }
 0x399   : > { %3835 = vmatpush.bf16.msrb.mxu1 %v8791_v43  ;;  %v1776_v7 = vpop.f32.mrf.mxu3 }
 0x39a   : > { %3696 = vmatpush.bf16.msra.mxu2 %v8778_v6  ;;  %v1777_v24 = vadd.f32 %v1776_v7, %v1764_v14  ;;  %v7500_v6 = vld [vmem:[%s11285_s5 + $0x704] sm:$0x3]  ;;  %v4092_v10 = vsel %vm1643_vm11, %v4075_v20, 0  ;;  %v8807_v14 = vld [vmem:[%s11285_s5 + $0x718] sm:$0xff]  ;;  %v4212_v41 = vpack.c.b16 %v4199_v39, %v4199_v39  ;;  %v8825_v39 = vld [vmem:[%s11285_s5 + $0x7ac] sm:$0xff] }
 0x39b   : > { %3422 = vmatpush.bf16.msrb.mxu3 %v8754_v11  ;;  %v8771_v11 = vld [vmem:[%s11285_s5 + $0x5ec] sm:$0xff]  ;;  %v8828_v7 = vld [vmem:[%s11285_s5 + $0x7c4] sm:$0xff] }
 0x39c   : > { %3818 = vmatpush.bf16.msrb.mxu0 %v8787_v63  ;;  %v1916_v56 = vadd.f32 %v1913_v28, %v1777_v24  ;;  %v1914_v57 = vpop.f32.mrf.mxu0  ;;  %v3731_v63 = vunpack.c.l.b16 %v9906_v19  ;;  %v7722_v19 = vld [vmem:[%s11285_s5 + $0x830] sm:$0x3] }
 0x39d   : > { %3836 = vmatpush.bf16.msrb.mxu1 %v8790_v12  ;;  %v2175_v58 = vpop.f32.mrf.mxu1 }
 0x39e   : > { %3697 = vmatpush.bf16.msra.mxu2 %v8777_v46  ;;  %v10510_v46 = vpack.c.b16 %v3731_v63, %v3731_v63  ;;  %v8813_v58 = vld [vmem:[%s11285_s5 + $0x748] sm:$0xff] }
 0x39f   : > { %3423 = vmatpush.bf16.msrb.mxu3 %v8753_v35  ;;  %v8816_v35 = vld [vmem:[%s11285_s5 + $0x760] sm:$0xff]  ;;  %v8802_v63 = vld [vmem:[%s11285_s5 + $0x6ec] sm:$0xff] }
 0x3a0   : > { %3819 = vmatpush.bf16.msrb.mxu0 %v8786_v23  ;;  %v2051_v21 = vpop.f32.mrf.mxu2  ;;  %v3925_v23 = vunpack.c.l.b16 %v7500_v6  ;;  %v8838_v6 = vld [vmem:[%s11285_s5 + $0x818] sm:$0xff] }
 0x3a1   : > { %3837 = vmatpush.bf16.msrb.mxu1 %v8789_v18  ;;  %7401 = vmatmul.msk.bf16.vlgmr.msra.gmra.mxu2 %vm579_vm15, %v3594_v13  ;;  %v1778_v43 = vpop.f32.mrf.mxu3  ;;  %v4336_v18 = vunpack.c.l.b16 %v7722_v19  ;;  %v8839_v21 = vld [vmem:[%s11285_s5 + $0x820] sm:$0xff]  ;;  %v10602_v19 = vshrl.u32 %v10436_v25, 16 }
 0x3a2   : > { %3957 = vmatpush.bf16.msrb.mxu2 %v8800_v27  ;;  %7253 = vmatmul.msk.bf16.vlgmr.msrb.gmra.mxu3 %vm579_vm15, %v3320_v44  ;;  %v3938_v62 = vpack.c.b16 %v3925_v23, %v3925_v23  ;;  %v8835_v43 = vld [vmem:[%s11285_s5 + $0x800] sm:$0xff] }
 0x3a3   : > { %3677 = vmatpush.bf16.msra.mxu3 %v8776_v40  ;;  %v8770_v40 = vld [vmem:[%s11285_s5 + $0x5e4] sm:$0xff]  ;;  %v4349_v28 = vpack.c.b16 %v4336_v18, %v4336_v18  ;;  %v8833_v18 = vld [vmem:[%s11285_s5 + $0x7f0] sm:$0xff] }
 0x3a4   : > { %3820 = vmatpush.bf16.msrb.mxu0 %v8785_v42  ;;  %7475 = vmatmul.msk.bf16.vlgmr.msrb.gmra.mxu1 %vm579_vm15, %v10436_v25  ;;  %v2186_v32 = vpop.f32.mrf.mxu0  ;;  %v3955_v48 = vsel %vm1643_vm11, %v3938_v62, 0  ;;  %v8824_v23 = vld [vmem:[%s11285_s5 + $0x7a4] sm:$0xff] }
 0x3a5   : > { %4094 = vmatpush.bf16.msra.mxu1 %v8812_v16  ;;  %v10505_v12 = vpop.f32.mrf.mxu1  ;;  %v2187_v27 = vadd.f32 %v2186_v32, %v2173_v34  ;;  %v8806_v16 = vld [vmem:[%s11285_s5 + $0x710] sm:$0xff]  ;;  %v4229_v34 = vsel %vm1643_vm11, %v4212_v41, 0 }
 0x3a6   : > { %3958 = vmatpush.bf16.msrb.mxu2 %v8799_v0  ;;  %v8815_v0 = vld [vmem:[%s11285_s5 + $0x758] sm:$0xff]  ;;  %v8860_v41 = vld [vmem:[%s11285_s5 + $0x8d0] sm:$0xff] }
 0x3a7   : > { %3678 = vmatpush.bf16.msra.mxu3 %v8775_v17  ;;  %v8793_v17 = vld [vmem:[%s11285_s5 + $0x6a4] sm:$0xff] }
 0x3a8   : > { %3821 = vmatpush.bf16.msrb.mxu0 %v8784_v31  ;;  %v10522_v42 = vpop.f32.mrf.mxu2 }
 0x3a9   : > { %4095 = vmatpush.bf16.msra.mxu1 %v8811_v38  ;;  %v2036_v13 = vpop.f32.mrf.mxu3 }
 0x3aa   : > { %3959 = vmatpush.bf16.msrb.mxu2 %v8798_v53  ;;  %v2050_v44 = vadd.f32 %v10453_v26, %v2036_v13  ;;  %v8814_v26 = vld [vmem:[%s11285_s5 + $0x750] sm:$0xff]  ;;  %v8823_v13 = vld [vmem:[%s11285_s5 + $0x79c] sm:$0xff] }
 0x3ab   : > { %3679 = vmatpush.bf16.msra.mxu3 %v8774_v4  ;;  %v8805_v4 = vld [vmem:[%s11285_s5 + $0x708] sm:$0xff] }
 0x3ac   : > { %3822 = vmatpush.bf16.msrb.mxu0 %v8783_v50  ;;  %v2053_v31 = vadd.f32 %v2050_v44, %v1916_v56  ;;  %v2188_v38 = vpop.f32.mrf.mxu0  ;;  %v10546_v50 = vshrl.u32 %v10510_v46, 16  ;;  %v4010_v56 = vrot.slane %v10510_v46, 1 }
 0x3ad   : > { %4096 = vmatpush.bf16.msra.mxu1 %v8810_v47  ;;  %v2449_v53 = vpop.f32.mrf.mxu1  ;;  %v4366_v47 = vsel %vm1643_vm11, %v4349_v28, 0  ;;  %v8859_v28 = vld [vmem:[%s11285_s5 + $0x8c8] sm:$0xff]  ;;  %v7870_v38 = vld [vmem:[%s11285_s5 + $0x8f8] sm:$0x3] }
 0x3ae   : > { %3960 = vmatpush.bf16.msrb.mxu2 %v8797_v52  ;;  %v2190_v24 = vadd.f32 %v2187_v27, %v2053_v31  ;;  %v8804_v52 = vld [vmem:[%s11285_s5 + $0x6fc] sm:$0xff]  ;;  %v8822_v31 = vld [vmem:[%s11285_s5 + $0x794] sm:$0xff] }
 0x3af   : > { %3680 = vmatpush.bf16.msra.mxu3 %v8773_v54 }
 0x3b0   : > { %3823 = vmatpush.bf16.msrb.mxu0 %v8782_v59  ;;  %v2312_v54 = vpop.f32.mrf.mxu2  ;;  %v8840_v59 = vld [vmem:[%s11285_s5 + $0x828] sm:$0xff] }
 0x3b1   : > { %4097 = vmatpush.bf16.msra.mxu1 %v8809_v60  ;;  %v2038_v57 = vpop.f32.mrf.mxu3  ;;  %v8836_v60 = vld [vmem:[%s11285_s5 + $0x808] sm:$0xff] }
 0x3b2   : > { %3961 = vmatpush.bf16.msrb.mxu2 %v8796_v3  ;;  %v8803_v3 = vld [vmem:[%s11285_s5 + $0x6f4] sm:$0xff]  ;;  %v8844_v54 = vld [vmem:[%s11285_s5 + $0x84c] sm:$0xff] }
 0x3b3   : > { %3681 = vmatpush.bf16.msra.mxu3 %v8772_v1 }
 0x3b4   : > { %3824 = vmatpush.bf16.msrb.mxu0 %v8781_v2  ;;  %v2460_v1 = vpop.f32.mrf.mxu0 }
 0x3b5   : > { %4098 = vmatpush.bf16.msra.mxu1 %v8808_v30  ;;  %v2461_v2 = vadd.f32 %v2460_v1, %v10505_v12  ;;  %v4011_v30 = vrot.slane %v10436_v25, 1  ;;  %v8848_v12 = vld [vmem:[%s11285_s5 + $0x86c] sm:$0xff] }
 0x3b6   : > { %3962 = vmatpush.bf16.msrb.mxu2 %v8795_v45 }
 0x3b7   : > { %3682 = vmatpush.bf16.msra.mxu3 %v8771_v11  ;;  %3825 = vmatmul.bf16.vlgmr.msrb.gmra.mxu0 %v10510_v46  ;;  %v8834_v11 = vld [vmem:[%s11285_s5 + $0x7f8] sm:$0xff] }
 0x3b8   : > { %4110 = vmatpush.bf16.msra.mxu0 %v4092_v10 }
 0x3b9   : > { %4099 = vmatpush.bf16.msra.mxu1 %v8807_v14  ;;  %v10573_v20 = vpop.f32.mrf.mxu1  ;;  %v8801_v14 = vld [vmem:[%s11285_s5 + $0x6e4] sm:$0xff] }
 0x3ba   : > { %3963 = vmatpush.bf16.msrb.mxu2 %v8794_v37 }
 0x3bb   : > { %3683 = vmatpush.bf16.msra.mxu3 %v8770_v40  ;;  %v8837_v40 = vld [vmem:[%s11285_s5 + $0x810] sm:$0xff] }
 0x3bc   : > { %4111 = vmatpush.bf16.msra.mxu0 %v8816_v35  ;;  %v10590_v45 = vpop.f32.mrf.mxu2  ;;  %v2462_v35 = vpop.f32.mrf.mxu0 }
 0x3bd   : > { %4100 = vmatpush.bf16.msra.mxu1 %v8806_v16  ;;  %v2323_v10 = vpop.f32.mrf.mxu3  ;;  %v8847_v16 = vld [vmem:[%s11285_s5 + $0x864] sm:$0xff] }
 0x3be   : > { %3964 = vmatpush.bf16.msrb.mxu2 %v8793_v17  ;;  %v2324_v32 = vadd.f32 %v2323_v10, %v10522_v42  ;;  %v4148_v42 = vrot.slane %v10602_v19, 1  ;;  %v4285_v17 = vrot.slane %v10436_v25, 2  ;;  %v8864_v10 = vld [vmem:[%s11285_s5 + $0x8f0] sm:$0xff]  ;;  %v8863_v35 = vld [vmem:[%s11285_s5 + $0x8e8] sm:$0xff] }
 0x3bf   : > { %3684 = vmatpush.bf16.msra.mxu3 %v8769_v22  ;;  %v8832_v22 = vld [vmem:[%s11285_s5 + $0x7e8] sm:$0xff] }
 0x3c0   : > { %4112 = vmatpush.bf16.msra.mxu0 %v8815_v0  ;;  %v2327_v27 = vadd.f32 %v2324_v32, %v2190_v24  ;;  %v8830_v24 = vld [vmem:[%s11285_s5 + $0x7d8] sm:$0xff] }
 0x3c1   : > { %4101 = vmatpush.bf16.msra.mxu1 %v8805_v4  ;;  %3965 = vmatmul.bf16.vlgmr.msrb.gmra.mxu2 %v10546_v50  ;;  %v2739_v37 = vpop.f32.mrf.mxu1  ;;  %v8831_v4 = vld [vmem:[%s11285_s5 + $0x7e0] sm:$0xff] }
 0x3c2   : > { %4247 = vmatpush.bf16.msra.mxu2 %v4229_v34  ;;  %3685 = vmatmul.bf16.vlgmr.msra.gmra.mxu3 %v3593_v55  ;;  %v10627_v62 = vadd.f32 %v2461_v2, %v2327_v27  ;;  %v8846_v34 = vld [vmem:[%s11285_s5 + $0x85c] sm:$0xff]  ;;  %v8820_v55 = vld [vmem:[%s11285_s5 + $0x784] sm:$0xff]  ;;  %v8841_v37 = vld [vmem:[%s11285_s5 + $0x834] sm:$0xff] }
 0x3c3   : > { %3973 = vmatpush.bf16.msrb.mxu3 %v3955_v48  ;;  %v8858_v48 = vld [vmem:[%s11285_s5 + $0x8c0] sm:$0xff] }
 0x3c4   : > { %4113 = vmatpush.bf16.msra.mxu0 %v8814_v26  ;;  %4102 = vmatmul.bf16.vlgmr.msra.gmra.mxu1 %v4010_v56  ;;  %v2599_v0 = vpop.f32.mrf.mxu2  ;;  %v8845_v26 = vld [vmem:[%s11285_s5 + $0x854] sm:$0xff] }
 0x3c5   : > { %4384 = vmatpush.bf16.msrb.mxu1 %v4366_v47  ;;  %v2325_v44 = vpop.f32.mrf.mxu3  ;;  %v8821_v47 = vld [vmem:[%s11285_s5 + $0x78c] sm:$0xff] }
 0x3c6   : > { %4248 = vmatpush.bf16.msra.mxu2 %v8828_v7  ;;  %v4610_v7 = vunpack.c.l.b16 %v7870_v38 }
 0x3c7   : > { %3974 = vmatpush.bf16.msrb.mxu3 %v8804_v52  ;;  %v8857_v52 = vld [vmem:[%s11285_s5 + $0x8b8] sm:$0xff] }
 0x3c8   : > { %4114 = vmatpush.bf16.msra.mxu0 %v8813_v58  ;;  %v4623_v56 = vpack.c.b16 %v4610_v7, %v4610_v7  ;;  %v8829_v58 = vld [vmem:[%s11285_s5 + $0x7d0] sm:$0xff]  ;;  %v8888_v7 = vld [vmem:[%s11285_s5 + $0x9b8] sm:$0xff] }
 0x3c9   : > { %4385 = vmatpush.bf16.msrb.mxu1 %v8840_v59  ;;  %v8856_v59 = vld [vmem:[%s11285_s5 + $0x8b0] sm:$0xff] }
 0x3ca   : > { %4249 = vmatpush.bf16.msra.mxu2 %v8827_v15  ;;  %v8843_v15 = vld [vmem:[%s11285_s5 + $0x844] sm:$0xff]  ;;  %v4640_v1 = vsel %vm1643_vm11, %v4623_v56, 0 }
 0x3cb   : > { %3975 = vmatpush.bf16.msrb.mxu3 %v8803_v3  ;;  %7623 = vmatmul.msk.bf16.vlgmr.msra.gmra.mxu0 %vm579_vm15, %v4011_v30  ;;  %v7796_v3 = vld [vmem:[%s11285_s5 + $0x894] sm:$0x3]  ;;  %v8018_v30 = vld [vmem:[%s11285_s5 + $0x9c0] sm:$0x3] }
 0x3cc   : > { %4368 = vmatpush.bf16.msrb.mxu0 %v8836_v60  ;;  %v10652_v53 = vpop.f32.mrf.mxu0  ;;  %v7944_v60 = vld [vmem:[%s11285_s5 + $0x95c] sm:$0x3]  ;;  %v4887_v32 = vunpack.c.l.b16 %v8018_v30 }
 0x3cd   : > { %4386 = vmatpush.bf16.msrb.mxu1 %v8839_v21  ;;  %v8819_v21 = vld [vmem:[%s11285_s5 + $0x77c] sm:$0xff]  ;;  %v4747_v2 = vunpack.c.l.b16 %v7944_v60  ;;  %v8883_v60 = vld [vmem:[%s11285_s5 + $0x990] sm:$0xff] }
 0x3ce   : > { %4250 = vmatpush.bf16.msra.mxu2 %v8826_v61  ;;  %v4473_v61 = vunpack.c.l.b16 %v7796_v3 }
 0x3cf   : > { %3976 = vmatpush.bf16.msrb.mxu3 %v8802_v63 }
 0x3d0   : > { %4369 = vmatpush.bf16.msrb.mxu0 %v8835_v43  ;;  %v8855_v43 = vld [vmem:[%s11285_s5 + $0x8a8] sm:$0xff] }
 0x3d1   : > { %4387 = vmatpush.bf16.msrb.mxu1 %v8838_v6  ;;  %v4284_v6 = vrot.slane %v10510_v46, 2 }
 0x3d2   : > { %4251 = vmatpush.bf16.msra.mxu2 %v8825_v39  ;;  %v8818_v39 = vld [vmem:[%s11285_s5 + $0x774] sm:$0xff] }
 0x3d3   : > { %3977 = vmatpush.bf16.msrb.mxu3 %v8801_v14  ;;  %v8854_v14 = vld [vmem:[%s11285_s5 + $0x8a0] sm:$0xff] }
 0x3d4   : > { %4370 = vmatpush.bf16.msrb.mxu0 %v8834_v11  ;;  %v2726_v57 = vpop.f32.mrf.mxu0  ;;  %v8842_v11 = vld [vmem:[%s11285_s5 + $0x83c] sm:$0xff] }
 0x3d5   : > { %4388 = vmatpush.bf16.msrb.mxu1 %v8837_v40  ;;  %7697 = vmatmul.msk.bf16.vlgmr.msra.gmra.mxu2 %vm579_vm15, %v4148_v42  ;;  %v814_v40 = vadd.f32 %v9553_v9, %v9596_v29  ;;  %v8887_v57 = vld [vmem:[%s11285_s5 + $0x9b0] sm:$0xff] }
 0x3d6   : > { %4505 = vmatpush.bf16.msrb.mxu2 %v8848_v12  ;;  %7549 = vmatmul.msk.bf16.vlgmr.msrb.gmra.mxu3 %vm579_vm15, %v10602_v19  ;;  %v4760_v12 = vpack.c.b16 %v4747_v2, %v4747_v2 }
 0x3d7   : > { %4231 = vmatpush.bf16.msra.mxu3 %v8824_v23  ;;  %v4486_v23 = vpack.c.b16 %v4473_v61, %v4473_v61  ;;  %v1136_v9 = vadd.f32 %v10358_v51, %v814_v40  ;;  %v8873_v61 = vld [vmem:[%s11285_s5 + $0x93c] sm:$0xff]  ;;  %v8895_v40 = vld [vmem:[%s11285_s5 + $0x9f4] sm:$0xff] }
 0x3d8   : > { %4371 = vmatpush.bf16.msrb.mxu0 %v8833_v18  ;;  %7771 = vmatmul.msk.bf16.vlgmr.msrb.gmra.mxu1 %vm579_vm15, %v4285_v17  ;;  %v785_v18 = vadd.f32 %v9542_v8, %v9603_v33  ;;  %v4777_v44 = vsel %vm1643_vm11, %v4760_v12, 0  ;;  %v8853_v8 = vld [vmem:[%s11285_s5 + $0x898] sm:$0xff]  ;;  %v2738_v33 = vadd.f32 %v10573_v20, %v10652_v53 }
 0x3d9   : > { %4642 = vmatpush.bf16.msra.mxu1 %v8860_v41  ;;  %v3001_v63 = vpop.f32.mrf.mxu1  ;;  %v4503_v29 = vsel %vm1643_vm11, %v4486_v23, 0  ;;  %v1457_v51 = vadd.f32 %v10337_v36, %v1136_v9  ;;  %v8876_v20 = vld [vmem:[%s11285_s5 + $0x954] sm:$0xff]  ;;  %v4147_v36 = vrot.slane %v10546_v50, 1  ;;  %v8908_v23 = vld [vmem:[%s11285_s5 + $0xa60] sm:$0xff]  ;;  %v8166_v9 = vld [vmem:[%s11285_s5 + $0xa88] sm:$0x3] }
 0x3da   : > { %4506 = vmatpush.bf16.msrb.mxu2 %v8847_v16  ;;  %v8817_v16 = vld [vmem:[%s11285_s5 + $0x76c] sm:$0xff] }
 0x3db   : > { %4232 = vmatpush.bf16.msra.mxu3 %v8823_v13  ;;  %v4900_v13 = vpack.c.b16 %v4887_v32, %v4887_v32  ;;  %v8885_v32 = vld [vmem:[%s11285_s5 + $0x9a0] sm:$0xff] }
 0x3dc   : > { %4372 = vmatpush.bf16.msrb.mxu0 %v8832_v22  ;;  %v10716_v27 = vpop.f32.mrf.mxu2  ;;  %v1135_v22 = vadd.f32 %v9660_v5, %v785_v18  ;;  %v8862_v5 = vld [vmem:[%s11285_s5 + $0x8e0] sm:$0xff]  ;;  %v8871_v18 = vld [vmem:[%s11285_s5 + $0x92c] sm:$0xff] }
 0x3dd   : > { %4643 = vmatpush.bf16.msra.mxu1 %v8859_v28  ;;  %v2584_v42 = vpop.f32.mrf.mxu3 }
 0x3de   : > { %4507 = vmatpush.bf16.msrb.mxu2 %v8846_v34  ;;  %v2598_v17 = vadd.f32 %v10590_v45, %v2584_v42  ;;  %v4421_v34 = vrot.slane %v10546_v50, 2  ;;  %v1456_v53 = vadd.f32 %v10349_v49, %v1135_v22  ;;  %v8870_v22 = vld [vmem:[%s11285_s5 + $0x924] sm:$0xff] }
 0x3df   : > { %4233 = vmatpush.bf16.msra.mxu3 %v8822_v31  ;;  %v4917_v31 = vsel %vm1643_vm11, %v4900_v13, 0 }
 0x3e0   : > { %4373 = vmatpush.bf16.msrb.mxu0 %v8831_v4  ;;  %v3014_v41 = vpop.f32.mrf.mxu0  ;;  %v2601_v28 = vadd.f32 %v2598_v17, %v10627_v62  ;;  %v8852_v62 = vld [vmem:[%s11285_s5 + $0x88c] sm:$0xff]  ;;  %v1480_v4 = vpop.permute.xlu2 %1479  ;;  %v8880_v17 = vld [vmem:[%s11285_s5 + $0x978] sm:$0xff] }
 0x3e1   : > { %4644 = vmatpush.bf16.msra.mxu1 %v8858_v48  ;;  %v10731_v0 = vadd.f32 %v3014_v41, %v3001_v63  ;;  %v3003_v45 = vpop.f32.mrf.mxu1  ;;  %v1488_v56 = vadd.f32 %v1480_v4, %v1456_v53  ;;  %v8896_v63 = vld [vmem:[%s11285_s5 + $0x9fc] sm:$0xff]  ;;  %v4422_v41 = vrot.slane %v10602_v19, 2 }
 0x3e2   : > { %4508 = vmatpush.bf16.msrb.mxu2 %v8845_v26  ;;  %v2741_v38 = vadd.f32 %v2738_v33, %v2601_v28  ;;  %v4558_v26 = vrot.slane %v10510_v46, 3  ;;  %v8875_v46 = vld [vmem:[%s11285_s5 + $0x94c] sm:$0xff]  ;;  %v8893_v33 = vld [vmem:[%s11285_s5 + $0x9e4] sm:$0xff]  ;;  %v8869_v45 = vld [vmem:[%s11285_s5 + $0x91c] sm:$0xff] }
 0x3e3   : > { %4234 = vmatpush.bf16.msra.mxu3 %v8821_v47  ;;  %v8861_v47 = vld [vmem:[%s11285_s5 + $0x8d8] sm:$0xff]  ;;  %v8877_v53 = vld [vmem:[%s11285_s5 + $0x960] sm:$0xff] }
 0x3e4   : > { %4374 = vmatpush.bf16.msrb.mxu0 %v8830_v24  ;;  %v2866_v48 = vpop.f32.mrf.mxu2  ;;  %v1489_v24 = vadd.f32 %v1480_v4, %v1457_v51  ;;  %v8240_v4 = vld [vmem:[%s11285_s5 + $0xaec] sm:$0x3] }
 0x3e5   : > { %4645 = vmatpush.bf16.msra.mxu1 %v8857_v52  ;;  %v2586_v52 = vpop.f32.mrf.mxu3 }
 0x3e6   : > { %4509 = vmatpush.bf16.msrb.mxu2 %v8844_v54  ;;  %v8884_v54 = vld [vmem:[%s11285_s5 + $0x998] sm:$0xff]  ;;  %v5301_v52 = vunpack.c.l.b16 %v8240_v4 }
 0x3e7   : > { %4235 = vmatpush.bf16.msra.mxu3 %v8820_v55  ;;  %v8851_v55 = vld [vmem:[%s11285_s5 + $0x884] sm:$0xff] }
 0x3e8   : > { %4375 = vmatpush.bf16.msrb.mxu0 %v8829_v58  ;;  %v3016_v49 = vpop.f32.mrf.mxu0  ;;  %v1497_v58 = vmax.f32 %v1489_v24, 0.0 }
 0x3e9   : > { %4646 = vmatpush.bf16.msra.mxu1 %v8856_v59  ;;  %v4559_v59 = vrot.slane %v10436_v25, 3  ;;  %v8886_v25 = vld [vmem:[%s11285_s5 + $0x9a8] sm:$0xff] }
 0x3ea   : > { %4510 = vmatpush.bf16.msrb.mxu2 %v8843_v15  ;;  %v8874_v15 = vld [vmem:[%s11285_s5 + $0x944] sm:$0xff]  ;;  %v8867_v49 = vld [vmem:[%s11285_s5 + $0x90c] sm:$0xff] }
 0x3eb   : > { %4236 = vmatpush.bf16.msra.mxu3 %v8819_v21  ;;  %4376 = vmatmul.bf16.vlgmr.msrb.gmra.mxu0 %v4284_v6  ;;  %v1496_v21 = vmax.f32 %v1488_v56, 0.0  ;;  %v8849_v6 = vld [vmem:[%s11285_s5 + $0x874] sm:$0xff] }
 0x3ec   : > { %4658 = vmatpush.bf16.msra.mxu0 %v4640_v1  ;;  %v8850_v1 = vld [vmem:[%s11285_s5 + $0x87c] sm:$0xff] }
 0x3ed   : > { %4647 = vmatpush.bf16.msra.mxu1 %v8855_v43  ;;  %v3288_v3 = vpop.f32.mrf.mxu1  ;;  %v10791_v2 = vpack.c.bf16 %v1497_v58, %v1496_v21  ;;  %v8882_v43 = vld [vmem:[%s11285_s5 + $0x988] sm:$0xff] }
 0x3ee   : > { %4511 = vmatpush.bf16.msrb.mxu2 %v8842_v11  ;;  %v8872_v11 = vld [vmem:[%s11285_s5 + $0x934] sm:$0xff]  ;;  %v8890_v58 = vld [vmem:[%s11285_s5 + $0x9cc] sm:$0xff] }
 0x3ef   : > { %4237 = vmatpush.bf16.msra.mxu3 %v8818_v39  ;;  %v4834_v12 = vunpack.c.h.b16 %v10791_v2  ;;  %v4833_v48 = vunpack.c.l.b16 %v10791_v2  ;;  %v8911_v2 = vld [vmem:[%s11285_s5 + $0xa78] sm:$0xff] }
 0x3f0   : > { %4659 = vmatpush.bf16.msra.mxu0 %v8864_v10  ;;  %v10793_v30 = vpop.f32.mrf.mxu2 }
 0x3f1   : > { %4648 = vmatpush.bf16.msra.mxu1 %v8854_v14  ;;  %v2877_v10 = vpop.f32.mrf.mxu3  ;;  %v8881_v14 = vld [vmem:[%s11285_s5 + $0x980] sm:$0xff]  ;;  %v10905_v56 = vpack.c.b16 %v4833_v48, %v4833_v48 }
 0x3f2   : > { %4512 = vmatpush.bf16.msrb.mxu2 %v8841_v37  ;;  %v2878_v39 = vadd.f32 %v2877_v10, %v10716_v27  ;;  %v4696_v27 = vrot.slane %v10602_v19, 3  ;;  %v8894_v19 = vld [vmem:[%s11285_s5 + $0x9ec] sm:$0xff]  ;;  %v8920_v48 = vld [vmem:[%s11285_s5 + $0xac4] sm:$0xff] }
 0x3f3   : > { %4238 = vmatpush.bf16.msra.mxu3 %v8817_v16  ;;  %v10833_v16 = vpack.c.b16 %v4834_v12, %v4834_v12  ;;  %v8901_v12 = vld [vmem:[%s11285_s5 + $0xa28] sm:$0xff] }
 0x3f4   : > { %4660 = vmatpush.bf16.msra.mxu0 %v8863_v35  ;;  %v2881_v35 = vadd.f32 %v2878_v39, %v2741_v38 }
 0x3f5   : > { %4649 = vmatpush.bf16.msra.mxu1 %v8853_v8  ;;  %4513 = vmatmul.bf16.vlgmr.msrb.gmra.mxu2 %v4421_v34  ;;  %v3290_v37 = vpop.f32.mrf.mxu1  ;;  %v8879_v8 = vld [vmem:[%s11285_s5 + $0x970] sm:$0xff]  ;;  %v8878_v34 = vld [vmem:[%s11285_s5 + $0x968] sm:$0xff] }
 0x3f6   : > { %4795 = vmatpush.bf16.msra.mxu2 %v4777_v44  ;;  %4239 = vmatmul.bf16.vlgmr.msra.gmra.mxu3 %v4147_v36  ;;  %v10831_v42 = vadd.f32 %v10731_v0, %v2881_v35  ;;  %v8907_v44 = vld [vmem:[%s11285_s5 + $0xa58] sm:$0xff]  ;;  %v8904_v36 = vld [vmem:[%s11285_s5 + $0xa40] sm:$0xff] }
 0x3f7   : > { %4521 = vmatpush.bf16.msrb.mxu3 %v4503_v29  ;;  %v8906_v29 = vld [vmem:[%s11285_s5 + $0xa50] sm:$0xff] }
 0x3f8   : > { %4661 = vmatpush.bf16.msra.mxu0 %v8862_v5  ;;  %4650 = vmatmul.bf16.vlgmr.msra.gmra.mxu1 %v4558_v26  ;;  %v3153_v13 = vpop.f32.mrf.mxu2  ;;  %v5164_v5 = vunpack.c.l.b16 %v8166_v9  ;;  %v8891_v26 = vld [vmem:[%s11285_s5 + $0x9d4] sm:$0xff] }
 0x3f9   : > { %4935 = vmatpush.bf16.msrb.mxu1 %v4917_v31  ;;  %v2879_v0 = vpop.f32.mrf.mxu3  ;;  %v8905_v31 = vld [vmem:[%s11285_s5 + $0xa48] sm:$0xff] }
 0x3fa   : > { %4796 = vmatpush.bf16.msra.mxu2 %v8876_v20  ;;  %v8892_v20 = vld [vmem:[%s11285_s5 + $0x9dc] sm:$0xff]  ;;  %v5177_v38 = vpack.c.b16 %v5164_v5, %v5164_v5 }
 0x3fb   : > { %4522 = vmatpush.bf16.msrb.mxu3 %v8852_v62  ;;  %v8868_v62 = vld [vmem:[%s11285_s5 + $0x914] sm:$0xff]  ;;  %v8923_v0 = vld [vmem:[%s11285_s5 + $0xadc] sm:$0xff] }
 0x3fc   : > { %4662 = vmatpush.bf16.msra.mxu0 %v8861_v47  ;;  %v8092_v47 = vld [vmem:[%s11285_s5 + $0xa24] sm:$0x3]  ;;  %v5194_v24 = vsel %vm1643_vm11, %v5177_v38, 0  ;;  %v10998_v38 = vshrl.u32 %v10833_v16, 16 }
 0x3fd   : > { %4936 = vmatpush.bf16.msrb.mxu1 %v8888_v7 }
 0x3fe   : > { %4797 = vmatpush.bf16.msra.mxu2 %v8875_v46  ;;  %v8903_v46 = vld [vmem:[%s11285_s5 + $0xa38] sm:$0xff] }
 0x3ff   : > { %4523 = vmatpush.bf16.msrb.mxu3 %v8851_v55  ;;  %7919 = vmatmul.msk.bf16.vlgmr.msra.gmra.mxu0 %vm579_vm15, %v4559_v59  ;;  %v5027_v55 = vunpack.c.l.b16 %v8092_v47  ;;  %v8933_v47 = vld [vmem:[%s11285_s5 + $0xb30] sm:$0xff] }
 0x400   : > { %4919 = vmatpush.bf16.msrb.mxu0 %v8884_v54  ;;  %v3275_v28 = vpop.f32.mrf.mxu0  ;;  %v8314_v54 = vld [vmem:[%s11285_s5 + $0xb50] sm:$0x3] }
 0x401   : > { %4937 = vmatpush.bf16.msrb.mxu1 %v8887_v57  ;;  %v10865_v51 = vadd.f32 %v3288_v3, %v3275_v28  ;;  %v8912_v57 = vld [vmem:[%s11285_s5 + $0xa80] sm:$0xff]  ;;  %v5314_v3 = vpack.c.b16 %v5301_v52, %v5301_v52  ;;  %v5040_v21 = vpack.c.b16 %v5027_v55, %v5027_v55 }
 0x402   : > { %4798 = vmatpush.bf16.msra.mxu2 %v8874_v15  ;;  %v5438_v15 = vunpack.c.l.b16 %v8314_v54  ;;  %v8931_v28 = vld [vmem:[%s11285_s5 + $0xb20] sm:$0xff]  ;;  %v5250_v54 = vrot.slane %v10998_v38, 1 }
 0x403   : > { %4524 = vmatpush.bf16.msrb.mxu3 %v8850_v1  ;;  %v8902_v1 = vld [vmem:[%s11285_s5 + $0xa30] sm:$0xff]  ;;  %v8919_v55 = vld [vmem:[%s11285_s5 + $0xabc] sm:$0xff] }
 0x404   : > { %4920 = vmatpush.bf16.msrb.mxu0 %v8883_v60  ;;  %v8866_v60 = vld [vmem:[%s11285_s5 + $0x904] sm:$0xff] }
 0x405   : > { %4938 = vmatpush.bf16.msrb.mxu1 %v8886_v25 }
 0x406   : > { %4799 = vmatpush.bf16.msra.mxu2 %v8873_v61  ;;  %v8865_v61 = vld [vmem:[%s11285_s5 + $0x8fc] sm:$0xff] }
 0x407   : > { %4525 = vmatpush.bf16.msrb.mxu3 %v8849_v6 }
 0x408   : > { %4921 = vmatpush.bf16.msrb.mxu0 %v8882_v43  ;;  %v3277_v7 = vpop.f32.mrf.mxu0  ;;  %v8889_v43 = vld [vmem:[%s11285_s5 + $0x9c4] sm:$0xff] }
 0x409   : > { %4939 = vmatpush.bf16.msrb.mxu1 %v8885_v32  ;;  %7993 = vmatmul.msk.bf16.vlgmr.msra.gmra.mxu2 %vm579_vm15, %v4696_v27  ;;  %v8929_v7 = vld [vmem:[%s11285_s5 + $0xb10] sm:$0xff] }
 0x40a   : > { %5059 = vmatpush.bf16.msrb.mxu2 %v8896_v63  ;;  %7845 = vmatmul.msk.bf16.vlgmr.msrb.gmra.mxu3 %vm579_vm15, %v4422_v41  ;;  %v5451_v63 = vpack.c.b16 %v5438_v15, %v5438_v15  ;;  %v4695_v41 = vrot.slane %v10546_v50, 3  ;;  %v8932_v50 = vld [vmem:[%s11285_s5 + $0xb28] sm:$0xff] }
 0x40b   : > { %4779 = vmatpush.bf16.msra.mxu3 %v8872_v11  ;;  %v5331_v11 = vsel %vm1643_vm11, %v5314_v3, 0  ;;  %v8955_v15 = vld [vmem:[%s11285_s5 + $0xbe8] sm:$0xff]  ;;  %v8942_v3 = vld [vmem:[%s11285_s5 + $0xb7c] sm:$0xff] }
 0x40c   : > { %4922 = vmatpush.bf16.msrb.mxu0 %v8881_v14  ;;  %8067 = vmatmul.msk.bf16.vlgmr.msrb.gmra.mxu1 %vm579_vm15, %v10833_v16  ;;  %v5057_v14 = vsel %vm1643_vm11, %v5040_v21, 0  ;;  %v5468_v27 = vsel %vm1643_vm11, %v5451_v63, 0  ;;  %v8918_v21 = vld [vmem:[%s11285_s5 + $0xab4] sm:$0xff] }
 0x40d   : > { %5196 = vmatpush.bf16.msra.mxu1 %v8908_v23  ;;  %v3549_v59 = vpop.f32.mrf.mxu1  ;;  %v8910_v23 = vld [vmem:[%s11285_s5 + $0xa70] sm:$0xff] }
 0x40e   : > { %5060 = vmatpush.bf16.msrb.mxu2 %v8895_v40  ;;  %v8924_v40 = vld [vmem:[%s11285_s5 + $0xae4] sm:$0xff] }
 0x40f   : > { %4780 = vmatpush.bf16.msra.mxu3 %v8871_v18  ;;  %v8900_v18 = vld [vmem:[%s11285_s5 + $0xa1c] sm:$0xff] }
 0x410   : > { %4923 = vmatpush.bf16.msrb.mxu0 %v8880_v17  ;;  %v10920_v25 = vpop.f32.mrf.mxu2  ;;  %v5112_v17 = vrot.slane %v10905_v56, 1 }
 0x411   : > { %5197 = vmatpush.bf16.msra.mxu1 %v8907_v44  ;;  %v3138_v10 = vpop.f32.mrf.mxu3  ;;  %v8909_v44 = vld [vmem:[%s11285_s5 + $0xa68] sm:$0xff] }
 0x412   : > { %5061 = vmatpush.bf16.msrb.mxu2 %v8894_v19  ;;  %v3152_v32 = vadd.f32 %v10793_v30, %v3138_v10  ;;  %v10944_v30 = vshrl.u32 %v10905_v56, 16  ;;  %v8936_v19 = vld [vmem:[%s11285_s5 + $0xb48] sm:$0xff] }
 0x413   : > { %4781 = vmatpush.bf16.msra.mxu3 %v8870_v22 }
 0x414   : > { %4924 = vmatpush.bf16.msrb.mxu0 %v8879_v8  ;;  %v3562_v6 = vpop.f32.mrf.mxu0  ;;  %v3155_v35 = vadd.f32 %v3152_v32, %v10831_v42  ;;  %v8899_v8 = vld [vmem:[%s11285_s5 + $0xa14] sm:$0xff] }
 0x415   : > { %5198 = vmatpush.bf16.msra.mxu1 %v8906_v29  ;;  %v10932_v39 = vadd.f32 %v3562_v6, %v3549_v59  ;;  %v3551_v37 = vpop.f32.mrf.mxu1  ;;  %v8935_v29 = vld [vmem:[%s11285_s5 + $0xb40] sm:$0xff]  ;;  %v5387_v59 = vrot.slane %v10833_v16, 2  ;;  %v8917_v6 = vld [vmem:[%s11285_s5 + $0xaac] sm:$0xff]  ;;  %v8953_v32 = vld [vmem:[%s11285_s5 + $0xbd8] sm:$0xff] }
 0x416   : > { %5062 = vmatpush.bf16.msrb.mxu2 %v8893_v33  ;;  %v3292_v42 = vadd.f32 %v10865_v51, %v3155_v35  ;;  %v5113_v33 = vrot.slane %v10833_v16, 1  ;;  %v8898_v51 = vld [vmem:[%s11285_s5 + $0xa0c] sm:$0xff] }
 0x417   : > { %4782 = vmatpush.bf16.msra.mxu3 %v8869_v45  ;;  %v8922_v45 = vld [vmem:[%s11285_s5 + $0xad4] sm:$0xff] }
 0x418   : > { %4925 = vmatpush.bf16.msrb.mxu0 %v8878_v34  ;;  %v3414_v13 = vpop.f32.mrf.mxu2  ;;  %v8934_v34 = vld [vmem:[%s11285_s5 + $0xb38] sm:$0xff]  ;;  %v8925_v35 = vld [vmem:[%s11285_s5 + $0xaf0] sm:$0xff] }
 0x419   : > { %5199 = vmatpush.bf16.msra.mxu1 %v8905_v31  ;;  %v3140_v9 = vpop.f32.mrf.mxu3  ;;  %v8952_v37 = vld [vmem:[%s11285_s5 + $0xbd0] sm:$0xff]  ;;  %v8915_v13 = vld [vmem:[%s11285_s5 + $0xa9c] sm:$0xff] }
 0x41a   : > { %5063 = vmatpush.bf16.msrb.mxu2 %v8892_v20  ;;  %v8930_v20 = vld [vmem:[%s11285_s5 + $0xb18] sm:$0xff] }
 0x41b   : > { %4783 = vmatpush.bf16.msra.mxu3 %v8868_v62  ;;  %v8921_v62 = vld [vmem:[%s11285_s5 + $0xacc] sm:$0xff] }
 0x41c   : > { %4926 = vmatpush.bf16.msrb.mxu0 %v8877_v53  ;;  %v3564_v22 = vpop.f32.mrf.mxu0  ;;  %v8944_v53 = vld [vmem:[%s11285_s5 + $0xb8c] sm:$0xff] }
 0x41d   : > { %5200 = vmatpush.bf16.msra.mxu1 %v8904_v36  ;;  %v8897_v36 = vld [vmem:[%s11285_s5 + $0xa04] sm:$0xff]  ;;  %v8938_v22 = vld [vmem:[%s11285_s5 + $0xb5c] sm:$0xff] }
 0x41e   : > { %5064 = vmatpush.bf16.msrb.mxu2 %v8891_v26 }
 0x41f   : > { %4784 = vmatpush.bf16.msra.mxu3 %v8867_v49  ;;  %4927 = vmatmul.bf16.vlgmr.msrb.gmra.mxu0 %v10905_v56 }
 0x420   : > { %5212 = vmatpush.bf16.msra.mxu0 %v5194_v24  ;;  %v8956_v24 = vld [vmem:[%s11285_s5 + $0xbf0] sm:$0xff] }
 0x421   : > { %5201 = vmatpush.bf16.msra.mxu1 %v8903_v46  ;;  %v3839_v5 = vpop.f32.mrf.mxu1  ;;  %v8943_v46 = vld [vmem:[%s11285_s5 + $0xb84] sm:$0xff] }
 0x422   : > { %5065 = vmatpush.bf16.msrb.mxu2 %v8890_v58 }
 0x423   : > { %4785 = vmatpush.bf16.msra.mxu3 %v8866_v60  ;;  %v8928_v60 = vld [vmem:[%s11285_s5 + $0xb08] sm:$0xff] }
 0x424   : > { %5213 = vmatpush.bf16.msra.mxu0 %v8912_v57  ;;  %v10989_v31 = vpop.f32.mrf.mxu2 }
 0x425   : > { %5202 = vmatpush.bf16.msra.mxu1 %v8902_v1  ;;  %v3425_v4 = vpop.f32.mrf.mxu3 }
 0x426   : > { %5066 = vmatpush.bf16.msrb.mxu2 %v8889_v43  ;;  %v3426_v26 = vadd.f32 %v3425_v4, %v10920_v25  ;;  %v8462_v25 = vld [vmem:[%s11285_s5 + $0xc18] sm:$0x3]  ;;  %v8954_v43 = vld [vmem:[%s11285_s5 + $0xbe0] sm:$0xff] }
 0x427   : > { %4786 = vmatpush.bf16.msra.mxu3 %v8865_v61  ;;  %v8941_v61 = vld [vmem:[%s11285_s5 + $0xb74] sm:$0xff]  ;;  %v5712_v10 = vunpack.c.l.b16 %v8462_v25  ;;  %v8946_v25 = vld [vmem:[%s11285_s5 + $0xb9c] sm:$0xff] }
 0x428   : > { %5214 = vmatpush.bf16.msra.mxu0 %v8911_v2  ;;  %v3429_v49 = vadd.f32 %v3426_v26, %v3292_v42  ;;  %v8927_v2 = vld [vmem:[%s11285_s5 + $0xb00] sm:$0xff] }
 0x429   : > { %5203 = vmatpush.bf16.msra.mxu1 %v8901_v12  ;;  %5067 = vmatmul.bf16.vlgmr.msrb.gmra.mxu2 %v10944_v30  ;;  %v3841_v52 = vpop.f32.mrf.mxu1  ;;  %v8940_v12 = vld [vmem:[%s11285_s5 + $0xb6c] sm:$0xff] }
 0x42a   : > { %5349 = vmatpush.bf16.msra.mxu2 %v5331_v11  ;;  %4787 = vmatmul.bf16.vlgmr.msra.gmra.mxu3 %v4695_v41  ;;  %v11028_v57 = vadd.f32 %v10932_v39, %v3429_v49  ;;  %v8926_v39 = vld [vmem:[%s11285_s5 + $0xaf8] sm:$0xff]  ;;  %v5249_v52 = vrot.slane %v10944_v30, 1 }
 0x42b   : > { %5075 = vmatpush.bf16.msrb.mxu3 %v5057_v14  ;;  %v8916_v14 = vld [vmem:[%s11285_s5 + $0xaa4] sm:$0xff]  ;;  %v8972_v49 = vld [vmem:[%s11285_s5 + $0xc74] sm:$0xff] }
 0x42c   : > { %5215 = vmatpush.bf16.msra.mxu0 %v8910_v23  ;;  %5204 = vmatmul.bf16.vlgmr.msra.gmra.mxu1 %v5112_v17  ;;  %v3701_v58 = vpop.f32.mrf.mxu2  ;;  %v5725_v23 = vpack.c.b16 %v5712_v10, %v5712_v10 }
 0x42d   : > { %5486 = vmatpush.bf16.msrb.mxu1 %v5468_v27  ;;  %v3427_v1 = vpop.f32.mrf.mxu3  ;;  %v8536_v27 = vld [vmem:[%s11285_s5 + $0xc7c] sm:$0x3] }
 0x42e   : > { %5350 = vmatpush.bf16.msra.mxu2 %v8924_v40  ;;  %v8939_v40 = vld [vmem:[%s11285_s5 + $0xb64] sm:$0xff]  ;;  %v5742_v42 = vsel %vm1643_vm11, %v5725_v23, 0  ;;  %v5849_v17 = vunpack.c.l.b16 %v8536_v27  ;;  %v8957_v58 = vld [vmem:[%s11285_s5 + $0xbf8] sm:$0xff] }
 0x42f   : > { %5076 = vmatpush.bf16.msrb.mxu3 %v8900_v18  ;;  %v8388_v18 = vld [vmem:[%s11285_s5 + $0xbb4] sm:$0x3]  ;;  %v8970_v1 = vld [vmem:[%s11285_s5 + $0xc64] sm:$0xff] }
 0x430   : > { %5216 = vmatpush.bf16.msra.mxu0 %v8909_v44  ;;  %v8951_v44 = vld [vmem:[%s11285_s5 + $0xbc8] sm:$0xff] }
 0x431   : > { %5487 = vmatpush.bf16.msrb.mxu1 %v8936_v19  ;;  %v5575_v19 = vunpack.c.l.b16 %v8388_v18  ;;  %v8964_v18 = vld [vmem:[%s11285_s5 + $0xc34] sm:$0xff] }
 0x432   : > { %5351 = vmatpush.bf16.msra.mxu2 %v8923_v0  ;;  %v8960_v0 = vld [vmem:[%s11285_s5 + $0xc10] sm:$0xff] }
 0x433   : > { %5077 = vmatpush.bf16.msrb.mxu3 %v8899_v8  ;;  %8215 = vmatmul.msk.bf16.vlgmr.msra.gmra.mxu0 %vm579_vm15, %v5113_v33  ;;  %v8914_v8 = vld [vmem:[%s11285_s5 + $0xa94] sm:$0xff]  ;;  %v8950_v33 = vld [vmem:[%s11285_s5 + $0xbc0] sm:$0xff] }
 0x434   : > { %5470 = vmatpush.bf16.msrb.mxu0 %v8932_v50  ;;  %v3826_v63 = vpop.f32.mrf.mxu0  ;;  %v5386_v50 = vrot.slane %v10905_v56, 2 }
 0x435   : > { %5488 = vmatpush.bf16.msrb.mxu1 %v8935_v29  ;;  %v11061_v11 = vadd.f32 %v3839_v5, %v3826_v63  ;;  %v5862_v29 = vpack.c.b16 %v5849_v17, %v5849_v17  ;;  %v8959_v5 = vld [vmem:[%s11285_s5 + $0xc08] sm:$0xff]  ;;  %v8968_v63 = vld [vmem:[%s11285_s5 + $0xc54] sm:$0xff] }
 0x436   : > { %5352 = vmatpush.bf16.msra.mxu2 %v8922_v45  ;;  %v8962_v17 = vld [vmem:[%s11285_s5 + $0xc24] sm:$0xff] }
 0x437   : > { %5078 = vmatpush.bf16.msrb.mxu3 %v8898_v51  ;;  %v8937_v51 = vld [vmem:[%s11285_s5 + $0xb54] sm:$0xff] }
 0x438   : > { %5471 = vmatpush.bf16.msrb.mxu0 %v8931_v28  ;;  %v5588_v28 = vpack.c.b16 %v5575_v19, %v5575_v19  ;;  %v8961_v19 = vld [vmem:[%s11285_s5 + $0xc1c] sm:$0xff] }
 0x439   : > { %5489 = vmatpush.bf16.msrb.mxu1 %v8934_v34  ;;  %v8913_v34 = vld [vmem:[%s11285_s5 + $0xa8c] sm:$0xff] }
 0x43a   : > { %5353 = vmatpush.bf16.msra.mxu2 %v8921_v62  ;;  %v5605_v26 = vsel %vm1643_vm11, %v5588_v28, 0 }
 0x43b   : > { %5079 = vmatpush.bf16.msrb.mxu3 %v8897_v36 }
 0x43c   : > { %5472 = vmatpush.bf16.msrb.mxu0 %v8930_v20  ;;  %v3828_v41 = vpop.f32.mrf.mxu0 }
 0x43d   : > { %5490 = vmatpush.bf16.msrb.mxu1 %v8933_v47  ;;  %8289 = vmatmul.msk.bf16.vlgmr.msra.gmra.mxu2 %vm579_vm15, %v5250_v54  ;;  %v8958_v47 = vld [vmem:[%s11285_s5 + $0xc00] sm:$0xff]  ;;  %v8948_v54 = vld [vmem:[%s11285_s5 + $0xbac] sm:$0xff] }
 0x43e   : > { %5607 = vmatpush.bf16.msrb.mxu2 %v8944_v53  ;;  %8141 = vmatmul.msk.bf16.vlgmr.msrb.gmra.mxu3 %vm579_vm15, %v10998_v38  ;;  %v5879_v53 = vsel %vm1643_vm11, %v5862_v29, 0 }
 0x43f   : > { %5333 = vmatpush.bf16.msra.mxu3 %v8920_v48  ;;  %v8949_v48 = vld [vmem:[%s11285_s5 + $0xbb8] sm:$0xff] }
 0x440   : > { %5473 = vmatpush.bf16.msrb.mxu0 %v8929_v7  ;;  %8363 = vmatmul.msk.bf16.vlgmr.msrb.gmra.mxu1 %vm579_vm15, %v5387_v59  ;;  %v8971_v59 = vld [vmem:[%s11285_s5 + $0xc6c] sm:$0xff] }
 0x441   : > { %5744 = vmatpush.bf16.msra.mxu1 %v8956_v24  ;;  %v4103_v9 = vpop.f32.mrf.mxu1 }
 0x442   : > { %5608 = vmatpush.bf16.msrb.mxu2 %v8943_v46 }
 0x443   : > { %5334 = vmatpush.bf16.msra.mxu3 %v8919_v55 }
 0x444   : > { %5474 = vmatpush.bf16.msrb.mxu0 %v8928_v60  ;;  %v3966_v45 = vpop.f32.mrf.mxu2 }
 0x445   : > { %5745 = vmatpush.bf16.msra.mxu1 %v8955_v15  ;;  %v3686_v62 = vpop.f32.mrf.mxu3 }
 0x446   : > { %5609 = vmatpush.bf16.msrb.mxu2 %v8942_v3  ;;  %v3700_v4 = vadd.f32 %v10989_v31, %v3686_v62  ;;  %v5523_v31 = vrot.slane %v10944_v30, 2  ;;  %v8947_v3 = vld [vmem:[%s11285_s5 + $0xba4] sm:$0xff] }
 0x447   : > { %5335 = vmatpush.bf16.msra.mxu3 %v8918_v21 }
 0x448   : > { %5475 = vmatpush.bf16.msrb.mxu0 %v8927_v2  ;;  %v4116_v20 = vpop.f32.mrf.mxu0  ;;  %v3703_v7 = vadd.f32 %v3700_v4, %v11028_v57  ;;  %v5660_v57 = vrot.slane %v10905_v56, 3  ;;  %v5661_v56 = vrot.slane %v10833_v16, 3  ;;  %v8945_v16 = vld [vmem:[%s11285_s5 + $0xb94] sm:$0xff] }
 0x449   : > { %5746 = vmatpush.bf16.msra.mxu1 %v8954_v43  ;;  %v4117_v36 = vadd.f32 %v4116_v20, %v4103_v9  ;;  %v4105_v24 = vpop.f32.mrf.mxu1  ;;  %v8969_v43 = vld [vmem:[%s11285_s5 + $0xc5c] sm:$0xff] }
 0x44a   : > { %5610 = vmatpush.bf16.msrb.mxu2 %v8941_v61  ;;  %v3843_v46 = vadd.f32 %v11061_v11, %v3703_v7 }
 0x44b   : > { %5336 = vmatpush.bf16.msra.mxu3 %v8917_v6 }
 0x44c   : > { %5476 = vmatpush.bf16.msrb.mxu0 %v8926_v39  ;;  %v3968_v55 = vpop.f32.mrf.mxu2  ;;  %v5798_v39 = vrot.slane %v10998_v38, 3 }
 0x44d   : > { %5747 = vmatpush.bf16.msra.mxu1 %v8953_v32  ;;  %v3688_v15 = vpop.f32.mrf.mxu3  ;;  %v5524_v32 = vrot.slane %v10998_v38, 2  ;;  %v8965_v38 = vld [vmem:[%s11285_s5 + $0xc3c] sm:$0xff] }
 0x44e   : > { %5611 = vmatpush.bf16.msrb.mxu2 %v8940_v12  ;;  %v8967_v12 = vld [vmem:[%s11285_s5 + $0xc4c] sm:$0xff] }
 0x44f   : > { %5337 = vmatpush.bf16.msra.mxu3 %v8916_v14 }
 0x450   : > { %5477 = vmatpush.bf16.msrb.mxu0 %v8925_v35  ;;  %v4118_v60 = vpop.f32.mrf.mxu0 }
 0x451   : > { %5748 = vmatpush.bf16.msra.mxu1 %v8952_v37  ;;  %v8966_v37 = vld [vmem:[%s11285_s5 + $0xc44] sm:$0xff] }
 0x452   : > { %5612 = vmatpush.bf16.msrb.mxu2 %v8939_v40 }
 0x453   : > { %5338 = vmatpush.bf16.msra.mxu3 %v8915_v13  ;;  %5478 = vmatmul.bf16.vlgmr.msrb.gmra.mxu0 %v5386_v50 }
 0x454   : > { %5760 = vmatpush.bf16.msra.mxu0 %v5742_v42  ;;  %v8963_v42 = vld [vmem:[%s11285_s5 + $0xc2c] sm:$0xff] }
 0x455   : > { %5749 = vmatpush.bf16.msra.mxu1 %v8951_v44  ;;  %v4390_v21 = vpop.f32.mrf.mxu1 }
 0x456   : > { %5613 = vmatpush.bf16.msrb.mxu2 %v8938_v22 }
 0x457   : > { %5339 = vmatpush.bf16.msra.mxu3 %v8914_v8 }
 0x458   : > { %5761 = vmatpush.bf16.msra.mxu0 %v8960_v0  ;;  %v4253_v2 = vpop.f32.mrf.mxu2 }
 0x459   : > { %5750 = vmatpush.bf16.msra.mxu1 %v8950_v33  ;;  %v3979_v61 = vpop.f32.mrf.mxu3  ;;  %v5797_v33 = vrot.slane %v10944_v30, 3 }
 0x45a   : > { %5614 = vmatpush.bf16.msrb.mxu2 %v8937_v51  ;;  %v3980_v6 = vadd.f32 %v3979_v61, %v3966_v45 }
 0x45b   : > { %5340 = vmatpush.bf16.msra.mxu3 %v8913_v34 }
 0x45c   : > { %5762 = vmatpush.bf16.msra.mxu0 %v8959_v5  ;;  %v3983_v10 = vadd.f32 %v3980_v6, %v3843_v46 }
 0x45d   : > { %5751 = vmatpush.bf16.msra.mxu1 %v8949_v48  ;;  %5615 = vmatmul.bf16.vlgmr.msrb.gmra.mxu2 %v5523_v31  ;;  %v4392_v11 = vpop.f32.mrf.mxu1 }
 0x45e   : > { %5897 = vmatpush.bf16.msra.mxu2 %v5879_v53  ;;  %5341 = vmatmul.bf16.vlgmr.msra.gmra.mxu3 %v5249_v52  ;;  %v4120_v14 = vadd.f32 %v4117_v36, %v3983_v10  ;;  %v5926_v11 = vld [vmem:[%s11287_s7 + $0x78] sm:$0xff] }
 0x45f   : > { %5623 = vmatpush.bf16.msrb.mxu3 %v5605_v26 }
 0x460   : > { %5763 = vmatpush.bf16.msra.mxu0 %v8958_v47  ;;  %5752 = vmatmul.bf16.vlgmr.msra.gmra.mxu1 %v5660_v57  ;;  %v4255_v23 = vpop.f32.mrf.mxu2 }
 0x461   : > { %v3981_v35 = vpop.f32.mrf.mxu3  ;;  %v5922_v23 = vld [vmem:[%s11287_s7 + $0x58] sm:$0xff] }
 0x462   : > { %5898 = vmatpush.bf16.msra.mxu2 %v8972_v49 }
 0x463   : > { %5624 = vmatpush.bf16.msrb.mxu3 %v8948_v54 }
 0x464   : > { %5764 = vmatpush.bf16.msra.mxu0 %v8957_v58 }
 0x466   : > { %5899 = vmatpush.bf16.msra.mxu2 %v8971_v59 }
 0x467   : > { %5625 = vmatpush.bf16.msrb.mxu3 %v8947_v3  ;;  %8511 = vmatmul.msk.bf16.vlgmr.msra.gmra.mxu0 %vm579_vm15, %v5661_v56 }
 0x468   : > { %v4377_v27 = vpop.f32.mrf.mxu0  ;;  %5928 = vmatpush.msrb.mxu0 %v5926_v11 }
 0x469   : > { %v4391_v40 = vadd.f32 %v4390_v21, %v4377_v27  ;;  %v5921_v27 = vld [vmem:[%s11287_s7 + $0x50] sm:$0xff] }
 0x46a   : > { %5900 = vmatpush.bf16.msra.mxu2 %v8970_v1 }
 0x46b   : > { %5626 = vmatpush.bf16.msrb.mxu3 %v8946_v25 }
 0x46e   : > { %5901 = vmatpush.bf16.msra.mxu2 %v8969_v43 }
 0x46f   : > { %5627 = vmatpush.bf16.msrb.mxu3 %v8945_v16 }
 0x470   : > { %v4379_v41 = vpop.f32.mrf.mxu0 }
 0x471   : > { %8585 = vmatmul.msk.bf16.vlgmr.msra.gmra.mxu2 %vm579_vm15, %v5798_v39  ;;  %v5925_v39 = vld [vmem:[%s11287_s7 + $0x70] sm:$0xff] }
 0x472   : > { %8437 = vmatmul.msk.bf16.vlgmr.msrb.gmra.mxu3 %vm579_vm15, %v5524_v32  ;;  %v5924_v32 = vld [vmem:[%s11287_s7 + $0x68] sm:$0xff]  ;;  %5929 = vmatpush.msrb.mxu0 %v5925_v39  ;;  %vm5949_vm15 = vcmask 106496  }
 0x473   : > { %5881 = vmatpush.bf16.msra.mxu3 %v8968_v63 }
 0x474   : > { %5930 = vmatpush.msrb.mxu0 %v5924_v32 }
 0x475   : > { %v4651_v13 = vpop.f32.mrf.mxu1 }
 0x477   : > { %5882 = vmatpush.bf16.msra.mxu3 %v8967_v12 }
 0x478   : > { %v4514_v44 = vpop.f32.mrf.mxu2 }
 0x479   : > { %v4240_v0 = vpop.f32.mrf.mxu3 }
 0x47a   : > { %v4254_v9 = vadd.f32 %v4253_v2, %v4240_v0 }
 0x47b   : > { %5883 = vmatpush.bf16.msra.mxu3 %v8966_v37 }
 0x47c   : > { %v4664_v50 = vpop.f32.mrf.mxu0  ;;  %v4257_v8 = vadd.f32 %v4254_v9, %v4120_v14  ;;  %v5923_v14 = vld [vmem:[%s11287_s7 + $0x60] sm:$0xff] }
 0x47d   : > { %v4665_v22 = vadd.f32 %v4664_v50, %v4651_v13  ;;  %v4653_v29 = vpop.f32.mrf.mxu1  ;;  %5931 = vmatpush.msrb.mxu0 %v5923_v14 }
 0x47e   : > { %v4394_v28 = vadd.f32 %v4391_v40, %v4257_v8  ;;  %v5916_v8 = vld [vmem:[%s11287_s7 + $0x28] sm:$0xff]  ;;  %v5915_v29 = vld [vmem:[%s11287_s7 + $0x20] sm:$0xff] }
 0x47f   : > { %5884 = vmatpush.bf16.msra.mxu3 %v8965_v38  ;;  %5932 = vmatpush.msrb.mxu0 %v5922_v23 }
 0x480   : > { %v4516_v45 = vpop.f32.mrf.mxu2 }
 0x481   : > { %v4242_v51 = vpop.f32.mrf.mxu3  ;;  %5933 = vmatpush.msrb.mxu0 %v5921_v27  ;;  %v5914_v45 = vld [vmem:[%s11287_s7 + $0x18] sm:$0xff] }
 0x482   : > { %v5912_v51 = vld [vmem:[%s11287_s7 + $0x8] sm:$0xff] }
 0x483   : > { %5885 = vmatpush.bf16.msra.mxu3 %v8964_v18  ;;  %v5920_v18 = vld [vmem:[%s11287_s7 + $0x48] sm:$0xff] }
 0x484   : > { %v4666_v5 = vpop.f32.mrf.mxu0  ;;  %5934 = vmatpush.msrb.mxu0 %v5920_v18 }
 0x485   : > { %v5913_v5 = vld [vmem:[%s11287_s7 + $0x10] sm:$0xff] }
 0x487   : > { %5886 = vmatpush.bf16.msra.mxu3 %v8963_v42 }
 0x489   : > { %v4941_v34 = vpop.f32.mrf.mxu1 }
 0x48b   : > { %5887 = vmatpush.bf16.msra.mxu3 %v8962_v17  ;;  %v5919_v17 = vld [vmem:[%s11287_s7 + $0x40] sm:$0xff] }
 0x48c   : > { %v4801_v20 = vpop.f32.mrf.mxu2  ;;  %5935 = vmatpush.msrb.mxu0 %v5919_v17 }
 0x48d   : > { %v4527_v62 = vpop.f32.mrf.mxu3 }
 0x48e   : > { %v4528_v53 = vadd.f32 %v4527_v62, %v4514_v44 }
 0x48f   : > { %5888 = vmatpush.bf16.msra.mxu3 %v8961_v19  ;;  %v5918_v19 = vld [vmem:[%s11287_s7 + $0x38] sm:$0xff] }
 0x490   : > { %v4531_v36 = vadd.f32 %v4528_v53, %v4394_v28  ;;  %5936 = vmatpush.msrb.mxu0 %v5918_v19 }
 0x491   : > { %v4943_v4 = vpop.f32.mrf.mxu1 }
 0x492   : > { %5889 = vmatmul.bf16.vlgmr.msra.gmra.mxu3 %v5797_v33  ;;  %v4668_v48 = vadd.f32 %v4665_v22, %v4531_v36  ;;  %v5917_v22 = vld [vmem:[%s11287_s7 + $0x30] sm:$0xff] }
 0x493   : > { %5937 = vmatpush.msrb.mxu0 %v5917_v22 }
 0x494   : > { %v4803_v26 = vpop.f32.mrf.mxu2 }
 0x495   : > { %v4529_v47 = vpop.f32.mrf.mxu3  ;;  %5938 = vmatpush.msrb.mxu0 %v5916_v8 }
 0x497   : > { %5939 = vmatpush.msrb.mxu0 %v5915_v29 }
 0x499   : > { %5940 = vmatpush.msrb.mxu0 %v5914_v45 }
 0x49b   : > { %5941 = vmatpush.msrb.mxu0 %v5913_v5 }
 0x49c   : > { %v4928_v7 = vpop.f32.mrf.mxu0 }
 0x49d   : > { %v4942_v24 = vadd.f32 %v4941_v34, %v4928_v7  ;;  %5942 = vmatpush.msrb.mxu0 %v5912_v51  ;;  %v5911_v34 = vld [vmem:[%s11287_s7] sm:$0xff] }
 0x49e   : > { %v5908_v7 = vld [vmem:[%s11286_s6] sm:$0x1] }
 0x49f   : > { %5943 = vmatpush.msrb.mxu0 %v5911_v34 }
 0x4a4   : > { %v4930_v31 = vpop.f32.mrf.mxu0 }
 0x4a9   : > { %v5205_v49 = vpop.f32.mrf.mxu1 }
 0x4ac   : > { %v5068_v52 = vpop.f32.mrf.mxu2 }
 0x4ad   : > { %v4788_v54 = vpop.f32.mrf.mxu3 }
 0x4ae   : > { %v4802_v55 = vadd.f32 %v4801_v20, %v4788_v54 }
 0x4b0   : > { %v5218_v30 = vpop.f32.mrf.mxu0  ;;  %v4805_v57 = vadd.f32 %v4802_v55, %v4668_v48 }
 0x4b1   : > { %v5219_v46 = vadd.f32 %v5218_v30, %v5205_v49  ;;  %v5207_v58 = vpop.f32.mrf.mxu1  ;;  %v5927_v30 = vld [vmem:[%s11288_s8] sm:$0x1] }
 0x4b2   : > { %v4945_v59 = vadd.f32 %v4942_v24, %v4805_v57 }
 0x4b4   : > { %v5070_v60 = vpop.f32.mrf.mxu2 }
 0x4b5   : > { %v4790_v3 = vpop.f32.mrf.mxu3 }
 0x4b8   : > { %v5220_v15 = vpop.f32.mrf.mxu0 }
 0x4bd   : > { %v5492_v56 = vpop.f32.mrf.mxu1 }
 0x4c0   : > { %v5355_v1 = vpop.f32.mrf.mxu2 }
 0x4c1   : > { %v5081_v21 = vpop.f32.mrf.mxu3 }
 0x4c2   : > { %v5082_v25 = vadd.f32 %v5081_v21, %v5068_v52 }
 0x4c4   : > { %v5085_v2 = vadd.f32 %v5082_v25, %v4945_v59 }
 0x4c5   : > { %v5494_v43 = vpop.f32.mrf.mxu1 }
 0x4c6   : > { %v5222_v16 = vadd.f32 %v5219_v46, %v5085_v2 }
 0x4c8   : > { %v5357_v61 = vpop.f32.mrf.mxu2 }
 0x4c9   : > { %v5083_v63 = vpop.f32.mrf.mxu3 }
 0x4d0   : > { %v5479_v6 = vpop.f32.mrf.mxu0 }
 0x4d1   : > { %v5493_v41 = vadd.f32 %v5492_v56, %v5479_v6 }
 0x4d8   : > { %v5481_v10 = vpop.f32.mrf.mxu0 }
 0x4dd   : > { %v5753_v12 = vpop.f32.mrf.mxu1 }
 0x4e0   : > { %v5616_v35 = vpop.f32.mrf.mxu2 }
 0x4e1   : > { %v5342_v37 = vpop.f32.mrf.mxu3 }
 0x4e2   : > { %v5356_v40 = vadd.f32 %v5355_v1, %v5342_v37 }
 0x4e4   : > { %v5766_v38 = vpop.f32.mrf.mxu0  ;;  %v5359_v42 = vadd.f32 %v5356_v40, %v5222_v16 }
 0x4e5   : > { %v5755_v13 = vpop.f32.mrf.mxu1  ;;  %v5767_v4 = vadd.f32 %v5766_v38, %v5753_v12 }
 0x4e6   : > { %v5496_v44 = vadd.f32 %v5493_v41, %v5359_v42 }
 0x4e8   : > { %v5618_v50 = vpop.f32.mrf.mxu2 }
 0x4e9   : > { %v5344_v0 = vpop.f32.mrf.mxu3 }
 0x4ec   : > { %v5768_v9 = vpop.f32.mrf.mxu0 }
 0x4f4   : > { %v5903_v33 = vpop.f32.mrf.mxu2 }
 0x4f5   : > { %v5629_v28 = vpop.f32.mrf.mxu3 }
 0x4f6   : > { %v5630_v53 = vadd.f32 %v5629_v28, %v5616_v35 }
 0x4f8   : > { %v5633_v36 = vadd.f32 %v5630_v53, %v5496_v44 }
 0x4fa   : > { %v5770_v26 = vadd.f32 %v5767_v4, %v5633_v36 }
 0x4fc   : > { %v5905_v20 = vpop.f32.mrf.mxu2 }
 0x4fd   : > { %v5631_v62 = vpop.f32.mrf.mxu3 }
 0x515   : > { %v5890_v48 = vpop.f32.mrf.mxu3 }
 0x516   : > { %v5904_v47 = vadd.f32 %v5903_v33, %v5890_v48 }
 0x518   : > { %v5907_v24 = vadd.f32 %v5904_v47, %v5770_v26 }
 0x51a   : > { %v5909_v31 = vadd.f32 %v5908_v7, %v5907_v24 }
 0x51c   : > { %v5910_v49 = vmax.f32 %v5909_v31, 0.0 }
 0x51d   : > { %v5892_v52 = vpop.f32.mrf.mxu3 }
 0x51e   : > { %5944 = vmatmul.f32.vlgmr.msrb.gmra.mxu0 %v5910_v49 }
 0x59b   : > { %v5945_v54 = vpop.f32.mrf.mxu0 }
 0x59c   : > { %v5946_v46 = vadd.f32 %v5945_v54, %v5927_v30 }
 0x59e   : > { %v5948_v55 = vmax.f32 %v5946_v46, 0.0 }
 0x5a0   : > { %v5950_v57 = vsel %vm5949_vm15, %v5948_v55, -inf }
 0x5a1   : > { %5951 = vmax.xlane.f32.xlu2 %v5950_v57 }
 0x614   : > { %v5952_v58 = vpop.xlane.xlu2 %5951 }
 0x615   : > { %v5953_v59 = vsub.f32 %v5948_v55, %v5952_v58 }
 0x617   : > { %v5954_v60 = vmul.f32 1.442695, %v5953_v59 }
 0x619   : > { %9018 = vpow2.f32 %v5954_v60 }
 0x61f   : > { %v9019_v15 = vpop.eup %9018 }
 0x620   : > { %v5956_v3 = vsel %vm5949_vm15, %v9019_v15, 0.0 }
 0x621   : > { %5957 = vadd.xlane.f32.xlu0 %v5956_v3 }
 0x694   : > { %v5958_v56 = vpop.xlane.xlu0 %5957 }
 0x695   : > { %9020 = vlog2.f32 %v5958_v56 }
 0x69b   : > { %v9021_v1 = vpop.eup %9020 }
 0x69c   : > { %v5960_v21 = vmul.f32 0.6931472, %v9021_v1 }
 0x69e   : > { %v5961_v25 = vsub.f32 %v5953_v59, %v5960_v21 }
 0x6a0   : > { %5962 = vst.msk [vmem:[%s324_s14] sm:$0x1] %vm5949_vm15, %v5961_v25 }
 0x6a1   : > { %9049 = shalt.err (!%p9046_p3)
}
 0x6a2   : > { %8973 = dma.vmem_to_hbm [thread:$0]  (%p9177_p5), %s5975_s16, 16, %s5977_s17, %s5964_s21  }
 0x6a3 PF: > { %p8979_p4 = scmp.ge.s32.totalorder %s9084_s12, 2  ;;  %s5988_s26 = sand.u32 1, %s9072_s30  }
 0x6a4   : > { %s5989_s29 = scalar_lea.sflag [#allocation3], %s5988_s26 }
 0x6a5   : > { %p8976_p7 = pnand %p8979_p4, %p9181_p6 }
 0x6a7   : > { %p8977_p8 = pneg %p8976_p7 }
 0x6a9   : > { %9067 = dma.done.wait (%p8977_p8), %s5989_s29, 16  }
 0x6aa   : > { %9069 = vsyncadd (%p8977_p8), %s5989_s29, 4294967280  ;;  %p19_p9 = scmp.ge.s32.totalorder %s9164_s15, 4   ;;  %s11292_s30 = smov %s9076_s10 }
 0x6ab   : > { %s11293_s10 = smov %s9080_s11  ;;  %s11294_s11 = smov %s9175_s18 }
 0x6ac   : > { %s11295_s12 = smov %s9164_s15  ;;  %21 = sbr.rel (!%p19_p9) target bundleno = 3 (0x3), region = 125 }
 0x6b1   :  { %5994 = vsyncpa [#allocation3], 1 }
 0x6b2   :  { %5996 = vsyncpa [#allocation3 + $0x1], 1 }

</bundles_post_ra>
